<compile_context>
chip_gen: v7x
topology: tpu7x:2x2x1
jax: 0.10.0
libtpu: 0.0.40
codegen_flags: <defaults>
</compile_context>

<pallas_src>
import numpy as np
import jax
import jax.numpy as jnp
from jax.experimental import pallas as pl
from jax.experimental.pallas import tpu as pltpu


TBLK_TARGET = 16     # time steps per grid iteration (static unroll)
BTILE_TARGET = 256   # batch rows per "parallel" batch tile


def _round_up(x, m):
    return ((x + m - 1) // m) * m


def _pad_gates_out(w, h, gs):
    """Remap the 4-gate output axis (..., 4*h) -> (..., 4*gs); PyTorch gate order
    (i, f, g, o) preserved, each gate occupying a gs-wide block."""
    lead = w.shape[:-1]
    w4 = jnp.reshape(w, lead + (4, h))
    w4 = jnp.pad(w4, [(0, 0)] * len(lead) + [(0, 0), (0, gs - h)])
    return jnp.reshape(w4, lead + (4 * gs,))


def _vmem_capacity_bytes():
    try:
        cap = int(getattr(pltpu.get_tpu_info(), "vmem_capacity_bytes", 0))
        if cap > 0:
            return cap
    except Exception:
        pass
    return 64 * 1024 * 1024          # conservative (v7x-sized) fallback


def _layer_vmem_bytes(tblk, btile, e_in, gs):
    """Approximate VMEM block footprint of one layer's pallas_call (bytes)."""
    x_in = 2 * tblk * btile * e_in * 2                      # x bf16, double-buffered
    wts = (e_in + gs) * 4 * gs * 2 + 4 * gs * 4             # W_ih + W_hh bf16 + bias f32
    lens = 2 * btile * 4
    outb = 2 * tblk * btile * gs * 2                        # out bf16, double-buffered
    state = 2 * 2 * btile * gs * 4                          # h_n, c_n f32
    zx = tblk * btile * 4 * gs * 4                          # f32 scratch
    return x_in + wts + lens + outb + state + zx


# ----------------------------------------------------------------------------
# Pallas kernel: one LSTM layer, fused input projection + serial recurrence.
# Grid = (batch_tiles "parallel", time_blocks "arbitrary").  h_n / c_n outputs
# (index depends only on the batch tile) carry the recurrent state across time
# blocks.  Padded time steps (t >= length[b]) neither update state nor produce
# output (zeroed), matching pack/pad_packed semantics.
# ----------------------------------------------------------------------------
def lstm_fused_kernel(tmax_ref, len_ref, x_ref, wih_ref, whh_ref, b_ref,
                      out_ref, h_ref, c_ref, zx_ref):
    tblk = x_ref.shape[0]
    gs = h_ref.shape[-1]                       # gate stride == state width
    b_idx = pl.program_id(0)                   # batch tile   ("parallel")
    t_idx = pl.program_id(1)                   # time block   ("arbitrary")
    t0 = t_idx * tblk

    @pl.when(t_idx == 0)
    def _init():                               # new batch tile: zero carried state
        h_ref[...] = jnp.zeros_like(h_ref)
        c_ref[...] = jnp.zeros_like(c_ref)

    tile_len = tmax_ref[b_idx]                 # scalar-prefetched per-tile max len

    @pl.when(t0 >= tile_len)
    def _skip():                               # block past every sequence in tile
        out_ref[...] = jnp.zeros_like(out_ref)

    @pl.when(t0 < tile_len)
    def _run():
        lens = len_ref[...]                    # (btile, 1) int32
        wih = wih_ref[...]                     # (e_in, 4*gs) bf16, resident
        whh = whh_ref[...]                     # (gs,   4*gs) bf16, resident
        bias = b_ref[...]                      # (1,    4*gs) f32,  resident

        # Fused input projection for the whole time block into VMEM scratch.
        # Independent of h, so the MXU work overlaps the serial chain below.
        for i in range(tblk):
            zx_ref[i] = jnp.dot(x_ref[i], wih,
                                preferred_element_type=jnp.float32) + bias

        h = h_ref[...]                         # (btile, gs) f32
        c = c_ref[...]
        for i in range(tblk):                  # statically unrolled recurrence
            z = zx_ref[i] + jnp.dot(h.astype(jnp.bfloat16), whh,
                                    preferred_element_type=jnp.float32)
            ig = jax.nn.sigmoid(z[:, 0 * gs:1 * gs])
            fg = jax.nn.sigmoid(z[:, 1 * gs:2 * gs])
            gg = jnp.tanh(z[:, 2 * gs:3 * gs])
            og = jax.nn.sigmoid(z[:, 3 * gs:4 * gs])
            c_new = fg * c + ig * gg
            h_new = og * jnp.tanh(c_new)
            valid = (t0 + i) < lens            # (btile, 1) bool
            h = jnp.where(valid, h_new, h)
            c = jnp.where(valid, c_new, c)
            out_ref[i] = jnp.where(valid, h_new,
                                   jnp.zeros_like(h_new)).astype(out_ref.dtype)
        h_ref[...] = h
        c_ref[...] = c


def _build_lstm_call(t_run, b_pad, e_in, gs, tblk, btile, vmem_limit,
                     single_buffer_weights):
    nb, nt = b_pad // btile, t_run // tblk

    def resident(shape):
        if single_buffer_weights:
            return pl.BlockSpec(shape, lambda b, t, tm: (0, 0),
                                pipeline_mode=pl.Buffered(1))
        return pl.BlockSpec(shape, lambda b, t, tm: (0, 0))

    grid_spec = pltpu.PrefetchScalarGridSpec(
        num_scalar_prefetch=1,                 # per-batch-tile max length (SMEM)
        grid=(nb, nt),
        in_specs=[
            pl.BlockSpec((btile, 1), lambda b, t, tm: (b, 0)),              # lengths
            pl.BlockSpec((tblk, btile, e_in), lambda b, t, tm: (t, b, 0)),  # x (bf16)
            resident((e_in, 4 * gs)),                                       # W_ih^T
            resident((gs, 4 * gs)),                                         # W_hh^T
            resident((1, 4 * gs)),                                          # bias
        ],
        out_specs=(
            pl.BlockSpec((tblk, btile, gs), lambda b, t, tm: (t, b, 0)),    # outputs
            pl.BlockSpec((btile, gs), lambda b, t, tm: (b, 0)),             # h_n
            pl.BlockSpec((btile, gs), lambda b, t, tm: (b, 0)),             # c_n
        ),
        scratch_shapes=[pltpu.VMEM((tblk, btile, 4 * gs), jnp.float32)],
    )
    return pl.pallas_call(
        lstm_fused_kernel,
        out_shape=(jax.ShapeDtypeStruct((t_run, b_pad, gs), jnp.bfloat16),
                   jax.ShapeDtypeStruct((b_pad, gs), jnp.float32),
                   jax.ShapeDtypeStruct((b_pad, gs), jnp.float32)),
        grid_spec=grid_spec,
        compiler_params=pltpu.CompilerParams(
            dimension_semantics=("parallel", "arbitrary"),
            vmem_limit_bytes=int(vmem_limit)),
    )


def lstm_layer_pallas(x, lens, tile_max, wih, whh, bias, gs, tblk, btile,
                      vmem_limit):
    """One LSTM layer.  x: (T_run, B_pad, E_in) bf16 -> (out bf16, h_n f32, c_n f32)."""
    t_run, b_pad, e_in = x.shape
    last_err = None
    for single in (True, False):       # prefer single-buffered resident weights
        try:
            call = _build_lstm_call(t_run, b_pad, e_in, gs, tblk, btile,
                                    vmem_limit, single)
            return call(tile_max, lens, x, wih, whh, bias)
        except Exception as err:       # fall back to default double-buffering
            last_err = err
    raise last_err


# ----------------------------------------------------------------------------
# Encoder: parameters + forward (embedding gather is plain-JAX glue; each LSTM
# layer is one Pallas call).
# ----------------------------------------------------------------------------
class EncoderPallas:
    def __init__(self, input_dim, emb_dim, hid_dim, n_layers, key):
        self.emb_dim = emb_dim
        self.hid_dim = hid_dim
        self.n_layers = n_layers
        # Gate stride: packed (stride H) when H < 128, lane-aligned otherwise.
        self.gate_stride = hid_dim if hid_dim < 128 else _round_up(hid_dim, 128)

        k_emb, *k_layers = jax.random.split(key, 1 + 4 * n_layers)
        # nn.Embedding default init: N(0, 1)
        self.embedding = jax.random.normal(k_emb, (input_dim, emb_dim), jnp.float32)

        # nn.LSTM default init: U(-1/sqrt(H), 1/sqrt(H)) for all params.
        bound = 1.0 / np.sqrt(hid_dim)
        H, GS = hid_dim, self.gate_stride
        self.raw_layers = []   # unpadded f32 params (used by the reference)
        self.layers = []       # kernel-ready padded / bf16 params
        for l in range(n_layers):
            in_dim = emb_dim if l == 0 else hid_dim
            in_dim_k = emb_dim if l == 0 else GS
            k0, k1, k2, k3 = k_layers[4 * l:4 * l + 4]
            w_ih = jax.random.uniform(k0, (4 * H, in_dim), jnp.float32, -bound, bound)
            w_hh = jax.random.uniform(k1, (4 * H, H), jnp.float32, -bound, bound)
            b_ih = jax.random.uniform(k2, (4 * H,), jnp.float32, -bound, bound)
            b_hh = jax.random.uniform(k3, (4 * H,), jnp.float32, -bound, bound)
            self.raw_layers.append((w_ih, w_hh, b_ih, b_hh))

            wih_t = _pad_gates_out(w_ih.T, H, GS)                 # (in_dim, 4*GS)
            wih_t = jnp.pad(wih_t, ((0, in_dim_k - in_dim), (0, 0)))
            whh_t = _pad_gates_out(w_hh.T, H, GS)                 # (H, 4*GS)
            whh_t = jnp.pad(whh_t, ((0, GS - H), (0, 0)))         # (GS, 4*GS)
            b = _pad_gates_out((b_ih + b_hh).reshape(1, 4 * H), H, GS)  # (1, 4*GS)
            self.layers.append((wih_t.astype(jnp.bfloat16),
                                whh_t.astype(jnp.bfloat16),
                                b.astype(jnp.float32)))

    def forward(self, src, src_lengths):
        """src: (B, T) int32; src_lengths: concrete host ints (like pack_padded).
        Returns (outputs (B, max_len, H), (h_n, c_n) each (n_layers, B, H))."""
        B, T = src.shape
        H, GS = self.hid_dim, self.gate_stride
        lengths_np = np.asarray(src_lengths, dtype=np.int32)
        max_len = int(lengths_np.max())

        # Generation-aware VMEM budget / tile selection (v7x: 64 MiB; v5e/v6e: 128).
        cap = _vmem_capacity_bytes()
        vmem_limit = min(int(cap * 0.85), cap - (2 << 20))
        block_budget = int(cap * 0.70)

        tblk = min(TBLK_TARGET, _round_up(max_len, 8))
        b_pad0 = _round_up(B, 8)
        btile = b_pad0 if b_pad0 <= BTILE_TARGET else BTILE_TARGET
        e_max = max(self.emb_dim, GS)
        while _layer_vmem_bytes(tblk, btile, e_max, GS) > block_budget:
            if tblk > 2:
                tblk = max(2, tblk // 2)
            elif btile > 8:
                btile = max(8, btile // 2)
            else:
                break
        b_pad = _round_up(b_pad0, btile)
        t_run = _round_up(max_len, tblk)
        nb = b_pad // btile

        lens_np = np.zeros((b_pad, 1), np.int32)
        lens_np[:B, 0] = lengths_np
        lens = jnp.asarray(lens_np)
        tile_max = jnp.asarray(
            lens_np.reshape(nb, btile).max(axis=1).astype(np.int32))

        # Embedding lookup (gather) — plain-JAX glue; time-major, padded, bf16.
        embedded = self.embedding[src]                          # (B, T, E) f32
        x = jnp.transpose(embedded, (1, 0, 2))[:max_len]        # (max_len, B, E)
        x = jnp.pad(x, ((0, t_run - max_len), (0, b_pad - B), (0, 0)))
        x = x.astype(jnp.bfloat16)

        h_list, c_list = [], []
        for (wih, whh, b) in self.layers:
            x, h_n, c_n = lstm_layer_pallas(x, lens, tile_max, wih, whh, b,
                                            GS, tblk, btile, vmem_limit)
            h_list.append(h_n)
            c_list.append(c_n)

        outputs = jnp.transpose(x.astype(jnp.float32), (1, 0, 2))[:B, :max_len, :H]
        h_n = jnp.stack(h_list, axis=0)[:, :B, :H]
        c_n = jnp.stack(c_list, axis=0)[:, :B, :H]
        return outputs, (h_n, c_n)


# ----------------------------------------------------------------------------
# Pure-JAX reference (same masked-LSTM math, bf16 matmul operands with f32
# accumulation, unpadded shapes) for correctness checking.
# ----------------------------------------------------------------------------
def reference_forward(enc, src, src_lengths):
    B, T = src.shape
    H = enc.hid_dim
    lengths = jnp.asarray(np.asarray(src_lengths, dtype=np.int32))
    max_len = int(np.asarray(src_lengths).max())
    bf16 = jnp.bfloat16

    x = jnp.transpose(enc.embedding[src], (1, 0, 2))            # (T, B, E)
    h_list, c_list = [], []
    for (w_ih, w_hh, b_ih, b_hh) in enc.raw_layers:
        wih_t = w_ih.T.astype(bf16)
        whh_t = w_hh.T.astype(bf16)
        b = (b_ih + b_hh).reshape(1, 4 * H)
        h = jnp.zeros((B, H), jnp.float32)
        c = jnp.zeros((B, H), jnp.float32)
        outs = []
        for t in range(max_len):
            zx = jnp.dot(x[t].astype(bf16), wih_t,
                         preferred_element_type=jnp.float32) + b
            z = zx + jnp.dot(h.astype(bf16), whh_t,
                             preferred_element_type=jnp.float32)
            i = jax.nn.sigmoid(z[:, 0 * H:1 * H])
            f = jax.nn.sigmoid(z[:, 1 * H:2 * H])
            g = jnp.tanh(z[:, 2 * H:3 * H])
            o = jax.nn.sigmoid(z[:, 3 * H:4 * H])
            c_new = f * c + i * g
            h_new = o * jnp.tanh(c_new)
            valid = (t < lengths)[:, None]
            h = jnp.where(valid, h_new, h)
            c = jnp.where(valid, c_new, c)
            outs.append(jnp.where(valid, h_new, jnp.zeros_like(h_new)))
        x = jnp.stack(outs, axis=0)                             # (max_len, B, H)
        h_list.append(h)
        c_list.append(c)
    outputs = jnp.transpose(x, (1, 0, 2))
    return outputs, (jnp.stack(h_list, 0), jnp.stack(c_list, 0))


if __name__ == "__main__":
    # Small deterministic problem: vocab=20, B=2, T=8, E=32, H=32, 2 layers.
    input_dim, emb_dim, hid_dim, n_layers = 20, 32, 32, 2
    B, T = 2, 8

    key = jax.random.PRNGKey(0)
    k_params, k_src = jax.random.split(key)
    enc = EncoderPallas(input_dim, emb_dim, hid_dim, n_layers, k_params)

    src = jax.random.randint(k_src, (B, T), 0, input_dim, dtype=jnp.int32)
    src_lengths = np.array([8, 5], dtype=np.int32)

    outputs, (h_n, c_n) = enc.forward(src, src_lengths)
    jax.block_until_ready((outputs, h_n, c_n))

    ref_out, (ref_h, ref_c) = reference_forward(enc, src, src_lengths)
    np.testing.assert_allclose(np.asarray(outputs), np.asarray(ref_out),
                               rtol=5e-3, atol=5e-3)
    np.testing.assert_allclose(np.asarray(h_n), np.asarray(ref_h),
                               rtol=5e-3, atol=5e-3)
    np.testing.assert_allclose(np.asarray(c_n), np.asarray(ref_c),
                               rtol=5e-3, atol=5e-3)

    assert outputs.shape == (B, int(src_lengths.max()), hid_dim)
    assert h_n.shape == (n_layers, B, hid_dim)
    assert c_n.shape == (n_layers, B, hid_dim)
    print("KERNEL_OK")
</pallas_src>

<mosaic_0001>
module attributes {stable_mosaic.version = 11 : i64} {
  func.func @lstm_fused_kernel(%arg0: i32, %arg1: i32, %arg2: memref<1xi32, #tpu.memory_space<smem>>, %arg3: memref<8x1xi32, #tpu.memory_space<vmem>>, %arg4: memref<8x8x32xbf16, #tpu.memory_space<vmem>>, %arg5: memref<32x128xbf16, #tpu.memory_space<vmem>>, %arg6: memref<32x128xbf16, #tpu.memory_space<vmem>>, %arg7: memref<1x128xf32, #tpu.memory_space<vmem>>, %arg8: memref<8x8x32xbf16, #tpu.memory_space<vmem>>, %arg9: memref<8x32xf32, #tpu.memory_space<vmem>>, %arg10: memref<8x32xf32, #tpu.memory_space<vmem>>, %arg11: memref<8x8x128xf32, #tpu.memory_space<vmem>>) attributes {dimension_semantics = [#tpu.dimension_semantics<parallel>, #tpu.dimension_semantics<arbitrary>], iteration_bounds = array<i64: 1, 1>, scalar_prefetch = 1 : i64, scratch_operands = 1 : i64, tpu.core_type = #tpu.core_type<tc>, window_params = [{transform_indices = @transform_0, window_bounds = array<i64: 8, 1>}, {transform_indices = @transform_1, window_bounds = array<i64: 8, 8, 32>}, {pipeline_mode = #tpu.pipeline_mode<synchronous>, transform_indices = @transform_2, window_bounds = array<i64: 32, 128>}, {pipeline_mode = #tpu.pipeline_mode<synchronous>, transform_indices = @transform_3, window_bounds = array<i64: 32, 128>}, {pipeline_mode = #tpu.pipeline_mode<synchronous>, transform_indices = @transform_4, window_bounds = array<i64: 1, 128>}, {transform_indices = @transform_5, window_bounds = array<i64: 8, 8, 32>}, {transform_indices = @transform_6, window_bounds = array<i64: 8, 32>}, {transform_indices = @transform_7, window_bounds = array<i64: 8, 32>}]} {
    %c8_i32 = arith.constant 8 : i32
    %0 = arith.muli %arg1, %c8_i32 : i32
    %c0_i32 = arith.constant 0 : i32
    %1 = arith.cmpi eq, %arg1, %c0_i32 : i32
    %2 = arith.extui %1 : i1 to i32
    %c0_i32_0 = arith.constant 0 : i32
    %3 = arith.cmpi ne, %2, %c0_i32_0 : i32
    scf.if %3 {
      %cst = arith.constant 0.000000e+00 : f32
      %12 = vector.broadcast %cst : f32 to vector<8x32xf32>
      %c0 = arith.constant 0 : index
      %c0_3 = arith.constant 0 : index
      %13 = vector.load %arg9[%c0, %c0_3] : memref<8x32xf32, #tpu.memory_space<vmem>>, vector<8x32xf32>
      tpu.vector_store %arg9[%c0, %c0_3], %12 {strides = array<i32>} : memref<8x32xf32, #tpu.memory_space<vmem>>, vector<8x32xf32>,
      %cst_4 = arith.constant 0.000000e+00 : f32
      %14 = vector.broadcast %cst_4 : f32 to vector<8x32xf32>
      %c0_5 = arith.constant 0 : index
      %c0_6 = arith.constant 0 : index
      %15 = vector.load %arg10[%c0_5, %c0_6] : memref<8x32xf32, #tpu.memory_space<vmem>>, vector<8x32xf32>
      tpu.vector_store %arg10[%c0_5, %c0_6], %14 {strides = array<i32>} : memref<8x32xf32, #tpu.memory_space<vmem>>, vector<8x32xf32>,
    } else {
    }
    %4 = arith.index_cast %arg0 : i32 to index
    %5 = memref.load %arg2[%4] : memref<1xi32, #tpu.memory_space<smem>>
    %6 = arith.cmpi sge, %0, %5 : i32
    %7 = arith.extui %6 : i1 to i32
    %c0_i32_1 = arith.constant 0 : i32
    %8 = arith.cmpi ne, %7, %c0_i32_1 : i32
    scf.if %8 {
      %cst = arith.constant 0.000000e+00 : bf16
      %12 = vector.broadcast %cst : bf16 to vector<8x8x32xbf16>
      %c0 = arith.constant 0 : index
      %c0_3 = arith.constant 0 : index
      %c0_4 = arith.constant 0 : index
      %13 = vector.load %arg8[%c0, %c0_3, %c0_4] : memref<8x8x32xbf16, #tpu.memory_space<vmem>>, vector<8x8x32xbf16>
      tpu.vector_store %arg8[%c0, %c0_3, %c0_4], %12 {strides = array<i32>} : memref<8x8x32xbf16, #tpu.memory_space<vmem>>, vector<8x8x32xbf16>,
    } else {
    }
    %9 = arith.cmpi slt, %0, %5 : i32
    %10 = arith.extui %9 : i1 to i32
    %c0_i32_2 = arith.constant 0 : i32
    %11 = arith.cmpi ne, %10, %c0_i32_2 : i32
    scf.if %11 {
      %c0 = arith.constant 0 : index
      %c0_3 = arith.constant 0 : index
      %12 = vector.load %arg3[%c0, %c0_3] : memref<8x1xi32, #tpu.memory_space<vmem>>, vector<8x1xi32>
      %c0_4 = arith.constant 0 : index
      %c0_5 = arith.constant 0 : index
      %13 = vector.load %arg5[%c0_4, %c0_5] : memref<32x128xbf16, #tpu.memory_space<vmem>>, vector<32x128xbf16>
      %c0_6 = arith.constant 0 : index
      %c0_7 = arith.constant 0 : index
      %14 = vector.load %arg6[%c0_6, %c0_7] : memref<32x128xbf16, #tpu.memory_space<vmem>>, vector<32x128xbf16>
      %c0_8 = arith.constant 0 : index
      %c0_9 = arith.constant 0 : index
      %15 = vector.load %arg7[%c0_8, %c0_9] : memref<1x128xf32, #tpu.memory_space<vmem>>, vector<1x128xf32>
      %c0_10 = arith.constant 0 : index
      %c0_11 = arith.constant 0 : index
      %c0_12 = arith.constant 0 : index
      %16 = vector.load %arg4[%c0_10, %c0_11, %c0_12] : memref<8x8x32xbf16, #tpu.memory_space<vmem>>, vector<1x8x32xbf16>
      %17 = vector.shape_cast %16 : vector<1x8x32xbf16> to vector<8x32xbf16>
      %cst = arith.constant dense<0.000000e+00> : vector<8x128xf32>
      %18 = tpu.matmul %17, %13, %cst {dimension_numbers = #tpu.dot_dimension_numbers<[1], [0], [0], [1], [0, 0, 1, 1], [], []>} : vector<8x32xbf16>, vector<32x128xbf16>, vector<8x128xf32> -> vector<8x128xf32>
      %19 = vector.broadcast %15 : vector<1x128xf32> to vector<8x128xf32>
      %20 = arith.addf %18, %19 : vector<8x128xf32>
      %c0_13 = arith.constant 0 : index
      %c0_14 = arith.constant 0 : index
      %c0_15 = arith.constant 0 : index
      %21 = vector.load %arg11[%c0_13, %c0_14, %c0_15] : memref<8x8x128xf32, #tpu.memory_space<vmem>>, vector<1x8x128xf32>
      %22 = vector.shape_cast %21 : vector<1x8x128xf32> to vector<8x128xf32>
      %23 = vector.shape_cast %20 : vector<8x128xf32> to vector<1x8x128xf32>
      tpu.vector_store %arg11[%c0_13, %c0_14, %c0_15], %23 {strides = array<i32>} : memref<8x8x128xf32, #tpu.memory_space<vmem>>, vector<1x8x128xf32>,
      %c1 = arith.constant 1 : index
      %c0_16 = arith.constant 0 : index
      %c0_17 = arith.constant 0 : index
      %24 = vector.load %arg4[%c1, %c0_16, %c0_17] : memref<8x8x32xbf16, #tpu.memory_space<vmem>>, vector<1x8x32xbf16>
      %25 = vector.shape_cast %24 : vector<1x8x32xbf16> to vector<8x32xbf16>
      %cst_18 = arith.constant dense<0.000000e+00> : vector<8x128xf32>
      %26 = tpu.matmul %25, %13, %cst_18 {dimension_numbers = #tpu.dot_dimension_numbers<[1], [0], [0], [1], [0, 0, 1, 1], [], []>} : vector<8x32xbf16>, vector<32x128xbf16>, vector<8x128xf32> -> vector<8x128xf32>
      %27 = vector.broadcast %15 : vector<1x128xf32> to vector<8x128xf32>
      %28 = arith.addf %26, %27 : vector<8x128xf32>
      %c1_19 = arith.constant 1 : index
      %c0_20 = arith.constant 0 : index
      %c0_21 = arith.constant 0 : index
      %29 = vector.load %arg11[%c1_19, %c0_20, %c0_21] : memref<8x8x128xf32, #tpu.memory_space<vmem>>, vector<1x8x128xf32>
      %30 = vector.shape_cast %29 : vector<1x8x128xf32> to vector<8x128xf32>
      %31 = vector.shape_cast %28 : vector<8x128xf32> to vector<1x8x128xf32>
      tpu.vector_store %arg11[%c1_19, %c0_20, %c0_21], %31 {strides = array<i32>} : memref<8x8x128xf32, #tpu.memory_space<vmem>>, vector<1x8x128xf32>,
      %c2 = arith.constant 2 : index
      %c0_22 = arith.constant 0 : index
      %c0_23 = arith.constant 0 : index
      %32 = vector.load %arg4[%c2, %c0_22, %c0_23] : memref<8x8x32xbf16, #tpu.memory_space<vmem>>, vector<1x8x32xbf16>
      %33 = vector.shape_cast %32 : vector<1x8x32xbf16> to vector<8x32xbf16>
      %cst_24 = arith.constant dense<0.000000e+00> : vector<8x128xf32>
      %34 = tpu.matmul %33, %13, %cst_24 {dimension_numbers = #tpu.dot_dimension_numbers<[1], [0], [0], [1], [0, 0, 1, 1], [], []>} : vector<8x32xbf16>, vector<32x128xbf16>, vector<8x128xf32> -> vector<8x128xf32>
      %35 = vector.broadcast %15 : vector<1x128xf32> to vector<8x128xf32>
      %36 = arith.addf %34, %35 : vector<8x128xf32>
      %c2_25 = arith.constant 2 : index
      %c0_26 = arith.constant 0 : index
      %c0_27 = arith.constant 0 : index
      %37 = vector.load %arg11[%c2_25, %c0_26, %c0_27] : memref<8x8x128xf32, #tpu.memory_space<vmem>>, vector<1x8x128xf32>
      %38 = vector.shape_cast %37 : vector<1x8x128xf32> to vector<8x128xf32>
      %39 = vector.shape_cast %36 : vector<8x128xf32> to vector<1x8x128xf32>
      tpu.vector_store %arg11[%c2_25, %c0_26, %c0_27], %39 {strides = array<i32>} : memref<8x8x128xf32, #tpu.memory_space<vmem>>, vector<1x8x128xf32>,
      %c3 = arith.constant 3 : index
      %c0_28 = arith.constant 0 : index
      %c0_29 = arith.constant 0 : index
      %40 = vector.load %arg4[%c3, %c0_28, %c0_29] : memref<8x8x32xbf16, #tpu.memory_space<vmem>>, vector<1x8x32xbf16>
      %41 = vector.shape_cast %40 : vector<1x8x32xbf16> to vector<8x32xbf16>
      %cst_30 = arith.constant dense<0.000000e+00> : vector<8x128xf32>
      %42 = tpu.matmul %41, %13, %cst_30 {dimension_numbers = #tpu.dot_dimension_numbers<[1], [0], [0], [1], [0, 0, 1, 1], [], []>} : vector<8x32xbf16>, vector<32x128xbf16>, vector<8x128xf32> -> vector<8x128xf32>
      %43 = vector.broadcast %15 : vector<1x128xf32> to vector<8x128xf32>
      %44 = arith.addf %42, %43 : vector<8x128xf32>
      %c3_31 = arith.constant 3 : index
      %c0_32 = arith.constant 0 : index
      %c0_33 = arith.constant 0 : index
      %45 = vector.load %arg11[%c3_31, %c0_32, %c0_33] : memref<8x8x128xf32, #tpu.memory_space<vmem>>, vector<1x8x128xf32>
      %46 = vector.shape_cast %45 : vector<1x8x128xf32> to vector<8x128xf32>
      %47 = vector.shape_cast %44 : vector<8x128xf32> to vector<1x8x128xf32>
      tpu.vector_store %arg11[%c3_31, %c0_32, %c0_33], %47 {strides = array<i32>} : memref<8x8x128xf32, #tpu.memory_space<vmem>>, vector<1x8x128xf32>,
      %c4 = arith.constant 4 : index
      %c0_34 = arith.constant 0 : index
      %c0_35 = arith.constant 0 : index
      %48 = vector.load %arg4[%c4, %c0_34, %c0_35] : memref<8x8x32xbf16, #tpu.memory_space<vmem>>, vector<1x8x32xbf16>
      %49 = vector.shape_cast %48 : vector<1x8x32xbf16> to vector<8x32xbf16>
      %cst_36 = arith.constant dense<0.000000e+00> : vector<8x128xf32>
      %50 = tpu.matmul %49, %13, %cst_36 {dimension_numbers = #tpu.dot_dimension_numbers<[1], [0], [0], [1], [0, 0, 1, 1], [], []>} : vector<8x32xbf16>, vector<32x128xbf16>, vector<8x128xf32> -> vector<8x128xf32>
      %51 = vector.broadcast %15 : vector<1x128xf32> to vector<8x128xf32>
      %52 = arith.addf %50, %51 : vector<8x128xf32>
      %c4_37 = arith.constant 4 : index
      %c0_38 = arith.constant 0 : index
      %c0_39 = arith.constant 0 : index
      %53 = vector.load %arg11[%c4_37, %c0_38, %c0_39] : memref<8x8x128xf32, #tpu.memory_space<vmem>>, vector<1x8x128xf32>
      %54 = vector.shape_cast %53 : vector<1x8x128xf32> to vector<8x128xf32>
      %55 = vector.shape_cast %52 : vector<8x128xf32> to vector<1x8x128xf32>
      tpu.vector_store %arg11[%c4_37, %c0_38, %c0_39], %55 {strides = array<i32>} : memref<8x8x128xf32, #tpu.memory_space<vmem>>, vector<1x8x128xf32>,
      %c5 = arith.constant 5 : index
      %c0_40 = arith.constant 0 : index
      %c0_41 = arith.constant 0 : index
      %56 = vector.load %arg4[%c5, %c0_40, %c0_41] : memref<8x8x32xbf16, #tpu.memory_space<vmem>>, vector<1x8x32xbf16>
      %57 = vector.shape_cast %56 : vector<1x8x32xbf16> to vector<8x32xbf16>
      %cst_42 = arith.constant dense<0.000000e+00> : vector<8x128xf32>
      %58 = tpu.matmul %57, %13, %cst_42 {dimension_numbers = #tpu.dot_dimension_numbers<[1], [0], [0], [1], [0, 0, 1, 1], [], []>} : vector<8x32xbf16>, vector<32x128xbf16>, vector<8x128xf32> -> vector<8x128xf32>
      %59 = vector.broadcast %15 : vector<1x128xf32> to vector<8x128xf32>
      %60 = arith.addf %58, %59 : vector<8x128xf32>
      %c5_43 = arith.constant 5 : index
      %c0_44 = arith.constant 0 : index
      %c0_45 = arith.constant 0 : index
      %61 = vector.load %arg11[%c5_43, %c0_44, %c0_45] : memref<8x8x128xf32, #tpu.memory_space<vmem>>, vector<1x8x128xf32>
      %62 = vector.shape_cast %61 : vector<1x8x128xf32> to vector<8x128xf32>
      %63 = vector.shape_cast %60 : vector<8x128xf32> to vector<1x8x128xf32>
      tpu.vector_store %arg11[%c5_43, %c0_44, %c0_45], %63 {strides = array<i32>} : memref<8x8x128xf32, #tpu.memory_space<vmem>>, vector<1x8x128xf32>,
      %c6 = arith.constant 6 : index
      %c0_46 = arith.constant 0 : index
      %c0_47 = arith.constant 0 : index
      %64 = vector.load %arg4[%c6, %c0_46, %c0_47] : memref<8x8x32xbf16, #tpu.memory_space<vmem>>, vector<1x8x32xbf16>
      %65 = vector.shape_cast %64 : vector<1x8x32xbf16> to vector<8x32xbf16>
      %cst_48 = arith.constant dense<0.000000e+00> : vector<8x128xf32>
      %66 = tpu.matmul %65, %13, %cst_48 {dimension_numbers = #tpu.dot_dimension_numbers<[1], [0], [0], [1], [0, 0, 1, 1], [], []>} : vector<8x32xbf16>, vector<32x128xbf16>, vector<8x128xf32> -> vector<8x128xf32>
      %67 = vector.broadcast %15 : vector<1x128xf32> to vector<8x128xf32>
      %68 = arith.addf %66, %67 : vector<8x128xf32>
      %c6_49 = arith.constant 6 : index
      %c0_50 = arith.constant 0 : index
      %c0_51 = arith.constant 0 : index
      %69 = vector.load %arg11[%c6_49, %c0_50, %c0_51] : memref<8x8x128xf32, #tpu.memory_space<vmem>>, vector<1x8x128xf32>
      %70 = vector.shape_cast %69 : vector<1x8x128xf32> to vector<8x128xf32>
      %71 = vector.shape_cast %68 : vector<8x128xf32> to vector<1x8x128xf32>
      tpu.vector_store %arg11[%c6_49, %c0_50, %c0_51], %71 {strides = array<i32>} : memref<8x8x128xf32, #tpu.memory_space<vmem>>, vector<1x8x128xf32>,
      %c7 = arith.constant 7 : index
      %c0_52 = arith.constant 0 : index
      %c0_53 = arith.constant 0 : index
      %72 = vector.load %arg4[%c7, %c0_52, %c0_53] : memref<8x8x32xbf16, #tpu.memory_space<vmem>>, vector<1x8x32xbf16>
      %73 = vector.shape_cast %72 : vector<1x8x32xbf16> to vector<8x32xbf16>
      %cst_54 = arith.constant dense<0.000000e+00> : vector<8x128xf32>
      %74 = tpu.matmul %73, %13, %cst_54 {dimension_numbers = #tpu.dot_dimension_numbers<[1], [0], [0], [1], [0, 0, 1, 1], [], []>} : vector<8x32xbf16>, vector<32x128xbf16>, vector<8x128xf32> -> vector<8x128xf32>
      %75 = vector.broadcast %15 : vector<1x128xf32> to vector<8x128xf32>
      %76 = arith.addf %74, %75 : vector<8x128xf32>
      %c7_55 = arith.constant 7 : index
      %c0_56 = arith.constant 0 : index
      %c0_57 = arith.constant 0 : index
      %77 = vector.load %arg11[%c7_55, %c0_56, %c0_57] : memref<8x8x128xf32, #tpu.memory_space<vmem>>, vector<1x8x128xf32>
      %78 = vector.shape_cast %77 : vector<1x8x128xf32> to vector<8x128xf32>
      %79 = vector.shape_cast %76 : vector<8x128xf32> to vector<1x8x128xf32>
      tpu.vector_store %arg11[%c7_55, %c0_56, %c0_57], %79 {strides = array<i32>} : memref<8x8x128xf32, #tpu.memory_space<vmem>>, vector<1x8x128xf32>,
      %c0_58 = arith.constant 0 : index
      %c0_59 = arith.constant 0 : index
      %80 = vector.load %arg9[%c0_58, %c0_59] : memref<8x32xf32, #tpu.memory_space<vmem>>, vector<8x32xf32>
      %c0_60 = arith.constant 0 : index
      %c0_61 = arith.constant 0 : index
      %81 = vector.load %arg10[%c0_60, %c0_61] : memref<8x32xf32, #tpu.memory_space<vmem>>, vector<8x32xf32>
      %c0_62 = arith.constant 0 : index
      %c0_63 = arith.constant 0 : index
      %c0_64 = arith.constant 0 : index
      %82 = vector.load %arg11[%c0_62, %c0_63, %c0_64] : memref<8x8x128xf32, #tpu.memory_space<vmem>>, vector<1x8x128xf32>
      %83 = vector.shape_cast %82 : vector<1x8x128xf32> to vector<8x128xf32>
      %84 = arith.truncf %80 : vector<8x32xf32> to vector<8x32xbf16>
      %cst_65 = arith.constant dense<0.000000e+00> : vector<8x128xf32>
      %85 = tpu.matmul %84, %14, %cst_65 {dimension_numbers = #tpu.dot_dimension_numbers<[1], [0], [0], [1], [0, 0, 1, 1], [], []>} : vector<8x32xbf16>, vector<32x128xbf16>, vector<8x128xf32> -> vector<8x128xf32>
      %86 = arith.addf %83, %85 : vector<8x128xf32>
      %87 = vector.extract_strided_slice %86 {offsets = [0, 0], sizes = [8, 32], strides = [1, 1]} : vector<8x128xf32> to vector<8x32xf32>
      %88 = arith.negf %87 : vector<8x32xf32>
      %89 = math.exp %88 : vector<8x32xf32>
      %cst_66 = arith.constant 1.000000e+00 : f32
      %90 = vector.broadcast %cst_66 : f32 to vector<8x32xf32>
      %91 = arith.addf %90, %89 : vector<8x32xf32>
      %92 = arith.divf %90, %91 : vector<8x32xf32>
      %93 = vector.extract_strided_slice %86 {offsets = [0, 32], sizes = [8, 32], strides = [1, 1]} : vector<8x128xf32> to vector<8x32xf32>
      %94 = arith.negf %93 : vector<8x32xf32>
      %95 = math.exp %94 : vector<8x32xf32>
      %cst_67 = arith.constant 1.000000e+00 : f32
      %96 = vector.broadcast %cst_67 : f32 to vector<8x32xf32>
      %97 = arith.addf %96, %95 : vector<8x32xf32>
      %98 = arith.divf %96, %97 : vector<8x32xf32>
      %99 = vector.extract_strided_slice %86 {offsets = [0, 64], sizes = [8, 32], strides = [1, 1]} : vector<8x128xf32> to vector<8x32xf32>
      %100 = math.tanh %99 : vector<8x32xf32>
      %101 = vector.extract_strided_slice %86 {offsets = [0, 96], sizes = [8, 32], strides = [1, 1]} : vector<8x128xf32> to vector<8x32xf32>
      %102 = arith.negf %101 : vector<8x32xf32>
      %103 = math.exp %102 : vector<8x32xf32>
      %cst_68 = arith.constant 1.000000e+00 : f32
      %104 = vector.broadcast %cst_68 : f32 to vector<8x32xf32>
      %105 = arith.addf %104, %103 : vector<8x32xf32>
      %106 = arith.divf %104, %105 : vector<8x32xf32>
      %107 = arith.mulf %98, %81 : vector<8x32xf32>
      %108 = arith.mulf %92, %100 : vector<8x32xf32>
      %109 = arith.addf %107, %108 : vector<8x32xf32>
      %110 = math.tanh %109 : vector<8x32xf32>
      %111 = arith.mulf %106, %110 : vector<8x32xf32>
      %c0_i32_69 = arith.constant 0 : i32
      %112 = arith.addi %0, %c0_i32_69 : i32
      %113 = vector.broadcast %112 : i32 to vector<8x1xi32>
      %114 = arith.cmpi slt, %113, %12 : vector<8x1xi32>
      %115 = vector.shape_cast %114 : vector<8x1xi1> to vector<8x1xi1>
      %116 = vector.broadcast %115 : vector<8x1xi1> to vector<8x32xi1>
      %117 = arith.select %116, %111, %80 : vector<8x32xi1>, vector<8x32xf32>
      %118 = vector.shape_cast %114 : vector<8x1xi1> to vector<8x1xi1>
      %119 = vector.broadcast %118 : vector<8x1xi1> to vector<8x32xi1>
      %120 = arith.select %119, %109, %81 : vector<8x32xi1>, vector<8x32xf32>
      %cst_70 = arith.constant 0.000000e+00 : f32
      %121 = vector.broadcast %cst_70 : f32 to vector<8x32xf32>
      %122 = vector.shape_cast %114 : vector<8x1xi1> to vector<8x1xi1>
      %123 = vector.broadcast %122 : vector<8x1xi1> to vector<8x32xi1>
      %124 = arith.select %123, %111, %121 : vector<8x32xi1>, vector<8x32xf32>
      %125 = arith.truncf %124 : vector<8x32xf32> to vector<8x32xbf16>
      %c0_71 = arith.constant 0 : index
      %c0_72 = arith.constant 0 : index
      %c0_73 = arith.constant 0 : index
      %126 = vector.load %arg8[%c0_71, %c0_72, %c0_73] : memref<8x8x32xbf16, #tpu.memory_space<vmem>>, vector<1x8x32xbf16>
      %127 = vector.shape_cast %126 : vector<1x8x32xbf16> to vector<8x32xbf16>
      %128 = vector.shape_cast %125 : vector<8x32xbf16> to vector<1x8x32xbf16>
      tpu.vector_store %arg8[%c0_71, %c0_72, %c0_73], %128 {strides = array<i32>} : memref<8x8x32xbf16, #tpu.memory_space<vmem>>, vector<1x8x32xbf16>,
      %c1_74 = arith.constant 1 : index
      %c0_75 = arith.constant 0 : index
      %c0_76 = arith.constant 0 : index
      %129 = vector.load %arg11[%c1_74, %c0_75, %c0_76] : memref<8x8x128xf32, #tpu.memory_space<vmem>>, vector<1x8x128xf32>
      %130 = vector.shape_cast %129 : vector<1x8x128xf32> to vector<8x128xf32>
      %131 = arith.truncf %117 : vector<8x32xf32> to vector<8x32xbf16>
      %cst_77 = arith.constant dense<0.000000e+00> : vector<8x128xf32>
      %132 = tpu.matmul %131, %14, %cst_77 {dimension_numbers = #tpu.dot_dimension_numbers<[1], [0], [0], [1], [0, 0, 1, 1], [], []>} : vector<8x32xbf16>, vector<32x128xbf16>, vector<8x128xf32> -> vector<8x128xf32>
      %133 = arith.addf %130, %132 : vector<8x128xf32>
      %134 = vector.extract_strided_slice %133 {offsets = [0, 0], sizes = [8, 32], strides = [1, 1]} : vector<8x128xf32> to vector<8x32xf32>
      %135 = arith.negf %134 : vector<8x32xf32>
      %136 = math.exp %135 : vector<8x32xf32>
      %cst_78 = arith.constant 1.000000e+00 : f32
      %137 = vector.broadcast %cst_78 : f32 to vector<8x32xf32>
      %138 = arith.addf %137, %136 : vector<8x32xf32>
      %139 = arith.divf %137, %138 : vector<8x32xf32>
      %140 = vector.extract_strided_slice %133 {offsets = [0, 32], sizes = [8, 32], strides = [1, 1]} : vector<8x128xf32> to vector<8x32xf32>
      %141 = arith.negf %140 : vector<8x32xf32>
      %142 = math.exp %141 : vector<8x32xf32>
      %cst_79 = arith.constant 1.000000e+00 : f32
      %143 = vector.broadcast %cst_79 : f32 to vector<8x32xf32>
      %144 = arith.addf %143, %142 : vector<8x32xf32>
      %145 = arith.divf %143, %144 : vector<8x32xf32>
      %146 = vector.extract_strided_slice %133 {offsets = [0, 64], sizes = [8, 32], strides = [1, 1]} : vector<8x128xf32> to vector<8x32xf32>
      %147 = math.tanh %146 : vector<8x32xf32>
      %148 = vector.extract_strided_slice %133 {offsets = [0, 96], sizes = [8, 32], strides = [1, 1]} : vector<8x128xf32> to vector<8x32xf32>
      %149 = arith.negf %148 : vector<8x32xf32>
      %150 = math.exp %149 : vector<8x32xf32>
      %cst_80 = arith.constant 1.000000e+00 : f32
      %151 = vector.broadcast %cst_80 : f32 to vector<8x32xf32>
      %152 = arith.addf %151, %150 : vector<8x32xf32>
      %153 = arith.divf %151, %152 : vector<8x32xf32>
      %154 = arith.mulf %145, %120 : vector<8x32xf32>
      %155 = arith.mulf %139, %147 : vector<8x32xf32>
      %156 = arith.addf %154, %155 : vector<8x32xf32>
      %157 = math.tanh %156 : vector<8x32xf32>
      %158 = arith.mulf %153, %157 : vector<8x32xf32>
      %c1_i32 = arith.constant 1 : i32
      %159 = arith.addi %0, %c1_i32 : i32
      %160 = vector.broadcast %159 : i32 to vector<8x1xi32>
      %161 = arith.cmpi slt, %160, %12 : vector<8x1xi32>
      %162 = vector.shape_cast %161 : vector<8x1xi1> to vector<8x1xi1>
      %163 = vector.broadcast %162 : vector<8x1xi1> to vector<8x32xi1>
      %164 = arith.select %163, %158, %117 : vector<8x32xi1>, vector<8x32xf32>
      %165 = vector.shape_cast %161 : vector<8x1xi1> to vector<8x1xi1>
      %166 = vector.broadcast %165 : vector<8x1xi1> to vector<8x32xi1>
      %167 = arith.select %166, %156, %120 : vector<8x32xi1>, vector<8x32xf32>
      %cst_81 = arith.constant 0.000000e+00 : f32
      %168 = vector.broadcast %cst_81 : f32 to vector<8x32xf32>
      %169 = vector.shape_cast %161 : vector<8x1xi1> to vector<8x1xi1>
      %170 = vector.broadcast %169 : vector<8x1xi1> to vector<8x32xi1>
      %171 = arith.select %170, %158, %168 : vector<8x32xi1>, vector<8x32xf32>
      %172 = arith.truncf %171 : vector<8x32xf32> to vector<8x32xbf16>
      %c1_82 = arith.constant 1 : index
      %c0_83 = arith.constant 0 : index
      %c0_84 = arith.constant 0 : index
      %173 = vector.load %arg8[%c1_82, %c0_83, %c0_84] : memref<8x8x32xbf16, #tpu.memory_space<vmem>>, vector<1x8x32xbf16>
      %174 = vector.shape_cast %173 : vector<1x8x32xbf16> to vector<8x32xbf16>
      %175 = vector.shape_cast %172 : vector<8x32xbf16> to vector<1x8x32xbf16>
      tpu.vector_store %arg8[%c1_82, %c0_83, %c0_84], %175 {strides = array<i32>} : memref<8x8x32xbf16, #tpu.memory_space<vmem>>, vector<1x8x32xbf16>,
      %c2_85 = arith.constant 2 : index
      %c0_86 = arith.constant 0 : index
      %c0_87 = arith.constant 0 : index
      %176 = vector.load %arg11[%c2_85, %c0_86, %c0_87] : memref<8x8x128xf32, #tpu.memory_space<vmem>>, vector<1x8x128xf32>
      %177 = vector.shape_cast %176 : vector<1x8x128xf32> to vector<8x128xf32>
      %178 = arith.truncf %164 : vector<8x32xf32> to vector<8x32xbf16>
      %cst_88 = arith.constant dense<0.000000e+00> : vector<8x128xf32>
      %179 = tpu.matmul %178, %14, %cst_88 {dimension_numbers = #tpu.dot_dimension_numbers<[1], [0], [0], [1], [0, 0, 1, 1], [], []>} : vector<8x32xbf16>, vector<32x128xbf16>, vector<8x128xf32> -> vector<8x128xf32>
      %180 = arith.addf %177, %179 : vector<8x128xf32>
      %181 = vector.extract_strided_slice %180 {offsets = [0, 0], sizes = [8, 32], strides = [1, 1]} : vector<8x128xf32> to vector<8x32xf32>
      %182 = arith.negf %181 : vector<8x32xf32>
      %183 = math.exp %182 : vector<8x32xf32>
      %cst_89 = arith.constant 1.000000e+00 : f32
      %184 = vector.broadcast %cst_89 : f32 to vector<8x32xf32>
      %185 = arith.addf %184, %183 : vector<8x32xf32>
      %186 = arith.divf %184, %185 : vector<8x32xf32>
      %187 = vector.extract_strided_slice %180 {offsets = [0, 32], sizes = [8, 32], strides = [1, 1]} : vector<8x128xf32> to vector<8x32xf32>
      %188 = arith.negf %187 : vector<8x32xf32>
      %189 = math.exp %188 : vector<8x32xf32>
      %cst_90 = arith.constant 1.000000e+00 : f32
      %190 = vector.broadcast %cst_90 : f32 to vector<8x32xf32>
      %191 = arith.addf %190, %189 : vector<8x32xf32>
      %192 = arith.divf %190, %191 : vector<8x32xf32>
      %193 = vector.extract_strided_slice %180 {offsets = [0, 64], sizes = [8, 32], strides = [1, 1]} : vector<8x128xf32> to vector<8x32xf32>
      %194 = math.tanh %193 : vector<8x32xf32>
      %195 = vector.extract_strided_slice %180 {offsets = [0, 96], sizes = [8, 32], strides = [1, 1]} : vector<8x128xf32> to vector<8x32xf32>
      %196 = arith.negf %195 : vector<8x32xf32>
      %197 = math.exp %196 : vector<8x32xf32>
      %cst_91 = arith.constant 1.000000e+00 : f32
      %198 = vector.broadcast %cst_91 : f32 to vector<8x32xf32>
      %199 = arith.addf %198, %197 : vector<8x32xf32>
      %200 = arith.divf %198, %199 : vector<8x32xf32>
      %201 = arith.mulf %192, %167 : vector<8x32xf32>
      %202 = arith.mulf %186, %194 : vector<8x32xf32>
      %203 = arith.addf %201, %202 : vector<8x32xf32>
      %204 = math.tanh %203 : vector<8x32xf32>
      %205 = arith.mulf %200, %204 : vector<8x32xf32>
      %c2_i32 = arith.constant 2 : i32
      %206 = arith.addi %0, %c2_i32 : i32
      %207 = vector.broadcast %206 : i32 to vector<8x1xi32>
      %208 = arith.cmpi slt, %207, %12 : vector<8x1xi32>
      %209 = vector.shape_cast %208 : vector<8x1xi1> to vector<8x1xi1>
      %210 = vector.broadcast %209 : vector<8x1xi1> to vector<8x32xi1>
      %211 = arith.select %210, %205, %164 : vector<8x32xi1>, vector<8x32xf32>
      %212 = vector.shape_cast %208 : vector<8x1xi1> to vector<8x1xi1>
      %213 = vector.broadcast %212 : vector<8x1xi1> to vector<8x32xi1>
      %214 = arith.select %213, %203, %167 : vector<8x32xi1>, vector<8x32xf32>
      %cst_92 = arith.constant 0.000000e+00 : f32
      %215 = vector.broadcast %cst_92 : f32 to vector<8x32xf32>
      %216 = vector.shape_cast %208 : vector<8x1xi1> to vector<8x1xi1>
      %217 = vector.broadcast %216 : vector<8x1xi1> to vector<8x32xi1>
      %218 = arith.select %217, %205, %215 : vector<8x32xi1>, vector<8x32xf32>
      %219 = arith.truncf %218 : vector<8x32xf32> to vector<8x32xbf16>
      %c2_93 = arith.constant 2 : index
      %c0_94 = arith.constant 0 : index
      %c0_95 = arith.constant 0 : index
      %220 = vector.load %arg8[%c2_93, %c0_94, %c0_95] : memref<8x8x32xbf16, #tpu.memory_space<vmem>>, vector<1x8x32xbf16>
      %221 = vector.shape_cast %220 : vector<1x8x32xbf16> to vector<8x32xbf16>
      %222 = vector.shape_cast %219 : vector<8x32xbf16> to vector<1x8x32xbf16>
      tpu.vector_store %arg8[%c2_93, %c0_94, %c0_95], %222 {strides = array<i32>} : memref<8x8x32xbf16, #tpu.memory_space<vmem>>, vector<1x8x32xbf16>,
      %c3_96 = arith.constant 3 : index
      %c0_97 = arith.constant 0 : index
      %c0_98 = arith.constant 0 : index
      %223 = vector.load %arg11[%c3_96, %c0_97, %c0_98] : memref<8x8x128xf32, #tpu.memory_space<vmem>>, vector<1x8x128xf32>
      %224 = vector.shape_cast %223 : vector<1x8x128xf32> to vector<8x128xf32>
      %225 = arith.truncf %211 : vector<8x32xf32> to vector<8x32xbf16>
      %cst_99 = arith.constant dense<0.000000e+00> : vector<8x128xf32>
      %226 = tpu.matmul %225, %14, %cst_99 {dimension_numbers = #tpu.dot_dimension_numbers<[1], [0], [0], [1], [0, 0, 1, 1], [], []>} : vector<8x32xbf16>, vector<32x128xbf16>, vector<8x128xf32> -> vector<8x128xf32>
      %227 = arith.addf %224, %226 : vector<8x128xf32>
      %228 = vector.extract_strided_slice %227 {offsets = [0, 0], sizes = [8, 32], strides = [1, 1]} : vector<8x128xf32> to vector<8x32xf32>
      %229 = arith.negf %228 : vector<8x32xf32>
      %230 = math.exp %229 : vector<8x32xf32>
      %cst_100 = arith.constant 1.000000e+00 : f32
      %231 = vector.broadcast %cst_100 : f32 to vector<8x32xf32>
      %232 = arith.addf %231, %230 : vector<8x32xf32>
      %233 = arith.divf %231, %232 : vector<8x32xf32>
      %234 = vector.extract_strided_slice %227 {offsets = [0, 32], sizes = [8, 32], strides = [1, 1]} : vector<8x128xf32> to vector<8x32xf32>
      %235 = arith.negf %234 : vector<8x32xf32>
      %236 = math.exp %235 : vector<8x32xf32>
      %cst_101 = arith.constant 1.000000e+00 : f32
      %237 = vector.broadcast %cst_101 : f32 to vector<8x32xf32>
      %238 = arith.addf %237, %236 : vector<8x32xf32>
      %239 = arith.divf %237, %238 : vector<8x32xf32>
      %240 = vector.extract_strided_slice %227 {offsets = [0, 64], sizes = [8, 32], strides = [1, 1]} : vector<8x128xf32> to vector<8x32xf32>
      %241 = math.tanh %240 : vector<8x32xf32>
      %242 = vector.extract_strided_slice %227 {offsets = [0, 96], sizes = [8, 32], strides = [1, 1]} : vector<8x128xf32> to vector<8x32xf32>
      %243 = arith.negf %242 : vector<8x32xf32>
      %244 = math.exp %243 : vector<8x32xf32>
      %cst_102 = arith.constant 1.000000e+00 : f32
      %245 = vector.broadcast %cst_102 : f32 to vector<8x32xf32>
      %246 = arith.addf %245, %244 : vector<8x32xf32>
      %247 = arith.divf %245, %246 : vector<8x32xf32>
      %248 = arith.mulf %239, %214 : vector<8x32xf32>
      %249 = arith.mulf %233, %241 : vector<8x32xf32>
      %250 = arith.addf %248, %249 : vector<8x32xf32>
      %251 = math.tanh %250 : vector<8x32xf32>
      %252 = arith.mulf %247, %251 : vector<8x32xf32>
      %c3_i32 = arith.constant 3 : i32
      %253 = arith.addi %0, %c3_i32 : i32
      %254 = vector.broadcast %253 : i32 to vector<8x1xi32>
      %255 = arith.cmpi slt, %254, %12 : vector<8x1xi32>
      %256 = vector.shape_cast %255 : vector<8x1xi1> to vector<8x1xi1>
      %257 = vector.broadcast %256 : vector<8x1xi1> to vector<8x32xi1>
      %258 = arith.select %257, %252, %211 : vector<8x32xi1>, vector<8x32xf32>
      %259 = vector.shape_cast %255 : vector<8x1xi1> to vector<8x1xi1>
      %260 = vector.broadcast %259 : vector<8x1xi1> to vector<8x32xi1>
      %261 = arith.select %260, %250, %214 : vector<8x32xi1>, vector<8x32xf32>
      %cst_103 = arith.constant 0.000000e+00 : f32
      %262 = vector.broadcast %cst_103 : f32 to vector<8x32xf32>
      %263 = vector.shape_cast %255 : vector<8x1xi1> to vector<8x1xi1>
      %264 = vector.broadcast %263 : vector<8x1xi1> to vector<8x32xi1>
      %265 = arith.select %264, %252, %262 : vector<8x32xi1>, vector<8x32xf32>
      %266 = arith.truncf %265 : vector<8x32xf32> to vector<8x32xbf16>
      %c3_104 = arith.constant 3 : index
      %c0_105 = arith.constant 0 : index
      %c0_106 = arith.constant 0 : index
      %267 = vector.load %arg8[%c3_104, %c0_105, %c0_106] : memref<8x8x32xbf16, #tpu.memory_space<vmem>>, vector<1x8x32xbf16>
      %268 = vector.shape_cast %267 : vector<1x8x32xbf16> to vector<8x32xbf16>
      %269 = vector.shape_cast %266 : vector<8x32xbf16> to vector<1x8x32xbf16>
      tpu.vector_store %arg8[%c3_104, %c0_105, %c0_106], %269 {strides = array<i32>} : memref<8x8x32xbf16, #tpu.memory_space<vmem>>, vector<1x8x32xbf16>,
      %c4_107 = arith.constant 4 : index
      %c0_108 = arith.constant 0 : index
      %c0_109 = arith.constant 0 : index
      %270 = vector.load %arg11[%c4_107, %c0_108, %c0_109] : memref<8x8x128xf32, #tpu.memory_space<vmem>>, vector<1x8x128xf32>
      %271 = vector.shape_cast %270 : vector<1x8x128xf32> to vector<8x128xf32>
      %272 = arith.truncf %258 : vector<8x32xf32> to vector<8x32xbf16>
      %cst_110 = arith.constant dense<0.000000e+00> : vector<8x128xf32>
      %273 = tpu.matmul %272, %14, %cst_110 {dimension_numbers = #tpu.dot_dimension_numbers<[1], [0], [0], [1], [0, 0, 1, 1], [], []>} : vector<8x32xbf16>, vector<32x128xbf16>, vector<8x128xf32> -> vector<8x128xf32>
      %274 = arith.addf %271, %273 : vector<8x128xf32>
      %275 = vector.extract_strided_slice %274 {offsets = [0, 0], sizes = [8, 32], strides = [1, 1]} : vector<8x128xf32> to vector<8x32xf32>
      %276 = arith.negf %275 : vector<8x32xf32>
      %277 = math.exp %276 : vector<8x32xf32>
      %cst_111 = arith.constant 1.000000e+00 : f32
      %278 = vector.broadcast %cst_111 : f32 to vector<8x32xf32>
      %279 = arith.addf %278, %277 : vector<8x32xf32>
      %280 = arith.divf %278, %279 : vector<8x32xf32>
      %281 = vector.extract_strided_slice %274 {offsets = [0, 32], sizes = [8, 32], strides = [1, 1]} : vector<8x128xf32> to vector<8x32xf32>
      %282 = arith.negf %281 : vector<8x32xf32>
      %283 = math.exp %282 : vector<8x32xf32>
      %cst_112 = arith.constant 1.000000e+00 : f32
      %284 = vector.broadcast %cst_112 : f32 to vector<8x32xf32>
      %285 = arith.addf %284, %283 : vector<8x32xf32>
      %286 = arith.divf %284, %285 : vector<8x32xf32>
      %287 = vector.extract_strided_slice %274 {offsets = [0, 64], sizes = [8, 32], strides = [1, 1]} : vector<8x128xf32> to vector<8x32xf32>
      %288 = math.tanh %287 : vector<8x32xf32>
      %289 = vector.extract_strided_slice %274 {offsets = [0, 96], sizes = [8, 32], strides = [1, 1]} : vector<8x128xf32> to vector<8x32xf32>
      %290 = arith.negf %289 : vector<8x32xf32>
      %291 = math.exp %290 : vector<8x32xf32>
      %cst_113 = arith.constant 1.000000e+00 : f32
      %292 = vector.broadcast %cst_113 : f32 to vector<8x32xf32>
      %293 = arith.addf %292, %291 : vector<8x32xf32>
      %294 = arith.divf %292, %293 : vector<8x32xf32>
      %295 = arith.mulf %286, %261 : vector<8x32xf32>
      %296 = arith.mulf %280, %288 : vector<8x32xf32>
      %297 = arith.addf %295, %296 : vector<8x32xf32>
      %298 = math.tanh %297 : vector<8x32xf32>
      %299 = arith.mulf %294, %298 : vector<8x32xf32>
      %c4_i32 = arith.constant 4 : i32
      %300 = arith.addi %0, %c4_i32 : i32
      %301 = vector.broadcast %300 : i32 to vector<8x1xi32>
      %302 = arith.cmpi slt, %301, %12 : vector<8x1xi32>
      %303 = vector.shape_cast %302 : vector<8x1xi1> to vector<8x1xi1>
      %304 = vector.broadcast %303 : vector<8x1xi1> to vector<8x32xi1>
      %305 = arith.select %304, %299, %258 : vector<8x32xi1>, vector<8x32xf32>
      %306 = vector.shape_cast %302 : vector<8x1xi1> to vector<8x1xi1>
      %307 = vector.broadcast %306 : vector<8x1xi1> to vector<8x32xi1>
      %308 = arith.select %307, %297, %261 : vector<8x32xi1>, vector<8x32xf32>
      %cst_114 = arith.constant 0.000000e+00 : f32
      %309 = vector.broadcast %cst_114 : f32 to vector<8x32xf32>
      %310 = vector.shape_cast %302 : vector<8x1xi1> to vector<8x1xi1>
      %311 = vector.broadcast %310 : vector<8x1xi1> to vector<8x32xi1>
      %312 = arith.select %311, %299, %309 : vector<8x32xi1>, vector<8x32xf32>
      %313 = arith.truncf %312 : vector<8x32xf32> to vector<8x32xbf16>
      %c4_115 = arith.constant 4 : index
      %c0_116 = arith.constant 0 : index
      %c0_117 = arith.constant 0 : index
      %314 = vector.load %arg8[%c4_115, %c0_116, %c0_117] : memref<8x8x32xbf16, #tpu.memory_space<vmem>>, vector<1x8x32xbf16>
      %315 = vector.shape_cast %314 : vector<1x8x32xbf16> to vector<8x32xbf16>
      %316 = vector.shape_cast %313 : vector<8x32xbf16> to vector<1x8x32xbf16>
      tpu.vector_store %arg8[%c4_115, %c0_116, %c0_117], %316 {strides = array<i32>} : memref<8x8x32xbf16, #tpu.memory_space<vmem>>, vector<1x8x32xbf16>,
      %c5_118 = arith.constant 5 : index
      %c0_119 = arith.constant 0 : index
      %c0_120 = arith.constant 0 : index
      %317 = vector.load %arg11[%c5_118, %c0_119, %c0_120] : memref<8x8x128xf32, #tpu.memory_space<vmem>>, vector<1x8x128xf32>
      %318 = vector.shape_cast %317 : vector<1x8x128xf32> to vector<8x128xf32>
      %319 = arith.truncf %305 : vector<8x32xf32> to vector<8x32xbf16>
      %cst_121 = arith.constant dense<0.000000e+00> : vector<8x128xf32>
      %320 = tpu.matmul %319, %14, %cst_121 {dimension_numbers = #tpu.dot_dimension_numbers<[1], [0], [0], [1], [0, 0, 1, 1], [], []>} : vector<8x32xbf16>, vector<32x128xbf16>, vector<8x128xf32> -> vector<8x128xf32>
      %321 = arith.addf %318, %320 : vector<8x128xf32>
      %322 = vector.extract_strided_slice %321 {offsets = [0, 0], sizes = [8, 32], strides = [1, 1]} : vector<8x128xf32> to vector<8x32xf32>
      %323 = arith.negf %322 : vector<8x32xf32>
      %324 = math.exp %323 : vector<8x32xf32>
      %cst_122 = arith.constant 1.000000e+00 : f32
      %325 = vector.broadcast %cst_122 : f32 to vector<8x32xf32>
      %326 = arith.addf %325, %324 : vector<8x32xf32>
      %327 = arith.divf %325, %326 : vector<8x32xf32>
      %328 = vector.extract_strided_slice %321 {offsets = [0, 32], sizes = [8, 32], strides = [1, 1]} : vector<8x128xf32> to vector<8x32xf32>
      %329 = arith.negf %328 : vector<8x32xf32>
      %330 = math.exp %329 : vector<8x32xf32>
      %cst_123 = arith.constant 1.000000e+00 : f32
      %331 = vector.broadcast %cst_123 : f32 to vector<8x32xf32>
      %332 = arith.addf %331, %330 : vector<8x32xf32>
      %333 = arith.divf %331, %332 : vector<8x32xf32>
      %334 = vector.extract_strided_slice %321 {offsets = [0, 64], sizes = [8, 32], strides = [1, 1]} : vector<8x128xf32> to vector<8x32xf32>
      %335 = math.tanh %334 : vector<8x32xf32>
      %336 = vector.extract_strided_slice %321 {offsets = [0, 96], sizes = [8, 32], strides = [1, 1]} : vector<8x128xf32> to vector<8x32xf32>
      %337 = arith.negf %336 : vector<8x32xf32>
      %338 = math.exp %337 : vector<8x32xf32>
      %cst_124 = arith.constant 1.000000e+00 : f32
      %339 = vector.broadcast %cst_124 : f32 to vector<8x32xf32>
      %340 = arith.addf %339, %338 : vector<8x32xf32>
      %341 = arith.divf %339, %340 : vector<8x32xf32>
      %342 = arith.mulf %333, %308 : vector<8x32xf32>
      %343 = arith.mulf %327, %335 : vector<8x32xf32>
      %344 = arith.addf %342, %343 : vector<8x32xf32>
      %345 = math.tanh %344 : vector<8x32xf32>
      %346 = arith.mulf %341, %345 : vector<8x32xf32>
      %c5_i32 = arith.constant 5 : i32
      %347 = arith.addi %0, %c5_i32 : i32
      %348 = vector.broadcast %347 : i32 to vector<8x1xi32>
      %349 = arith.cmpi slt, %348, %12 : vector<8x1xi32>
      %350 = vector.shape_cast %349 : vector<8x1xi1> to vector<8x1xi1>
      %351 = vector.broadcast %350 : vector<8x1xi1> to vector<8x32xi1>
      %352 = arith.select %351, %346, %305 : vector<8x32xi1>, vector<8x32xf32>
      %353 = vector.shape_cast %349 : vector<8x1xi1> to vector<8x1xi1>
      %354 = vector.broadcast %353 : vector<8x1xi1> to vector<8x32xi1>
      %355 = arith.select %354, %344, %308 : vector<8x32xi1>, vector<8x32xf32>
      %cst_125 = arith.constant 0.000000e+00 : f32
      %356 = vector.broadcast %cst_125 : f32 to vector<8x32xf32>
      %357 = vector.shape_cast %349 : vector<8x1xi1> to vector<8x1xi1>
      %358 = vector.broadcast %357 : vector<8x1xi1> to vector<8x32xi1>
      %359 = arith.select %358, %346, %356 : vector<8x32xi1>, vector<8x32xf32>
      %360 = arith.truncf %359 : vector<8x32xf32> to vector<8x32xbf16>
      %c5_126 = arith.constant 5 : index
      %c0_127 = arith.constant 0 : index
      %c0_128 = arith.constant 0 : index
      %361 = vector.load %arg8[%c5_126, %c0_127, %c0_128] : memref<8x8x32xbf16, #tpu.memory_space<vmem>>, vector<1x8x32xbf16>
      %362 = vector.shape_cast %361 : vector<1x8x32xbf16> to vector<8x32xbf16>
      %363 = vector.shape_cast %360 : vector<8x32xbf16> to vector<1x8x32xbf16>
      tpu.vector_store %arg8[%c5_126, %c0_127, %c0_128], %363 {strides = array<i32>} : memref<8x8x32xbf16, #tpu.memory_space<vmem>>, vector<1x8x32xbf16>,
      %c6_129 = arith.constant 6 : index
      %c0_130 = arith.constant 0 : index
      %c0_131 = arith.constant 0 : index
      %364 = vector.load %arg11[%c6_129, %c0_130, %c0_131] : memref<8x8x128xf32, #tpu.memory_space<vmem>>, vector<1x8x128xf32>
      %365 = vector.shape_cast %364 : vector<1x8x128xf32> to vector<8x128xf32>
      %366 = arith.truncf %352 : vector<8x32xf32> to vector<8x32xbf16>
      %cst_132 = arith.constant dense<0.000000e+00> : vector<8x128xf32>
      %367 = tpu.matmul %366, %14, %cst_132 {dimension_numbers = #tpu.dot_dimension_numbers<[1], [0], [0], [1], [0, 0, 1, 1], [], []>} : vector<8x32xbf16>, vector<32x128xbf16>, vector<8x128xf32> -> vector<8x128xf32>
      %368 = arith.addf %365, %367 : vector<8x128xf32>
      %369 = vector.extract_strided_slice %368 {offsets = [0, 0], sizes = [8, 32], strides = [1, 1]} : vector<8x128xf32> to vector<8x32xf32>
      %370 = arith.negf %369 : vector<8x32xf32>
      %371 = math.exp %370 : vector<8x32xf32>
      %cst_133 = arith.constant 1.000000e+00 : f32
      %372 = vector.broadcast %cst_133 : f32 to vector<8x32xf32>
      %373 = arith.addf %372, %371 : vector<8x32xf32>
      %374 = arith.divf %372, %373 : vector<8x32xf32>
      %375 = vector.extract_strided_slice %368 {offsets = [0, 32], sizes = [8, 32], strides = [1, 1]} : vector<8x128xf32> to vector<8x32xf32>
      %376 = arith.negf %375 : vector<8x32xf32>
      %377 = math.exp %376 : vector<8x32xf32>
      %cst_134 = arith.constant 1.000000e+00 : f32
      %378 = vector.broadcast %cst_134 : f32 to vector<8x32xf32>
      %379 = arith.addf %378, %377 : vector<8x32xf32>
      %380 = arith.divf %378, %379 : vector<8x32xf32>
      %381 = vector.extract_strided_slice %368 {offsets = [0, 64], sizes = [8, 32], strides = [1, 1]} : vector<8x128xf32> to vector<8x32xf32>
      %382 = math.tanh %381 : vector<8x32xf32>
      %383 = vector.extract_strided_slice %368 {offsets = [0, 96], sizes = [8, 32], strides = [1, 1]} : vector<8x128xf32> to vector<8x32xf32>
      %384 = arith.negf %383 : vector<8x32xf32>
      %385 = math.exp %384 : vector<8x32xf32>
      %cst_135 = arith.constant 1.000000e+00 : f32
      %386 = vector.broadcast %cst_135 : f32 to vector<8x32xf32>
      %387 = arith.addf %386, %385 : vector<8x32xf32>
      %388 = arith.divf %386, %387 : vector<8x32xf32>
      %389 = arith.mulf %380, %355 : vector<8x32xf32>
      %390 = arith.mulf %374, %382 : vector<8x32xf32>
      %391 = arith.addf %389, %390 : vector<8x32xf32>
      %392 = math.tanh %391 : vector<8x32xf32>
      %393 = arith.mulf %388, %392 : vector<8x32xf32>
      %c6_i32 = arith.constant 6 : i32
      %394 = arith.addi %0, %c6_i32 : i32
      %395 = vector.broadcast %394 : i32 to vector<8x1xi32>
      %396 = arith.cmpi slt, %395, %12 : vector<8x1xi32>
      %397 = vector.shape_cast %396 : vector<8x1xi1> to vector<8x1xi1>
      %398 = vector.broadcast %397 : vector<8x1xi1> to vector<8x32xi1>
      %399 = arith.select %398, %393, %352 : vector<8x32xi1>, vector<8x32xf32>
      %400 = vector.shape_cast %396 : vector<8x1xi1> to vector<8x1xi1>
      %401 = vector.broadcast %400 : vector<8x1xi1> to vector<8x32xi1>
      %402 = arith.select %401, %391, %355 : vector<8x32xi1>, vector<8x32xf32>
      %cst_136 = arith.constant 0.000000e+00 : f32
      %403 = vector.broadcast %cst_136 : f32 to vector<8x32xf32>
      %404 = vector.shape_cast %396 : vector<8x1xi1> to vector<8x1xi1>
      %405 = vector.broadcast %404 : vector<8x1xi1> to vector<8x32xi1>
      %406 = arith.select %405, %393, %403 : vector<8x32xi1>, vector<8x32xf32>
      %407 = arith.truncf %406 : vector<8x32xf32> to vector<8x32xbf16>
      %c6_137 = arith.constant 6 : index
      %c0_138 = arith.constant 0 : index
      %c0_139 = arith.constant 0 : index
      %408 = vector.load %arg8[%c6_137, %c0_138, %c0_139] : memref<8x8x32xbf16, #tpu.memory_space<vmem>>, vector<1x8x32xbf16>
      %409 = vector.shape_cast %408 : vector<1x8x32xbf16> to vector<8x32xbf16>
      %410 = vector.shape_cast %407 : vector<8x32xbf16> to vector<1x8x32xbf16>
      tpu.vector_store %arg8[%c6_137, %c0_138, %c0_139], %410 {strides = array<i32>} : memref<8x8x32xbf16, #tpu.memory_space<vmem>>, vector<1x8x32xbf16>,
      %c7_140 = arith.constant 7 : index
      %c0_141 = arith.constant 0 : index
      %c0_142 = arith.constant 0 : index
      %411 = vector.load %arg11[%c7_140, %c0_141, %c0_142] : memref<8x8x128xf32, #tpu.memory_space<vmem>>, vector<1x8x128xf32>
      %412 = vector.shape_cast %411 : vector<1x8x128xf32> to vector<8x128xf32>
      %413 = arith.truncf %399 : vector<8x32xf32> to vector<8x32xbf16>
      %cst_143 = arith.constant dense<0.000000e+00> : vector<8x128xf32>
      %414 = tpu.matmul %413, %14, %cst_143 {dimension_numbers = #tpu.dot_dimension_numbers<[1], [0], [0], [1], [0, 0, 1, 1], [], []>} : vector<8x32xbf16>, vector<32x128xbf16>, vector<8x128xf32> -> vector<8x128xf32>
      %415 = arith.addf %412, %414 : vector<8x128xf32>
      %416 = vector.extract_strided_slice %415 {offsets = [0, 0], sizes = [8, 32], strides = [1, 1]} : vector<8x128xf32> to vector<8x32xf32>
      %417 = arith.negf %416 : vector<8x32xf32>
      %418 = math.exp %417 : vector<8x32xf32>
      %cst_144 = arith.constant 1.000000e+00 : f32
      %419 = vector.broadcast %cst_144 : f32 to vector<8x32xf32>
      %420 = arith.addf %419, %418 : vector<8x32xf32>
      %421 = arith.divf %419, %420 : vector<8x32xf32>
      %422 = vector.extract_strided_slice %415 {offsets = [0, 32], sizes = [8, 32], strides = [1, 1]} : vector<8x128xf32> to vector<8x32xf32>
      %423 = arith.negf %422 : vector<8x32xf32>
      %424 = math.exp %423 : vector<8x32xf32>
      %cst_145 = arith.constant 1.000000e+00 : f32
      %425 = vector.broadcast %cst_145 : f32 to vector<8x32xf32>
      %426 = arith.addf %425, %424 : vector<8x32xf32>
      %427 = arith.divf %425, %426 : vector<8x32xf32>
      %428 = vector.extract_strided_slice %415 {offsets = [0, 64], sizes = [8, 32], strides = [1, 1]} : vector<8x128xf32> to vector<8x32xf32>
      %429 = math.tanh %428 : vector<8x32xf32>
      %430 = vector.extract_strided_slice %415 {offsets = [0, 96], sizes = [8, 32], strides = [1, 1]} : vector<8x128xf32> to vector<8x32xf32>
      %431 = arith.negf %430 : vector<8x32xf32>
      %432 = math.exp %431 : vector<8x32xf32>
      %cst_146 = arith.constant 1.000000e+00 : f32
      %433 = vector.broadcast %cst_146 : f32 to vector<8x32xf32>
      %434 = arith.addf %433, %432 : vector<8x32xf32>
      %435 = arith.divf %433, %434 : vector<8x32xf32>
      %436 = arith.mulf %427, %402 : vector<8x32xf32>
      %437 = arith.mulf %421, %429 : vector<8x32xf32>
      %438 = arith.addf %436, %437 : vector<8x32xf32>
      %439 = math.tanh %438 : vector<8x32xf32>
      %440 = arith.mulf %435, %439 : vector<8x32xf32>
      %c7_i32 = arith.constant 7 : i32
      %441 = arith.addi %0, %c7_i32 : i32
      %442 = vector.broadcast %441 : i32 to vector<8x1xi32>
      %443 = arith.cmpi slt, %442, %12 : vector<8x1xi32>
      %444 = vector.shape_cast %443 : vector<8x1xi1> to vector<8x1xi1>
      %445 = vector.broadcast %444 : vector<8x1xi1> to vector<8x32xi1>
      %446 = arith.select %445, %440, %399 : vector<8x32xi1>, vector<8x32xf32>
      %447 = vector.shape_cast %443 : vector<8x1xi1> to vector<8x1xi1>
      %448 = vector.broadcast %447 : vector<8x1xi1> to vector<8x32xi1>
      %449 = arith.select %448, %438, %402 : vector<8x32xi1>, vector<8x32xf32>
      %cst_147 = arith.constant 0.000000e+00 : f32
      %450 = vector.broadcast %cst_147 : f32 to vector<8x32xf32>
      %451 = vector.shape_cast %443 : vector<8x1xi1> to vector<8x1xi1>
      %452 = vector.broadcast %451 : vector<8x1xi1> to vector<8x32xi1>
      %453 = arith.select %452, %440, %450 : vector<8x32xi1>, vector<8x32xf32>
      %454 = arith.truncf %453 : vector<8x32xf32> to vector<8x32xbf16>
      %c7_148 = arith.constant 7 : index
      %c0_149 = arith.constant 0 : index
      %c0_150 = arith.constant 0 : index
      %455 = vector.load %arg8[%c7_148, %c0_149, %c0_150] : memref<8x8x32xbf16, #tpu.memory_space<vmem>>, vector<1x8x32xbf16>
      %456 = vector.shape_cast %455 : vector<1x8x32xbf16> to vector<8x32xbf16>
      %457 = vector.shape_cast %454 : vector<8x32xbf16> to vector<1x8x32xbf16>
      tpu.vector_store %arg8[%c7_148, %c0_149, %c0_150], %457 {strides = array<i32>} : memref<8x8x32xbf16, #tpu.memory_space<vmem>>, vector<1x8x32xbf16>,
      %c0_151 = arith.constant 0 : index
      %c0_152 = arith.constant 0 : index
      %458 = vector.load %arg9[%c0_151, %c0_152] : memref<8x32xf32, #tpu.memory_space<vmem>>, vector<8x32xf32>
      tpu.vector_store %arg9[%c0_151, %c0_152], %446 {strides = array<i32>} : memref<8x32xf32, #tpu.memory_space<vmem>>, vector<8x32xf32>,
      %c0_153 = arith.constant 0 : index
      %c0_154 = arith.constant 0 : index
      %459 = vector.load %arg10[%c0_153, %c0_154] : memref<8x32xf32, #tpu.memory_space<vmem>>, vector<8x32xf32>
      tpu.vector_store %arg10[%c0_153, %c0_154], %449 {strides = array<i32>} : memref<8x32xf32, #tpu.memory_space<vmem>>, vector<8x32xf32>,
    } else {
    }
    return
  }
  func.func @transform_0(%arg0: i32, %arg1: i32, %arg2: memref<1xi32, #tpu.memory_space<smem>>) -> (i32, i32) {
    %c0_i32 = arith.constant 0 : i32
    %c0_i32_0 = arith.constant 0 : i32
    return %arg0, %c0_i32 : i32, i32
  }
  func.func @transform_1(%arg0: i32, %arg1: i32, %arg2: memref<1xi32, #tpu.memory_space<smem>>) -> (i32, i32, i32) {
    %c0_i32 = arith.constant 0 : i32
    %c0_i32_0 = arith.constant 0 : i32
    return %arg1, %arg0, %c0_i32 : i32, i32, i32
  }
  func.func @transform_2(%arg0: i32, %arg1: i32, %arg2: memref<1xi32, #tpu.memory_space<smem>>) -> (i32, i32) {
    %c0_i32 = arith.constant 0 : i32
    %c0_i32_0 = arith.constant 0 : i32
    %c0_i32_1 = arith.constant 0 : i32
    return %c0_i32, %c0_i32_0 : i32, i32
  }
  func.func @transform_3(%arg0: i32, %arg1: i32, %arg2: memref<1xi32, #tpu.memory_space<smem>>) -> (i32, i32) {
    %c0_i32 = arith.constant 0 : i32
    %c0_i32_0 = arith.constant 0 : i32
    %c0_i32_1 = arith.constant 0 : i32
    return %c0_i32, %c0_i32_0 : i32, i32
  }
  func.func @transform_4(%arg0: i32, %arg1: i32, %arg2: memref<1xi32, #tpu.memory_space<smem>>) -> (i32, i32) {
    %c0_i32 = arith.constant 0 : i32
    %c0_i32_0 = arith.constant 0 : i32
    %c0_i32_1 = arith.constant 0 : i32
    return %c0_i32, %c0_i32_0 : i32, i32
  }
  func.func @transform_5(%arg0: i32, %arg1: i32, %arg2: memref<1xi32, #tpu.memory_space<smem>>) -> (i32, i32, i32) {
    %c0_i32 = arith.constant 0 : i32
    %c0_i32_0 = arith.constant 0 : i32
    return %arg1, %arg0, %c0_i32 : i32, i32, i32
  }
  func.func @transform_6(%arg0: i32, %arg1: i32, %arg2: memref<1xi32, #tpu.memory_space<smem>>) -> (i32, i32) {
    %c0_i32 = arith.constant 0 : i32
    %c0_i32_0 = arith.constant 0 : i32
    return %arg0, %c0_i32 : i32, i32
  }
  func.func @transform_7(%arg0: i32, %arg1: i32, %arg2: memref<1xi32, #tpu.memory_space<smem>>) -> (i32, i32) {
    %c0_i32 = arith.constant 0 : i32
    %c0_i32_0 = arith.constant 0 : i32
    return %arg0, %c0_i32 : i32, i32
  }
}

module attributes {stable_mosaic.version = 11 : i64} {
  func.func @lstm_fused_kernel(%arg0: i32, %arg1: i32, %arg2: memref<1xi32, #tpu.memory_space<smem>>, %arg3: memref<8x1xi32, #tpu.memory_space<vmem>>, %arg4: memref<8x8x32xbf16, #tpu.memory_space<vmem>>, %arg5: memref<32x128xbf16, #tpu.memory_space<vmem>>, %arg6: memref<32x128xbf16, #tpu.memory_space<vmem>>, %arg7: memref<1x128xf32, #tpu.memory_space<vmem>>, %arg8: memref<8x8x32xbf16, #tpu.memory_space<vmem>>, %arg9: memref<8x32xf32, #tpu.memory_space<vmem>>, %arg10: memref<8x32xf32, #tpu.memory_space<vmem>>, %arg11: memref<8x8x128xf32, #tpu.memory_space<vmem>>) attributes {dimension_semantics = [#tpu.dimension_semantics<parallel>, #tpu.dimension_semantics<arbitrary>], iteration_bounds = array<i64: 1, 1>, scalar_prefetch = 1 : i64, scratch_operands = 1 : i64, tpu.core_type = #tpu.core_type<tc>, window_params = [{transform_indices = @transform_0, window_bounds = array<i64: 8, 1>}, {transform_indices = @transform_1, window_bounds = array<i64: 8, 8, 32>}, {pipeline_mode = #tpu.pipeline_mode<synchronous>, transform_indices = @transform_2, window_bounds = array<i64: 32, 128>}, {pipeline_mode = #tpu.pipeline_mode<synchronous>, transform_indices = @transform_3, window_bounds = array<i64: 32, 128>}, {pipeline_mode = #tpu.pipeline_mode<synchronous>, transform_indices = @transform_4, window_bounds = array<i64: 1, 128>}, {transform_indices = @transform_5, window_bounds = array<i64: 8, 8, 32>}, {transform_indices = @transform_6, window_bounds = array<i64: 8, 32>}, {transform_indices = @transform_7, window_bounds = array<i64: 8, 32>}]} {
    %c8_i32 = arith.constant 8 : i32
    %0 = arith.muli %arg1, %c8_i32 : i32
    %c0_i32 = arith.constant 0 : i32
    %1 = arith.cmpi eq, %arg1, %c0_i32 : i32
    %2 = arith.extui %1 : i1 to i32
    %c0_i32_0 = arith.constant 0 : i32
    %3 = arith.cmpi ne, %2, %c0_i32_0 : i32
    scf.if %3 {
      %cst = arith.constant 0.000000e+00 : f32
      %12 = vector.broadcast %cst : f32 to vector<8x32xf32>
      %c0 = arith.constant 0 : index
      %c0_3 = arith.constant 0 : index
      %13 = vector.load %arg9[%c0, %c0_3] : memref<8x32xf32, #tpu.memory_space<vmem>>, vector<8x32xf32>
      tpu.vector_store %arg9[%c0, %c0_3], %12 {strides = array<i32>} : memref<8x32xf32, #tpu.memory_space<vmem>>, vector<8x32xf32>,
      %cst_4 = arith.constant 0.000000e+00 : f32
      %14 = vector.broadcast %cst_4 : f32 to vector<8x32xf32>
      %c0_5 = arith.constant 0 : index
      %c0_6 = arith.constant 0 : index
      %15 = vector.load %arg10[%c0_5, %c0_6] : memref<8x32xf32, #tpu.memory_space<vmem>>, vector<8x32xf32>
      tpu.vector_store %arg10[%c0_5, %c0_6], %14 {strides = array<i32>} : memref<8x32xf32, #tpu.memory_space<vmem>>, vector<8x32xf32>,
    } else {
    }
    %4 = arith.index_cast %arg0 : i32 to index
    %5 = memref.load %arg2[%4] : memref<1xi32, #tpu.memory_space<smem>>
    %6 = arith.cmpi sge, %0, %5 : i32
    %7 = arith.extui %6 : i1 to i32
    %c0_i32_1 = arith.constant 0 : i32
    %8 = arith.cmpi ne, %7, %c0_i32_1 : i32
    scf.if %8 {
      %cst = arith.constant 0.000000e+00 : bf16
      %12 = vector.broadcast %cst : bf16 to vector<8x8x32xbf16>
      %c0 = arith.constant 0 : index
      %c0_3 = arith.constant 0 : index
      %c0_4 = arith.constant 0 : index
      %13 = vector.load %arg8[%c0, %c0_3, %c0_4] : memref<8x8x32xbf16, #tpu.memory_space<vmem>>, vector<8x8x32xbf16>
      tpu.vector_store %arg8[%c0, %c0_3, %c0_4], %12 {strides = array<i32>} : memref<8x8x32xbf16, #tpu.memory_space<vmem>>, vector<8x8x32xbf16>,
    } else {
    }
    %9 = arith.cmpi slt, %0, %5 : i32
    %10 = arith.extui %9 : i1 to i32
    %c0_i32_2 = arith.constant 0 : i32
    %11 = arith.cmpi ne, %10, %c0_i32_2 : i32
    scf.if %11 {
      %c0 = arith.constant 0 : index
      %c0_3 = arith.constant 0 : index
      %12 = vector.load %arg3[%c0, %c0_3] : memref<8x1xi32, #tpu.memory_space<vmem>>, vector<8x1xi32>
      %c0_4 = arith.constant 0 : index
      %c0_5 = arith.constant 0 : index
      %13 = vector.load %arg5[%c0_4, %c0_5] : memref<32x128xbf16, #tpu.memory_space<vmem>>, vector<32x128xbf16>
      %c0_6 = arith.constant 0 : index
      %c0_7 = arith.constant 0 : index
      %14 = vector.load %arg6[%c0_6, %c0_7] : memref<32x128xbf16, #tpu.memory_space<vmem>>, vector<32x128xbf16>
      %c0_8 = arith.constant 0 : index
      %c0_9 = arith.constant 0 : index
      %15 = vector.load %arg7[%c0_8, %c0_9] : memref<1x128xf32, #tpu.memory_space<vmem>>, vector<1x128xf32>
      %c0_10 = arith.constant 0 : index
      %c0_11 = arith.constant 0 : index
      %c0_12 = arith.constant 0 : index
      %16 = vector.load %arg4[%c0_10, %c0_11, %c0_12] : memref<8x8x32xbf16, #tpu.memory_space<vmem>>, vector<1x8x32xbf16>
      %17 = vector.shape_cast %16 : vector<1x8x32xbf16> to vector<8x32xbf16>
      %cst = arith.constant dense<0.000000e+00> : vector<8x128xf32>
      %18 = tpu.matmul %17, %13, %cst {dimension_numbers = #tpu.dot_dimension_numbers<[1], [0], [0], [1], [0, 0, 1, 1], [], []>} : vector<8x32xbf16>, vector<32x128xbf16>, vector<8x128xf32> -> vector<8x128xf32>
      %19 = vector.broadcast %15 : vector<1x128xf32> to vector<8x128xf32>
      %20 = arith.addf %18, %19 : vector<8x128xf32>
      %c0_13 = arith.constant 0 : index
      %c0_14 = arith.constant 0 : index
      %c0_15 = arith.constant 0 : index
      %21 = vector.load %arg11[%c0_13, %c0_14, %c0_15] : memref<8x8x128xf32, #tpu.memory_space<vmem>>, vector<1x8x128xf32>
      %22 = vector.shape_cast %21 : vector<1x8x128xf32> to vector<8x128xf32>
      %23 = vector.shape_cast %20 : vector<8x128xf32> to vector<1x8x128xf32>
      tpu.vector_store %arg11[%c0_13, %c0_14, %c0_15], %23 {strides = array<i32>} : memref<8x8x128xf32, #tpu.memory_space<vmem>>, vector<1x8x128xf32>,
      %c1 = arith.constant 1 : index
      %c0_16 = arith.constant 0 : index
      %c0_17 = arith.constant 0 : index
      %24 = vector.load %arg4[%c1, %c0_16, %c0_17] : memref<8x8x32xbf16, #tpu.memory_space<vmem>>, vector<1x8x32xbf16>
      %25 = vector.shape_cast %24 : vector<1x8x32xbf16> to vector<8x32xbf16>
      %cst_18 = arith.constant dense<0.000000e+00> : vector<8x128xf32>
      %26 = tpu.matmul %25, %13, %cst_18 {dimension_numbers = #tpu.dot_dimension_numbers<[1], [0], [0], [1], [0, 0, 1, 1], [], []>} : vector<8x32xbf16>, vector<32x128xbf16>, vector<8x128xf32> -> vector<8x128xf32>
      %27 = vector.broadcast %15 : vector<1x128xf32> to vector<8x128xf32>
      %28 = arith.addf %26, %27 : vector<8x128xf32>
      %c1_19 = arith.constant 1 : index
      %c0_20 = arith.constant 0 : index
      %c0_21 = arith.constant 0 : index
      %29 = vector.load %arg11[%c1_19, %c0_20, %c0_21] : memref<8x8x128xf32, #tpu.memory_space<vmem>>, vector<1x8x128xf32>
      %30 = vector.shape_cast %29 : vector<1x8x128xf32> to vector<8x128xf32>
      %31 = vector.shape_cast %28 : vector<8x128xf32> to vector<1x8x128xf32>
      tpu.vector_store %arg11[%c1_19, %c0_20, %c0_21], %31 {strides = array<i32>} : memref<8x8x128xf32, #tpu.memory_space<vmem>>, vector<1x8x128xf32>,
      %c2 = arith.constant 2 : index
      %c0_22 = arith.constant 0 : index
      %c0_23 = arith.constant 0 : index
      %32 = vector.load %arg4[%c2, %c0_22, %c0_23] : memref<8x8x32xbf16, #tpu.memory_space<vmem>>, vector<1x8x32xbf16>
      %33 = vector.shape_cast %32 : vector<1x8x32xbf16> to vector<8x32xbf16>
      %cst_24 = arith.constant dense<0.000000e+00> : vector<8x128xf32>
      %34 = tpu.matmul %33, %13, %cst_24 {dimension_numbers = #tpu.dot_dimension_numbers<[1], [0], [0], [1], [0, 0, 1, 1], [], []>} : vector<8x32xbf16>, vector<32x128xbf16>, vector<8x128xf32> -> vector<8x128xf32>
      %35 = vector.broadcast %15 : vector<1x128xf32> to vector<8x128xf32>
      %36 = arith.addf %34, %35 : vector<8x128xf32>
      %c2_25 = arith.constant 2 : index
      %c0_26 = arith.constant 0 : index
      %c0_27 = arith.constant 0 : index
      %37 = vector.load %arg11[%c2_25, %c0_26, %c0_27] : memref<8x8x128xf32, #tpu.memory_space<vmem>>, vector<1x8x128xf32>
      %38 = vector.shape_cast %37 : vector<1x8x128xf32> to vector<8x128xf32>
      %39 = vector.shape_cast %36 : vector<8x128xf32> to vector<1x8x128xf32>
      tpu.vector_store %arg11[%c2_25, %c0_26, %c0_27], %39 {strides = array<i32>} : memref<8x8x128xf32, #tpu.memory_space<vmem>>, vector<1x8x128xf32>,
      %c3 = arith.constant 3 : index
      %c0_28 = arith.constant 0 : index
      %c0_29 = arith.constant 0 : index
      %40 = vector.load %arg4[%c3, %c0_28, %c0_29] : memref<8x8x32xbf16, #tpu.memory_space<vmem>>, vector<1x8x32xbf16>
      %41 = vector.shape_cast %40 : vector<1x8x32xbf16> to vector<8x32xbf16>
      %cst_30 = arith.constant dense<0.000000e+00> : vector<8x128xf32>
      %42 = tpu.matmul %41, %13, %cst_30 {dimension_numbers = #tpu.dot_dimension_numbers<[1], [0], [0], [1], [0, 0, 1, 1], [], []>} : vector<8x32xbf16>, vector<32x128xbf16>, vector<8x128xf32> -> vector<8x128xf32>
      %43 = vector.broadcast %15 : vector<1x128xf32> to vector<8x128xf32>
      %44 = arith.addf %42, %43 : vector<8x128xf32>
      %c3_31 = arith.constant 3 : index
      %c0_32 = arith.constant 0 : index
      %c0_33 = arith.constant 0 : index
      %45 = vector.load %arg11[%c3_31, %c0_32, %c0_33] : memref<8x8x128xf32, #tpu.memory_space<vmem>>, vector<1x8x128xf32>
      %46 = vector.shape_cast %45 : vector<1x8x128xf32> to vector<8x128xf32>
      %47 = vector.shape_cast %44 : vector<8x128xf32> to vector<1x8x128xf32>
      tpu.vector_store %arg11[%c3_31, %c0_32, %c0_33], %47 {strides = array<i32>} : memref<8x8x128xf32, #tpu.memory_space<vmem>>, vector<1x8x128xf32>,
      %c4 = arith.constant 4 : index
      %c0_34 = arith.constant 0 : index
      %c0_35 = arith.constant 0 : index
      %48 = vector.load %arg4[%c4, %c0_34, %c0_35] : memref<8x8x32xbf16, #tpu.memory_space<vmem>>, vector<1x8x32xbf16>
      %49 = vector.shape_cast %48 : vector<1x8x32xbf16> to vector<8x32xbf16>
      %cst_36 = arith.constant dense<0.000000e+00> : vector<8x128xf32>
      %50 = tpu.matmul %49, %13, %cst_36 {dimension_numbers = #tpu.dot_dimension_numbers<[1], [0], [0], [1], [0, 0, 1, 1], [], []>} : vector<8x32xbf16>, vector<32x128xbf16>, vector<8x128xf32> -> vector<8x128xf32>
      %51 = vector.broadcast %15 : vector<1x128xf32> to vector<8x128xf32>
      %52 = arith.addf %50, %51 : vector<8x128xf32>
      %c4_37 = arith.constant 4 : index
      %c0_38 = arith.constant 0 : index
      %c0_39 = arith.constant 0 : index
      %53 = vector.load %arg11[%c4_37, %c0_38, %c0_39] : memref<8x8x128xf32, #tpu.memory_space<vmem>>, vector<1x8x128xf32>
      %54 = vector.shape_cast %53 : vector<1x8x128xf32> to vector<8x128xf32>
      %55 = vector.shape_cast %52 : vector<8x128xf32> to vector<1x8x128xf32>
      tpu.vector_store %arg11[%c4_37, %c0_38, %c0_39], %55 {strides = array<i32>} : memref<8x8x128xf32, #tpu.memory_space<vmem>>, vector<1x8x128xf32>,
      %c5 = arith.constant 5 : index
      %c0_40 = arith.constant 0 : index
      %c0_41 = arith.constant 0 : index
      %56 = vector.load %arg4[%c5, %c0_40, %c0_41] : memref<8x8x32xbf16, #tpu.memory_space<vmem>>, vector<1x8x32xbf16>
      %57 = vector.shape_cast %56 : vector<1x8x32xbf16> to vector<8x32xbf16>
      %cst_42 = arith.constant dense<0.000000e+00> : vector<8x128xf32>
      %58 = tpu.matmul %57, %13, %cst_42 {dimension_numbers = #tpu.dot_dimension_numbers<[1], [0], [0], [1], [0, 0, 1, 1], [], []>} : vector<8x32xbf16>, vector<32x128xbf16>, vector<8x128xf32> -> vector<8x128xf32>
      %59 = vector.broadcast %15 : vector<1x128xf32> to vector<8x128xf32>
      %60 = arith.addf %58, %59 : vector<8x128xf32>
      %c5_43 = arith.constant 5 : index
      %c0_44 = arith.constant 0 : index
      %c0_45 = arith.constant 0 : index
      %61 = vector.load %arg11[%c5_43, %c0_44, %c0_45] : memref<8x8x128xf32, #tpu.memory_space<vmem>>, vector<1x8x128xf32>
      %62 = vector.shape_cast %61 : vector<1x8x128xf32> to vector<8x128xf32>
      %63 = vector.shape_cast %60 : vector<8x128xf32> to vector<1x8x128xf32>
      tpu.vector_store %arg11[%c5_43, %c0_44, %c0_45], %63 {strides = array<i32>} : memref<8x8x128xf32, #tpu.memory_space<vmem>>, vector<1x8x128xf32>,
      %c6 = arith.constant 6 : index
      %c0_46 = arith.constant 0 : index
      %c0_47 = arith.constant 0 : index
      %64 = vector.load %arg4[%c6, %c0_46, %c0_47] : memref<8x8x32xbf16, #tpu.memory_space<vmem>>, vector<1x8x32xbf16>
      %65 = vector.shape_cast %64 : vector<1x8x32xbf16> to vector<8x32xbf16>
      %cst_48 = arith.constant dense<0.000000e+00> : vector<8x128xf32>
      %66 = tpu.matmul %65, %13, %cst_48 {dimension_numbers = #tpu.dot_dimension_numbers<[1], [0], [0], [1], [0, 0, 1, 1], [], []>} : vector<8x32xbf16>, vector<32x128xbf16>, vector<8x128xf32> -> vector<8x128xf32>
      %67 = vector.broadcast %15 : vector<1x128xf32> to vector<8x128xf32>
      %68 = arith.addf %66, %67 : vector<8x128xf32>
      %c6_49 = arith.constant 6 : index
      %c0_50 = arith.constant 0 : index
      %c0_51 = arith.constant 0 : index
      %69 = vector.load %arg11[%c6_49, %c0_50, %c0_51] : memref<8x8x128xf32, #tpu.memory_space<vmem>>, vector<1x8x128xf32>
      %70 = vector.shape_cast %69 : vector<1x8x128xf32> to vector<8x128xf32>
      %71 = vector.shape_cast %68 : vector<8x128xf32> to vector<1x8x128xf32>
      tpu.vector_store %arg11[%c6_49, %c0_50, %c0_51], %71 {strides = array<i32>} : memref<8x8x128xf32, #tpu.memory_space<vmem>>, vector<1x8x128xf32>,
      %c7 = arith.constant 7 : index
      %c0_52 = arith.constant 0 : index
      %c0_53 = arith.constant 0 : index
      %72 = vector.load %arg4[%c7, %c0_52, %c0_53] : memref<8x8x32xbf16, #tpu.memory_space<vmem>>, vector<1x8x32xbf16>
      %73 = vector.shape_cast %72 : vector<1x8x32xbf16> to vector<8x32xbf16>
      %cst_54 = arith.constant dense<0.000000e+00> : vector<8x128xf32>
      %74 = tpu.matmul %73, %13, %cst_54 {dimension_numbers = #tpu.dot_dimension_numbers<[1], [0], [0], [1], [0, 0, 1, 1], [], []>} : vector<8x32xbf16>, vector<32x128xbf16>, vector<8x128xf32> -> vector<8x128xf32>
      %75 = vector.broadcast %15 : vector<1x128xf32> to vector<8x128xf32>
      %76 = arith.addf %74, %75 : vector<8x128xf32>
      %c7_55 = arith.constant 7 : index
      %c0_56 = arith.constant 0 : index
      %c0_57 = arith.constant 0 : index
      %77 = vector.load %arg11[%c7_55, %c0_56, %c0_57] : memref<8x8x128xf32, #tpu.memory_space<vmem>>, vector<1x8x128xf32>
      %78 = vector.shape_cast %77 : vector<1x8x128xf32> to vector<8x128xf32>
      %79 = vector.shape_cast %76 : vector<8x128xf32> to vector<1x8x128xf32>
      tpu.vector_store %arg11[%c7_55, %c0_56, %c0_57], %79 {strides = array<i32>} : memref<8x8x128xf32, #tpu.memory_space<vmem>>, vector<1x8x128xf32>,
      %c0_58 = arith.constant 0 : index
      %c0_59 = arith.constant 0 : index
      %80 = vector.load %arg9[%c0_58, %c0_59] : memref<8x32xf32, #tpu.memory_space<vmem>>, vector<8x32xf32>
      %c0_60 = arith.constant 0 : index
      %c0_61 = arith.constant 0 : index
      %81 = vector.load %arg10[%c0_60, %c0_61] : memref<8x32xf32, #tpu.memory_space<vmem>>, vector<8x32xf32>
      %c0_62 = arith.constant 0 : index
      %c0_63 = arith.constant 0 : index
      %c0_64 = arith.constant 0 : index
      %82 = vector.load %arg11[%c0_62, %c0_63, %c0_64] : memref<8x8x128xf32, #tpu.memory_space<vmem>>, vector<1x8x128xf32>
      %83 = vector.shape_cast %82 : vector<1x8x128xf32> to vector<8x128xf32>
      %84 = arith.truncf %80 : vector<8x32xf32> to vector<8x32xbf16>
      %cst_65 = arith.constant dense<0.000000e+00> : vector<8x128xf32>
      %85 = tpu.matmul %84, %14, %cst_65 {dimension_numbers = #tpu.dot_dimension_numbers<[1], [0], [0], [1], [0, 0, 1, 1], [], []>} : vector<8x32xbf16>, vector<32x128xbf16>, vector<8x128xf32> -> vector<8x128xf32>
      %86 = arith.addf %83, %85 : vector<8x128xf32>
      %87 = vector.extract_strided_slice %86 {offsets = [0, 0], sizes = [8, 32], strides = [1, 1]} : vector<8x128xf32> to vector<8x32xf32>
      %88 = arith.negf %87 : vector<8x32xf32>
      %89 = math.exp %88 : vector<8x32xf32>
      %cst_66 = arith.constant 1.000000e+00 : f32
      %90 = vector.broadcast %cst_66 : f32 to vector<8x32xf32>
      %91 = arith.addf %90, %89 : vector<8x32xf32>
      %92 = arith.divf %90, %91 : vector<8x32xf32>
      %93 = vector.extract_strided_slice %86 {offsets = [0, 32], sizes = [8, 32], strides = [1, 1]} : vector<8x128xf32> to vector<8x32xf32>
      %94 = arith.negf %93 : vector<8x32xf32>
      %95 = math.exp %94 : vector<8x32xf32>
      %cst_67 = arith.constant 1.000000e+00 : f32
      %96 = vector.broadcast %cst_67 : f32 to vector<8x32xf32>
      %97 = arith.addf %96, %95 : vector<8x32xf32>
      %98 = arith.divf %96, %97 : vector<8x32xf32>
      %99 = vector.extract_strided_slice %86 {offsets = [0, 64], sizes = [8, 32], strides = [1, 1]} : vector<8x128xf32> to vector<8x32xf32>
      %100 = math.tanh %99 : vector<8x32xf32>
      %101 = vector.extract_strided_slice %86 {offsets = [0, 96], sizes = [8, 32], strides = [1, 1]} : vector<8x128xf32> to vector<8x32xf32>
      %102 = arith.negf %101 : vector<8x32xf32>
      %103 = math.exp %102 : vector<8x32xf32>
      %cst_68 = arith.constant 1.000000e+00 : f32
      %104 = vector.broadcast %cst_68 : f32 to vector<8x32xf32>
      %105 = arith.addf %104, %103 : vector<8x32xf32>
      %106 = arith.divf %104, %105 : vector<8x32xf32>
      %107 = arith.mulf %98, %81 : vector<8x32xf32>
      %108 = arith.mulf %92, %100 : vector<8x32xf32>
      %109 = arith.addf %107, %108 : vector<8x32xf32>
      %110 = math.tanh %109 : vector<8x32xf32>
      %111 = arith.mulf %106, %110 : vector<8x32xf32>
      %c0_i32_69 = arith.constant 0 : i32
      %112 = arith.addi %0, %c0_i32_69 : i32
      %113 = vector.broadcast %112 : i32 to vector<8x1xi32>
      %114 = arith.cmpi slt, %113, %12 : vector<8x1xi32>
      %115 = vector.shape_cast %114 : vector<8x1xi1> to vector<8x1xi1>
      %116 = vector.broadcast %115 : vector<8x1xi1> to vector<8x32xi1>
      %117 = arith.select %116, %111, %80 : vector<8x32xi1>, vector<8x32xf32>
      %118 = vector.shape_cast %114 : vector<8x1xi1> to vector<8x1xi1>
      %119 = vector.broadcast %118 : vector<8x1xi1> to vector<8x32xi1>
      %120 = arith.select %119, %109, %81 : vector<8x32xi1>, vector<8x32xf32>
      %cst_70 = arith.constant 0.000000e+00 : f32
      %121 = vector.broadcast %cst_70 : f32 to vector<8x32xf32>
      %122 = vector.shape_cast %114 : vector<8x1xi1> to vector<8x1xi1>
      %123 = vector.broadcast %122 : vector<8x1xi1> to vector<8x32xi1>
      %124 = arith.select %123, %111, %121 : vector<8x32xi1>, vector<8x32xf32>
      %125 = arith.truncf %124 : vector<8x32xf32> to vector<8x32xbf16>
      %c0_71 = arith.constant 0 : index
      %c0_72 = arith.constant 0 : index
      %c0_73 = arith.constant 0 : index
      %126 = vector.load %arg8[%c0_71, %c0_72, %c0_73] : memref<8x8x32xbf16, #tpu.memory_space<vmem>>, vector<1x8x32xbf16>
      %127 = vector.shape_cast %126 : vector<1x8x32xbf16> to vector<8x32xbf16>
      %128 = vector.shape_cast %125 : vector<8x32xbf16> to vector<1x8x32xbf16>
      tpu.vector_store %arg8[%c0_71, %c0_72, %c0_73], %128 {strides = array<i32>} : memref<8x8x32xbf16, #tpu.memory_space<vmem>>, vector<1x8x32xbf16>,
      %c1_74 = arith.constant 1 : index
      %c0_75 = arith.constant 0 : index
      %c0_76 = arith.constant 0 : index
      %129 = vector.load %arg11[%c1_74, %c0_75, %c0_76] : memref<8x8x128xf32, #tpu.memory_space<vmem>>, vector<1x8x128xf32>
      %130 = vector.shape_cast %129 : vector<1x8x128xf32> to vector<8x128xf32>
      %131 = arith.truncf %117 : vector<8x32xf32> to vector<8x32xbf16>
      %cst_77 = arith.constant dense<0.000000e+00> : vector<8x128xf32>
      %132 = tpu.matmul %131, %14, %cst_77 {dimension_numbers = #tpu.dot_dimension_numbers<[1], [0], [0], [1], [0, 0, 1, 1], [], []>} : vector<8x32xbf16>, vector<32x128xbf16>, vector<8x128xf32> -> vector<8x128xf32>
      %133 = arith.addf %130, %132 : vector<8x128xf32>
      %134 = vector.extract_strided_slice %133 {offsets = [0, 0], sizes = [8, 32], strides = [1, 1]} : vector<8x128xf32> to vector<8x32xf32>
      %135 = arith.negf %134 : vector<8x32xf32>
      %136 = math.exp %135 : vector<8x32xf32>
      %cst_78 = arith.constant 1.000000e+00 : f32
      %137 = vector.broadcast %cst_78 : f32 to vector<8x32xf32>
      %138 = arith.addf %137, %136 : vector<8x32xf32>
      %139 = arith.divf %137, %138 : vector<8x32xf32>
      %140 = vector.extract_strided_slice %133 {offsets = [0, 32], sizes = [8, 32], strides = [1, 1]} : vector<8x128xf32> to vector<8x32xf32>
      %141 = arith.negf %140 : vector<8x32xf32>
      %142 = math.exp %141 : vector<8x32xf32>
      %cst_79 = arith.constant 1.000000e+00 : f32
      %143 = vector.broadcast %cst_79 : f32 to vector<8x32xf32>
      %144 = arith.addf %143, %142 : vector<8x32xf32>
      %145 = arith.divf %143, %144 : vector<8x32xf32>
      %146 = vector.extract_strided_slice %133 {offsets = [0, 64], sizes = [8, 32], strides = [1, 1]} : vector<8x128xf32> to vector<8x32xf32>
      %147 = math.tanh %146 : vector<8x32xf32>
      %148 = vector.extract_strided_slice %133 {offsets = [0, 96], sizes = [8, 32], strides = [1, 1]} : vector<8x128xf32> to vector<8x32xf32>
      %149 = arith.negf %148 : vector<8x32xf32>
      %150 = math.exp %149 : vector<8x32xf32>
      %cst_80 = arith.constant 1.000000e+00 : f32
      %151 = vector.broadcast %cst_80 : f32 to vector<8x32xf32>
      %152 = arith.addf %151, %150 : vector<8x32xf32>
      %153 = arith.divf %151, %152 : vector<8x32xf32>
      %154 = arith.mulf %145, %120 : vector<8x32xf32>
      %155 = arith.mulf %139, %147 : vector<8x32xf32>
      %156 = arith.addf %154, %155 : vector<8x32xf32>
      %157 = math.tanh %156 : vector<8x32xf32>
      %158 = arith.mulf %153, %157 : vector<8x32xf32>
      %c1_i32 = arith.constant 1 : i32
      %159 = arith.addi %0, %c1_i32 : i32
      %160 = vector.broadcast %159 : i32 to vector<8x1xi32>
      %161 = arith.cmpi slt, %160, %12 : vector<8x1xi32>
      %162 = vector.shape_cast %161 : vector<8x1xi1> to vector<8x1xi1>
      %163 = vector.broadcast %162 : vector<8x1xi1> to vector<8x32xi1>
      %164 = arith.select %163, %158, %117 : vector<8x32xi1>, vector<8x32xf32>
      %165 = vector.shape_cast %161 : vector<8x1xi1> to vector<8x1xi1>
      %166 = vector.broadcast %165 : vector<8x1xi1> to vector<8x32xi1>
      %167 = arith.select %166, %156, %120 : vector<8x32xi1>, vector<8x32xf32>
      %cst_81 = arith.constant 0.000000e+00 : f32
      %168 = vector.broadcast %cst_81 : f32 to vector<8x32xf32>
      %169 = vector.shape_cast %161 : vector<8x1xi1> to vector<8x1xi1>
      %170 = vector.broadcast %169 : vector<8x1xi1> to vector<8x32xi1>
      %171 = arith.select %170, %158, %168 : vector<8x32xi1>, vector<8x32xf32>
      %172 = arith.truncf %171 : vector<8x32xf32> to vector<8x32xbf16>
      %c1_82 = arith.constant 1 : index
      %c0_83 = arith.constant 0 : index
      %c0_84 = arith.constant 0 : index
      %173 = vector.load %arg8[%c1_82, %c0_83, %c0_84] : memref<8x8x32xbf16, #tpu.memory_space<vmem>>, vector<1x8x32xbf16>
      %174 = vector.shape_cast %173 : vector<1x8x32xbf16> to vector<8x32xbf16>
      %175 = vector.shape_cast %172 : vector<8x32xbf16> to vector<1x8x32xbf16>
      tpu.vector_store %arg8[%c1_82, %c0_83, %c0_84], %175 {strides = array<i32>} : memref<8x8x32xbf16, #tpu.memory_space<vmem>>, vector<1x8x32xbf16>,
      %c2_85 = arith.constant 2 : index
      %c0_86 = arith.constant 0 : index
      %c0_87 = arith.constant 0 : index
      %176 = vector.load %arg11[%c2_85, %c0_86, %c0_87] : memref<8x8x128xf32, #tpu.memory_space<vmem>>, vector<1x8x128xf32>
      %177 = vector.shape_cast %176 : vector<1x8x128xf32> to vector<8x128xf32>
      %178 = arith.truncf %164 : vector<8x32xf32> to vector<8x32xbf16>
      %cst_88 = arith.constant dense<0.000000e+00> : vector<8x128xf32>
      %179 = tpu.matmul %178, %14, %cst_88 {dimension_numbers = #tpu.dot_dimension_numbers<[1], [0], [0], [1], [0, 0, 1, 1], [], []>} : vector<8x32xbf16>, vector<32x128xbf16>, vector<8x128xf32> -> vector<8x128xf32>
      %180 = arith.addf %177, %179 : vector<8x128xf32>
      %181 = vector.extract_strided_slice %180 {offsets = [0, 0], sizes = [8, 32], strides = [1, 1]} : vector<8x128xf32> to vector<8x32xf32>
      %182 = arith.negf %181 : vector<8x32xf32>
      %183 = math.exp %182 : vector<8x32xf32>
      %cst_89 = arith.constant 1.000000e+00 : f32
      %184 = vector.broadcast %cst_89 : f32 to vector<8x32xf32>
      %185 = arith.addf %184, %183 : vector<8x32xf32>
      %186 = arith.divf %184, %185 : vector<8x32xf32>
      %187 = vector.extract_strided_slice %180 {offsets = [0, 32], sizes = [8, 32], strides = [1, 1]} : vector<8x128xf32> to vector<8x32xf32>
      %188 = arith.negf %187 : vector<8x32xf32>
      %189 = math.exp %188 : vector<8x32xf32>
      %cst_90 = arith.constant 1.000000e+00 : f32
      %190 = vector.broadcast %cst_90 : f32 to vector<8x32xf32>
      %191 = arith.addf %190, %189 : vector<8x32xf32>
      %192 = arith.divf %190, %191 : vector<8x32xf32>
      %193 = vector.extract_strided_slice %180 {offsets = [0, 64], sizes = [8, 32], strides = [1, 1]} : vector<8x128xf32> to vector<8x32xf32>
      %194 = math.tanh %193 : vector<8x32xf32>
      %195 = vector.extract_strided_slice %180 {offsets = [0, 96], sizes = [8, 32], strides = [1, 1]} : vector<8x128xf32> to vector<8x32xf32>
      %196 = arith.negf %195 : vector<8x32xf32>
      %197 = math.exp %196 : vector<8x32xf32>
      %cst_91 = arith.constant 1.000000e+00 : f32
      %198 = vector.broadcast %cst_91 : f32 to vector<8x32xf32>
      %199 = arith.addf %198, %197 : vector<8x32xf32>
      %200 = arith.divf %198, %199 : vector<8x32xf32>
      %201 = arith.mulf %192, %167 : vector<8x32xf32>
      %202 = arith.mulf %186, %194 : vector<8x32xf32>
      %203 = arith.addf %201, %202 : vector<8x32xf32>
      %204 = math.tanh %203 : vector<8x32xf32>
      %205 = arith.mulf %200, %204 : vector<8x32xf32>
      %c2_i32 = arith.constant 2 : i32
      %206 = arith.addi %0, %c2_i32 : i32
      %207 = vector.broadcast %206 : i32 to vector<8x1xi32>
      %208 = arith.cmpi slt, %207, %12 : vector<8x1xi32>
      %209 = vector.shape_cast %208 : vector<8x1xi1> to vector<8x1xi1>
      %210 = vector.broadcast %209 : vector<8x1xi1> to vector<8x32xi1>
      %211 = arith.select %210, %205, %164 : vector<8x32xi1>, vector<8x32xf32>
      %212 = vector.shape_cast %208 : vector<8x1xi1> to vector<8x1xi1>
      %213 = vector.broadcast %212 : vector<8x1xi1> to vector<8x32xi1>
      %214 = arith.select %213, %203, %167 : vector<8x32xi1>, vector<8x32xf32>
      %cst_92 = arith.constant 0.000000e+00 : f32
      %215 = vector.broadcast %cst_92 : f32 to vector<8x32xf32>
      %216 = vector.shape_cast %208 : vector<8x1xi1> to vector<8x1xi1>
      %217 = vector.broadcast %216 : vector<8x1xi1> to vector<8x32xi1>
      %218 = arith.select %217, %205, %215 : vector<8x32xi1>, vector<8x32xf32>
      %219 = arith.truncf %218 : vector<8x32xf32> to vector<8x32xbf16>
      %c2_93 = arith.constant 2 : index
      %c0_94 = arith.constant 0 : index
      %c0_95 = arith.constant 0 : index
      %220 = vector.load %arg8[%c2_93, %c0_94, %c0_95] : memref<8x8x32xbf16, #tpu.memory_space<vmem>>, vector<1x8x32xbf16>
      %221 = vector.shape_cast %220 : vector<1x8x32xbf16> to vector<8x32xbf16>
      %222 = vector.shape_cast %219 : vector<8x32xbf16> to vector<1x8x32xbf16>
      tpu.vector_store %arg8[%c2_93, %c0_94, %c0_95], %222 {strides = array<i32>} : memref<8x8x32xbf16, #tpu.memory_space<vmem>>, vector<1x8x32xbf16>,
      %c3_96 = arith.constant 3 : index
      %c0_97 = arith.constant 0 : index
      %c0_98 = arith.constant 0 : index
      %223 = vector.load %arg11[%c3_96, %c0_97, %c0_98] : memref<8x8x128xf32, #tpu.memory_space<vmem>>, vector<1x8x128xf32>
      %224 = vector.shape_cast %223 : vector<1x8x128xf32> to vector<8x128xf32>
      %225 = arith.truncf %211 : vector<8x32xf32> to vector<8x32xbf16>
      %cst_99 = arith.constant dense<0.000000e+00> : vector<8x128xf32>
      %226 = tpu.matmul %225, %14, %cst_99 {dimension_numbers = #tpu.dot_dimension_numbers<[1], [0], [0], [1], [0, 0, 1, 1], [], []>} : vector<8x32xbf16>, vector<32x128xbf16>, vector<8x128xf32> -> vector<8x128xf32>
      %227 = arith.addf %224, %226 : vector<8x128xf32>
      %228 = vector.extract_strided_slice %227 {offsets = [0, 0], sizes = [8, 32], strides = [1, 1]} : vector<8x128xf32> to vector<8x32xf32>
      %229 = arith.negf %228 : vector<8x32xf32>
      %230 = math.exp %229 : vector<8x32xf32>
      %cst_100 = arith.constant 1.000000e+00 : f32
      %231 = vector.broadcast %cst_100 : f32 to vector<8x32xf32>
      %232 = arith.addf %231, %230 : vector<8x32xf32>
      %233 = arith.divf %231, %232 : vector<8x32xf32>
      %234 = vector.extract_strided_slice %227 {offsets = [0, 32], sizes = [8, 32], strides = [1, 1]} : vector<8x128xf32> to vector<8x32xf32>
      %235 = arith.negf %234 : vector<8x32xf32>
      %236 = math.exp %235 : vector<8x32xf32>
      %cst_101 = arith.constant 1.000000e+00 : f32
      %237 = vector.broadcast %cst_101 : f32 to vector<8x32xf32>
      %238 = arith.addf %237, %236 : vector<8x32xf32>
      %239 = arith.divf %237, %238 : vector<8x32xf32>
      %240 = vector.extract_strided_slice %227 {offsets = [0, 64], sizes = [8, 32], strides = [1, 1]} : vector<8x128xf32> to vector<8x32xf32>
      %241 = math.tanh %240 : vector<8x32xf32>
      %242 = vector.extract_strided_slice %227 {offsets = [0, 96], sizes = [8, 32], strides = [1, 1]} : vector<8x128xf32> to vector<8x32xf32>
      %243 = arith.negf %242 : vector<8x32xf32>
      %244 = math.exp %243 : vector<8x32xf32>
      %cst_102 = arith.constant 1.000000e+00 : f32
      %245 = vector.broadcast %cst_102 : f32 to vector<8x32xf32>
      %246 = arith.addf %245, %244 : vector<8x32xf32>
      %247 = arith.divf %245, %246 : vector<8x32xf32>
      %248 = arith.mulf %239, %214 : vector<8x32xf32>
      %249 = arith.mulf %233, %241 : vector<8x32xf32>
      %250 = arith.addf %248, %249 : vector<8x32xf32>
      %251 = math.tanh %250 : vector<8x32xf32>
      %252 = arith.mulf %247, %251 : vector<8x32xf32>
      %c3_i32 = arith.constant 3 : i32
      %253 = arith.addi %0, %c3_i32 : i32
      %254 = vector.broadcast %253 : i32 to vector<8x1xi32>
      %255 = arith.cmpi slt, %254, %12 : vector<8x1xi32>
      %256 = vector.shape_cast %255 : vector<8x1xi1> to vector<8x1xi1>
      %257 = vector.broadcast %256 : vector<8x1xi1> to vector<8x32xi1>
      %258 = arith.select %257, %252, %211 : vector<8x32xi1>, vector<8x32xf32>
      %259 = vector.shape_cast %255 : vector<8x1xi1> to vector<8x1xi1>
      %260 = vector.broadcast %259 : vector<8x1xi1> to vector<8x32xi1>
      %261 = arith.select %260, %250, %214 : vector<8x32xi1>, vector<8x32xf32>
      %cst_103 = arith.constant 0.000000e+00 : f32
      %262 = vector.broadcast %cst_103 : f32 to vector<8x32xf32>
      %263 = vector.shape_cast %255 : vector<8x1xi1> to vector<8x1xi1>
      %264 = vector.broadcast %263 : vector<8x1xi1> to vector<8x32xi1>
      %265 = arith.select %264, %252, %262 : vector<8x32xi1>, vector<8x32xf32>
      %266 = arith.truncf %265 : vector<8x32xf32> to vector<8x32xbf16>
      %c3_104 = arith.constant 3 : index
      %c0_105 = arith.constant 0 : index
      %c0_106 = arith.constant 0 : index
      %267 = vector.load %arg8[%c3_104, %c0_105, %c0_106] : memref<8x8x32xbf16, #tpu.memory_space<vmem>>, vector<1x8x32xbf16>
      %268 = vector.shape_cast %267 : vector<1x8x32xbf16> to vector<8x32xbf16>
      %269 = vector.shape_cast %266 : vector<8x32xbf16> to vector<1x8x32xbf16>
      tpu.vector_store %arg8[%c3_104, %c0_105, %c0_106], %269 {strides = array<i32>} : memref<8x8x32xbf16, #tpu.memory_space<vmem>>, vector<1x8x32xbf16>,
      %c4_107 = arith.constant 4 : index
      %c0_108 = arith.constant 0 : index
      %c0_109 = arith.constant 0 : index
      %270 = vector.load %arg11[%c4_107, %c0_108, %c0_109] : memref<8x8x128xf32, #tpu.memory_space<vmem>>, vector<1x8x128xf32>
      %271 = vector.shape_cast %270 : vector<1x8x128xf32> to vector<8x128xf32>
      %272 = arith.truncf %258 : vector<8x32xf32> to vector<8x32xbf16>
      %cst_110 = arith.constant dense<0.000000e+00> : vector<8x128xf32>
      %273 = tpu.matmul %272, %14, %cst_110 {dimension_numbers = #tpu.dot_dimension_numbers<[1], [0], [0], [1], [0, 0, 1, 1], [], []>} : vector<8x32xbf16>, vector<32x128xbf16>, vector<8x128xf32> -> vector<8x128xf32>
      %274 = arith.addf %271, %273 : vector<8x128xf32>
      %275 = vector.extract_strided_slice %274 {offsets = [0, 0], sizes = [8, 32], strides = [1, 1]} : vector<8x128xf32> to vector<8x32xf32>
      %276 = arith.negf %275 : vector<8x32xf32>
      %277 = math.exp %276 : vector<8x32xf32>
      %cst_111 = arith.constant 1.000000e+00 : f32
      %278 = vector.broadcast %cst_111 : f32 to vector<8x32xf32>
      %279 = arith.addf %278, %277 : vector<8x32xf32>
      %280 = arith.divf %278, %279 : vector<8x32xf32>
      %281 = vector.extract_strided_slice %274 {offsets = [0, 32], sizes = [8, 32], strides = [1, 1]} : vector<8x128xf32> to vector<8x32xf32>
      %282 = arith.negf %281 : vector<8x32xf32>
      %283 = math.exp %282 : vector<8x32xf32>
      %cst_112 = arith.constant 1.000000e+00 : f32
      %284 = vector.broadcast %cst_112 : f32 to vector<8x32xf32>
      %285 = arith.addf %284, %283 : vector<8x32xf32>
      %286 = arith.divf %284, %285 : vector<8x32xf32>
      %287 = vector.extract_strided_slice %274 {offsets = [0, 64], sizes = [8, 32], strides = [1, 1]} : vector<8x128xf32> to vector<8x32xf32>
      %288 = math.tanh %287 : vector<8x32xf32>
      %289 = vector.extract_strided_slice %274 {offsets = [0, 96], sizes = [8, 32], strides = [1, 1]} : vector<8x128xf32> to vector<8x32xf32>
      %290 = arith.negf %289 : vector<8x32xf32>
      %291 = math.exp %290 : vector<8x32xf32>
      %cst_113 = arith.constant 1.000000e+00 : f32
      %292 = vector.broadcast %cst_113 : f32 to vector<8x32xf32>
      %293 = arith.addf %292, %291 : vector<8x32xf32>
      %294 = arith.divf %292, %293 : vector<8x32xf32>
      %295 = arith.mulf %286, %261 : vector<8x32xf32>
      %296 = arith.mulf %280, %288 : vector<8x32xf32>
      %297 = arith.addf %295, %296 : vector<8x32xf32>
      %298 = math.tanh %297 : vector<8x32xf32>
      %299 = arith.mulf %294, %298 : vector<8x32xf32>
      %c4_i32 = arith.constant 4 : i32
      %300 = arith.addi %0, %c4_i32 : i32
      %301 = vector.broadcast %300 : i32 to vector<8x1xi32>
      %302 = arith.cmpi slt, %301, %12 : vector<8x1xi32>
      %303 = vector.shape_cast %302 : vector<8x1xi1> to vector<8x1xi1>
      %304 = vector.broadcast %303 : vector<8x1xi1> to vector<8x32xi1>
      %305 = arith.select %304, %299, %258 : vector<8x32xi1>, vector<8x32xf32>
      %306 = vector.shape_cast %302 : vector<8x1xi1> to vector<8x1xi1>
      %307 = vector.broadcast %306 : vector<8x1xi1> to vector<8x32xi1>
      %308 = arith.select %307, %297, %261 : vector<8x32xi1>, vector<8x32xf32>
      %cst_114 = arith.constant 0.000000e+00 : f32
      %309 = vector.broadcast %cst_114 : f32 to vector<8x32xf32>
      %310 = vector.shape_cast %302 : vector<8x1xi1> to vector<8x1xi1>
      %311 = vector.broadcast %310 : vector<8x1xi1> to vector<8x32xi1>
      %312 = arith.select %311, %299, %309 : vector<8x32xi1>, vector<8x32xf32>
      %313 = arith.truncf %312 : vector<8x32xf32> to vector<8x32xbf16>
      %c4_115 = arith.constant 4 : index
      %c0_116 = arith.constant 0 : index
      %c0_117 = arith.constant 0 : index
      %314 = vector.load %arg8[%c4_115, %c0_116, %c0_117] : memref<8x8x32xbf16, #tpu.memory_space<vmem>>, vector<1x8x32xbf16>
      %315 = vector.shape_cast %314 : vector<1x8x32xbf16> to vector<8x32xbf16>
      %316 = vector.shape_cast %313 : vector<8x32xbf16> to vector<1x8x32xbf16>
      tpu.vector_store %arg8[%c4_115, %c0_116, %c0_117], %316 {strides = array<i32>} : memref<8x8x32xbf16, #tpu.memory_space<vmem>>, vector<1x8x32xbf16>,
      %c5_118 = arith.constant 5 : index
      %c0_119 = arith.constant 0 : index
      %c0_120 = arith.constant 0 : index
      %317 = vector.load %arg11[%c5_118, %c0_119, %c0_120] : memref<8x8x128xf32, #tpu.memory_space<vmem>>, vector<1x8x128xf32>
      %318 = vector.shape_cast %317 : vector<1x8x128xf32> to vector<8x128xf32>
      %319 = arith.truncf %305 : vector<8x32xf32> to vector<8x32xbf16>
      %cst_121 = arith.constant dense<0.000000e+00> : vector<8x128xf32>
      %320 = tpu.matmul %319, %14, %cst_121 {dimension_numbers = #tpu.dot_dimension_numbers<[1], [0], [0], [1], [0, 0, 1, 1], [], []>} : vector<8x32xbf16>, vector<32x128xbf16>, vector<8x128xf32> -> vector<8x128xf32>
      %321 = arith.addf %318, %320 : vector<8x128xf32>
      %322 = vector.extract_strided_slice %321 {offsets = [0, 0], sizes = [8, 32], strides = [1, 1]} : vector<8x128xf32> to vector<8x32xf32>
      %323 = arith.negf %322 : vector<8x32xf32>
      %324 = math.exp %323 : vector<8x32xf32>
      %cst_122 = arith.constant 1.000000e+00 : f32
      %325 = vector.broadcast %cst_122 : f32 to vector<8x32xf32>
      %326 = arith.addf %325, %324 : vector<8x32xf32>
      %327 = arith.divf %325, %326 : vector<8x32xf32>
      %328 = vector.extract_strided_slice %321 {offsets = [0, 32], sizes = [8, 32], strides = [1, 1]} : vector<8x128xf32> to vector<8x32xf32>
      %329 = arith.negf %328 : vector<8x32xf32>
      %330 = math.exp %329 : vector<8x32xf32>
      %cst_123 = arith.constant 1.000000e+00 : f32
      %331 = vector.broadcast %cst_123 : f32 to vector<8x32xf32>
      %332 = arith.addf %331, %330 : vector<8x32xf32>
      %333 = arith.divf %331, %332 : vector<8x32xf32>
      %334 = vector.extract_strided_slice %321 {offsets = [0, 64], sizes = [8, 32], strides = [1, 1]} : vector<8x128xf32> to vector<8x32xf32>
      %335 = math.tanh %334 : vector<8x32xf32>
      %336 = vector.extract_strided_slice %321 {offsets = [0, 96], sizes = [8, 32], strides = [1, 1]} : vector<8x128xf32> to vector<8x32xf32>
      %337 = arith.negf %336 : vector<8x32xf32>
      %338 = math.exp %337 : vector<8x32xf32>
      %cst_124 = arith.constant 1.000000e+00 : f32
      %339 = vector.broadcast %cst_124 : f32 to vector<8x32xf32>
      %340 = arith.addf %339, %338 : vector<8x32xf32>
      %341 = arith.divf %339, %340 : vector<8x32xf32>
      %342 = arith.mulf %333, %308 : vector<8x32xf32>
      %343 = arith.mulf %327, %335 : vector<8x32xf32>
      %344 = arith.addf %342, %343 : vector<8x32xf32>
      %345 = math.tanh %344 : vector<8x32xf32>
      %346 = arith.mulf %341, %345 : vector<8x32xf32>
      %c5_i32 = arith.constant 5 : i32
      %347 = arith.addi %0, %c5_i32 : i32
      %348 = vector.broadcast %347 : i32 to vector<8x1xi32>
      %349 = arith.cmpi slt, %348, %12 : vector<8x1xi32>
      %350 = vector.shape_cast %349 : vector<8x1xi1> to vector<8x1xi1>
      %351 = vector.broadcast %350 : vector<8x1xi1> to vector<8x32xi1>
      %352 = arith.select %351, %346, %305 : vector<8x32xi1>, vector<8x32xf32>
      %353 = vector.shape_cast %349 : vector<8x1xi1> to vector<8x1xi1>
      %354 = vector.broadcast %353 : vector<8x1xi1> to vector<8x32xi1>
      %355 = arith.select %354, %344, %308 : vector<8x32xi1>, vector<8x32xf32>
      %cst_125 = arith.constant 0.000000e+00 : f32
      %356 = vector.broadcast %cst_125 : f32 to vector<8x32xf32>
      %357 = vector.shape_cast %349 : vector<8x1xi1> to vector<8x1xi1>
      %358 = vector.broadcast %357 : vector<8x1xi1> to vector<8x32xi1>
      %359 = arith.select %358, %346, %356 : vector<8x32xi1>, vector<8x32xf32>
      %360 = arith.truncf %359 : vector<8x32xf32> to vector<8x32xbf16>
      %c5_126 = arith.constant 5 : index
      %c0_127 = arith.constant 0 : index
      %c0_128 = arith.constant 0 : index
      %361 = vector.load %arg8[%c5_126, %c0_127, %c0_128] : memref<8x8x32xbf16, #tpu.memory_space<vmem>>, vector<1x8x32xbf16>
      %362 = vector.shape_cast %361 : vector<1x8x32xbf16> to vector<8x32xbf16>
      %363 = vector.shape_cast %360 : vector<8x32xbf16> to vector<1x8x32xbf16>
      tpu.vector_store %arg8[%c5_126, %c0_127, %c0_128], %363 {strides = array<i32>} : memref<8x8x32xbf16, #tpu.memory_space<vmem>>, vector<1x8x32xbf16>,
      %c6_129 = arith.constant 6 : index
      %c0_130 = arith.constant 0 : index
      %c0_131 = arith.constant 0 : index
      %364 = vector.load %arg11[%c6_129, %c0_130, %c0_131] : memref<8x8x128xf32, #tpu.memory_space<vmem>>, vector<1x8x128xf32>
      %365 = vector.shape_cast %364 : vector<1x8x128xf32> to vector<8x128xf32>
      %366 = arith.truncf %352 : vector<8x32xf32> to vector<8x32xbf16>
      %cst_132 = arith.constant dense<0.000000e+00> : vector<8x128xf32>
      %367 = tpu.matmul %366, %14, %cst_132 {dimension_numbers = #tpu.dot_dimension_numbers<[1], [0], [0], [1], [0, 0, 1, 1], [], []>} : vector<8x32xbf16>, vector<32x128xbf16>, vector<8x128xf32> -> vector<8x128xf32>
      %368 = arith.addf %365, %367 : vector<8x128xf32>
      %369 = vector.extract_strided_slice %368 {offsets = [0, 0], sizes = [8, 32], strides = [1, 1]} : vector<8x128xf32> to vector<8x32xf32>
      %370 = arith.negf %369 : vector<8x32xf32>
      %371 = math.exp %370 : vector<8x32xf32>
      %cst_133 = arith.constant 1.000000e+00 : f32
      %372 = vector.broadcast %cst_133 : f32 to vector<8x32xf32>
      %373 = arith.addf %372, %371 : vector<8x32xf32>
      %374 = arith.divf %372, %373 : vector<8x32xf32>
      %375 = vector.extract_strided_slice %368 {offsets = [0, 32], sizes = [8, 32], strides = [1, 1]} : vector<8x128xf32> to vector<8x32xf32>
      %376 = arith.negf %375 : vector<8x32xf32>
      %377 = math.exp %376 : vector<8x32xf32>
      %cst_134 = arith.constant 1.000000e+00 : f32
      %378 = vector.broadcast %cst_134 : f32 to vector<8x32xf32>
      %379 = arith.addf %378, %377 : vector<8x32xf32>
      %380 = arith.divf %378, %379 : vector<8x32xf32>
      %381 = vector.extract_strided_slice %368 {offsets = [0, 64], sizes = [8, 32], strides = [1, 1]} : vector<8x128xf32> to vector<8x32xf32>
      %382 = math.tanh %381 : vector<8x32xf32>
      %383 = vector.extract_strided_slice %368 {offsets = [0, 96], sizes = [8, 32], strides = [1, 1]} : vector<8x128xf32> to vector<8x32xf32>
      %384 = arith.negf %383 : vector<8x32xf32>
      %385 = math.exp %384 : vector<8x32xf32>
      %cst_135 = arith.constant 1.000000e+00 : f32
      %386 = vector.broadcast %cst_135 : f32 to vector<8x32xf32>
      %387 = arith.addf %386, %385 : vector<8x32xf32>
      %388 = arith.divf %386, %387 : vector<8x32xf32>
      %389 = arith.mulf %380, %355 : vector<8x32xf32>
      %390 = arith.mulf %374, %382 : vector<8x32xf32>
      %391 = arith.addf %389, %390 : vector<8x32xf32>
      %392 = math.tanh %391 : vector<8x32xf32>
      %393 = arith.mulf %388, %392 : vector<8x32xf32>
      %c6_i32 = arith.constant 6 : i32
      %394 = arith.addi %0, %c6_i32 : i32
      %395 = vector.broadcast %394 : i32 to vector<8x1xi32>
      %396 = arith.cmpi slt, %395, %12 : vector<8x1xi32>
      %397 = vector.shape_cast %396 : vector<8x1xi1> to vector<8x1xi1>
      %398 = vector.broadcast %397 : vector<8x1xi1> to vector<8x32xi1>
      %399 = arith.select %398, %393, %352 : vector<8x32xi1>, vector<8x32xf32>
      %400 = vector.shape_cast %396 : vector<8x1xi1> to vector<8x1xi1>
      %401 = vector.broadcast %400 : vector<8x1xi1> to vector<8x32xi1>
      %402 = arith.select %401, %391, %355 : vector<8x32xi1>, vector<8x32xf32>
      %cst_136 = arith.constant 0.000000e+00 : f32
      %403 = vector.broadcast %cst_136 : f32 to vector<8x32xf32>
      %404 = vector.shape_cast %396 : vector<8x1xi1> to vector<8x1xi1>
      %405 = vector.broadcast %404 : vector<8x1xi1> to vector<8x32xi1>
      %406 = arith.select %405, %393, %403 : vector<8x32xi1>, vector<8x32xf32>
      %407 = arith.truncf %406 : vector<8x32xf32> to vector<8x32xbf16>
      %c6_137 = arith.constant 6 : index
      %c0_138 = arith.constant 0 : index
      %c0_139 = arith.constant 0 : index
      %408 = vector.load %arg8[%c6_137, %c0_138, %c0_139] : memref<8x8x32xbf16, #tpu.memory_space<vmem>>, vector<1x8x32xbf16>
      %409 = vector.shape_cast %408 : vector<1x8x32xbf16> to vector<8x32xbf16>
      %410 = vector.shape_cast %407 : vector<8x32xbf16> to vector<1x8x32xbf16>
      tpu.vector_store %arg8[%c6_137, %c0_138, %c0_139], %410 {strides = array<i32>} : memref<8x8x32xbf16, #tpu.memory_space<vmem>>, vector<1x8x32xbf16>,
      %c7_140 = arith.constant 7 : index
      %c0_141 = arith.constant 0 : index
      %c0_142 = arith.constant 0 : index
      %411 = vector.load %arg11[%c7_140, %c0_141, %c0_142] : memref<8x8x128xf32, #tpu.memory_space<vmem>>, vector<1x8x128xf32>
      %412 = vector.shape_cast %411 : vector<1x8x128xf32> to vector<8x128xf32>
      %413 = arith.truncf %399 : vector<8x32xf32> to vector<8x32xbf16>
      %cst_143 = arith.constant dense<0.000000e+00> : vector<8x128xf32>
      %414 = tpu.matmul %413, %14, %cst_143 {dimension_numbers = #tpu.dot_dimension_numbers<[1], [0], [0], [1], [0, 0, 1, 1], [], []>} : vector<8x32xbf16>, vector<32x128xbf16>, vector<8x128xf32> -> vector<8x128xf32>
      %415 = arith.addf %412, %414 : vector<8x128xf32>
      %416 = vector.extract_strided_slice %415 {offsets = [0, 0], sizes = [8, 32], strides = [1, 1]} : vector<8x128xf32> to vector<8x32xf32>
      %417 = arith.negf %416 : vector<8x32xf32>
      %418 = math.exp %417 : vector<8x32xf32>
      %cst_144 = arith.constant 1.000000e+00 : f32
      %419 = vector.broadcast %cst_144 : f32 to vector<8x32xf32>
      %420 = arith.addf %419, %418 : vector<8x32xf32>
      %421 = arith.divf %419, %420 : vector<8x32xf32>
      %422 = vector.extract_strided_slice %415 {offsets = [0, 32], sizes = [8, 32], strides = [1, 1]} : vector<8x128xf32> to vector<8x32xf32>
      %423 = arith.negf %422 : vector<8x32xf32>
      %424 = math.exp %423 : vector<8x32xf32>
      %cst_145 = arith.constant 1.000000e+00 : f32
      %425 = vector.broadcast %cst_145 : f32 to vector<8x32xf32>
      %426 = arith.addf %425, %424 : vector<8x32xf32>
      %427 = arith.divf %425, %426 : vector<8x32xf32>
      %428 = vector.extract_strided_slice %415 {offsets = [0, 64], sizes = [8, 32], strides = [1, 1]} : vector<8x128xf32> to vector<8x32xf32>
      %429 = math.tanh %428 : vector<8x32xf32>
      %430 = vector.extract_strided_slice %415 {offsets = [0, 96], sizes = [8, 32], strides = [1, 1]} : vector<8x128xf32> to vector<8x32xf32>
      %431 = arith.negf %430 : vector<8x32xf32>
      %432 = math.exp %431 : vector<8x32xf32>
      %cst_146 = arith.constant 1.000000e+00 : f32
      %433 = vector.broadcast %cst_146 : f32 to vector<8x32xf32>
      %434 = arith.addf %433, %432 : vector<8x32xf32>
      %435 = arith.divf %433, %434 : vector<8x32xf32>
      %436 = arith.mulf %427, %402 : vector<8x32xf32>
      %437 = arith.mulf %421, %429 : vector<8x32xf32>
      %438 = arith.addf %436, %437 : vector<8x32xf32>
      %439 = math.tanh %438 : vector<8x32xf32>
      %440 = arith.mulf %435, %439 : vector<8x32xf32>
      %c7_i32 = arith.constant 7 : i32
      %441 = arith.addi %0, %c7_i32 : i32
      %442 = vector.broadcast %441 : i32 to vector<8x1xi32>
      %443 = arith.cmpi slt, %442, %12 : vector<8x1xi32>
      %444 = vector.shape_cast %443 : vector<8x1xi1> to vector<8x1xi1>
      %445 = vector.broadcast %444 : vector<8x1xi1> to vector<8x32xi1>
      %446 = arith.select %445, %440, %399 : vector<8x32xi1>, vector<8x32xf32>
      %447 = vector.shape_cast %443 : vector<8x1xi1> to vector<8x1xi1>
      %448 = vector.broadcast %447 : vector<8x1xi1> to vector<8x32xi1>
      %449 = arith.select %448, %438, %402 : vector<8x32xi1>, vector<8x32xf32>
      %cst_147 = arith.constant 0.000000e+00 : f32
      %450 = vector.broadcast %cst_147 : f32 to vector<8x32xf32>
      %451 = vector.shape_cast %443 : vector<8x1xi1> to vector<8x1xi1>
      %452 = vector.broadcast %451 : vector<8x1xi1> to vector<8x32xi1>
      %453 = arith.select %452, %440, %450 : vector<8x32xi1>, vector<8x32xf32>
      %454 = arith.truncf %453 : vector<8x32xf32> to vector<8x32xbf16>
      %c7_148 = arith.constant 7 : index
      %c0_149 = arith.constant 0 : index
      %c0_150 = arith.constant 0 : index
      %455 = vector.load %arg8[%c7_148, %c0_149, %c0_150] : memref<8x8x32xbf16, #tpu.memory_space<vmem>>, vector<1x8x32xbf16>
      %456 = vector.shape_cast %455 : vector<1x8x32xbf16> to vector<8x32xbf16>
      %457 = vector.shape_cast %454 : vector<8x32xbf16> to vector<1x8x32xbf16>
      tpu.vector_store %arg8[%c7_148, %c0_149, %c0_150], %457 {strides = array<i32>} : memref<8x8x32xbf16, #tpu.memory_space<vmem>>, vector<1x8x32xbf16>,
      %c0_151 = arith.constant 0 : index
      %c0_152 = arith.constant 0 : index
      %458 = vector.load %arg9[%c0_151, %c0_152] : memref<8x32xf32, #tpu.memory_space<vmem>>, vector<8x32xf32>
      tpu.vector_store %arg9[%c0_151, %c0_152], %446 {strides = array<i32>} : memref<8x32xf32, #tpu.memory_space<vmem>>, vector<8x32xf32>,
      %c0_153 = arith.constant 0 : index
      %c0_154 = arith.constant 0 : index
      %459 = vector.load %arg10[%c0_153, %c0_154] : memref<8x32xf32, #tpu.memory_space<vmem>>, vector<8x32xf32>
      tpu.vector_store %arg10[%c0_153, %c0_154], %449 {strides = array<i32>} : memref<8x32xf32, #tpu.memory_space<vmem>>, vector<8x32xf32>,
    } else {
    }
    return
  }
  func.func @transform_0(%arg0: i32, %arg1: i32, %arg2: memref<1xi32, #tpu.memory_space<smem>>) -> (i32, i32) {
    %c0_i32 = arith.constant 0 : i32
    %c0_i32_0 = arith.constant 0 : i32
    return %arg0, %c0_i32 : i32, i32
  }
  func.func @transform_1(%arg0: i32, %arg1: i32, %arg2: memref<1xi32, #tpu.memory_space<smem>>) -> (i32, i32, i32) {
    %c0_i32 = arith.constant 0 : i32
    %c0_i32_0 = arith.constant 0 : i32
    return %arg1, %arg0, %c0_i32 : i32, i32, i32
  }
  func.func @transform_2(%arg0: i32, %arg1: i32, %arg2: memref<1xi32, #tpu.memory_space<smem>>) -> (i32, i32) {
    %c0_i32 = arith.constant 0 : i32
    %c0_i32_0 = arith.constant 0 : i32
    %c0_i32_1 = arith.constant 0 : i32
    return %c0_i32, %c0_i32_0 : i32, i32
  }
  func.func @transform_3(%arg0: i32, %arg1: i32, %arg2: memref<1xi32, #tpu.memory_space<smem>>) -> (i32, i32) {
    %c0_i32 = arith.constant 0 : i32
    %c0_i32_0 = arith.constant 0 : i32
    %c0_i32_1 = arith.constant 0 : i32
    return %c0_i32, %c0_i32_0 : i32, i32
  }
  func.func @transform_4(%arg0: i32, %arg1: i32, %arg2: memref<1xi32, #tpu.memory_space<smem>>) -> (i32, i32) {
    %c0_i32 = arith.constant 0 : i32
    %c0_i32_0 = arith.constant 0 : i32
    %c0_i32_1 = arith.constant 0 : i32
    return %c0_i32, %c0_i32_0 : i32, i32
  }
  func.func @transform_5(%arg0: i32, %arg1: i32, %arg2: memref<1xi32, #tpu.memory_space<smem>>) -> (i32, i32, i32) {
    %c0_i32 = arith.constant 0 : i32
    %c0_i32_0 = arith.constant 0 : i32
    return %arg1, %arg0, %c0_i32 : i32, i32, i32
  }
  func.func @transform_6(%arg0: i32, %arg1: i32, %arg2: memref<1xi32, #tpu.memory_space<smem>>) -> (i32, i32) {
    %c0_i32 = arith.constant 0 : i32
    %c0_i32_0 = arith.constant 0 : i32
    return %arg0, %c0_i32 : i32, i32
  }
  func.func @transform_7(%arg0: i32, %arg1: i32, %arg2: memref<1xi32, #tpu.memory_space<smem>>) -> (i32, i32) {
    %c0_i32 = arith.constant 0 : i32
    %c0_i32_0 = arith.constant 0 : i32
    return %arg0, %c0_i32 : i32, i32
  }
}

</mosaic_0001>

<bundles_post_ra>
// kernel: tpu_custom_call.1
= control target key start
LH: loop header
LB: loop body
LE: loop exit
PB: predicated region body
PF: predicated region fallthrough
CT: control target
= control target key end

     0   :  { %15 = vsyncpa [#allocation6], 0  ;;  %s2234_s0 = inlined_call_operand.<no memory space> [shape: s32[1], index: 0, kind: input, shape index: {}]   ;;  %s2235_s1 = inlined_call_operand.vmem [shape: s32[8,1], index: 1, kind: input, shape index: {}]   ;;  %s2236_s2 = inlined_call_operand.hbm [shape: bf16[8,8,32], index: 2, kind: input, shape index: {}]   ;;  %s2237_s3 = inlined_call_operand.vmem [shape: bf16[32,128], index: 3, kind: input, shape index: {}]   ;;  %s2238_s4 = inlined_call_operand.hbm [shape: bf16[32,128], index: 4, kind: input, shape index: {}]   ;;  %s2239_s5 = inlined_call_operand.vmem [shape: f32[1,128], index: 5, kind: input, shape index: {}]   ;;  %s2240_s6 = inlined_call_operand.hbm [shape: bf16[8,8,32], index: 6, kind: output, shape index: {0}]   ;;  %s2241_s7 = inlined_call_operand.hbm [shape: f32[8,32], index: 7, kind: output, shape index: {1}]   ;;  %s2242_s8 = inlined_call_operand.hbm [shape: f32[8,32], index: 8, kind: output, shape index: {2}]  }
   0x1   :  { %16 = vsyncpa [#allocation9], 0 }
   0x2   :  { %17 = vsyncpa [#allocation7], 0 }
   0x3   :  { %18 = vsyncpa [#allocation12], 0  ;;  %s1778_s27 = smov [#allocation5]   ;;  %s1660_s9 = scalar_lea.hbm %s2236_s2, 512 }
   0x4   :  { %s26_s28 = sshll.u32 %s1778_s27, 4  ;;  %p1661_p0 = scmp.ne.s32.totalorder %s2236_s2, %s1660_s9  ;;  %s27_s28 = int_to_ptr.vmem [resolvable:$true] %s26_s28 }
   0x5   :  { %p1664_p1 = scmp.lt.u32.totalorder %s1660_s9, %s2236_s2 }
   0x7   :  { %p1666_p2 = pnand %p1664_p1, %p1661_p0 }
   0x9   :  { %1669 = shalt.err (!%p1666_p2)
}
   0xa   :  { %s1670_s14 = scalar_lea.vmem %s27_s28, 512  ;;  %p1675_p4 = scmp.lt.s32.totalorder %s27_s28, %s27_s28 }
   0xb   :  { %p1671_p3 = scmp.ne.s32.totalorder %s27_s28, %s1670_s14  ;;  %p1676_p5 = scmp.lt.s32.totalorder %s1670_s14, %s1670_s14 }
   0xd   :  { %p1677_p6 = por %p1676_p5, %p1675_p4 }
   0xf   :  { %p1678_p7 = pnand %p1677_p6, %p1671_p3 }
  0x11   :  { %1681 = shalt.err (!%p1678_p7)
}
  0x12   :  { %s1779_s15 = smov 64   ;;  %s1780_s16 = smov 4  }
  0x13   :  { %32 = dma.hbm_to_vmem [thread:$0]  %s2236_s2, 512, %s27_s28, [#allocation6], %s1779_s15, %s1779_s15, %s1780_s16  }
  0x14   :  { %s1781_s19 = smov [#allocation8]   ;;  %s1682_s23 = scalar_lea.hbm %s2238_s4, 256 }
  0x15   :  { %s40_s20 = sshll.u32 %s1781_s19, 4  ;;  %p1683_p8 = scmp.ne.s32.totalorder %s2238_s4, %s1682_s23  ;;  %s41_s20 = int_to_ptr.vmem [resolvable:$true] %s40_s20 }
  0x16   :  { %p1686_p9 = scmp.lt.u32.totalorder %s1682_s23, %s2238_s4 }
  0x18   :  { %p1688_p10 = pnand %p1686_p9, %p1683_p8 }
  0x1a   :  { %1691 = shalt.err (!%p1688_p10)
}
  0x1b   :  { %s1692_s29 = scalar_lea.vmem %s41_s20, 256  ;;  %p1697_p12 = scmp.lt.s32.totalorder %s41_s20, %s41_s20 }
  0x1c   :  { %p1693_p11 = scmp.ne.s32.totalorder %s41_s20, %s1692_s29  ;;  %p1698_p13 = scmp.lt.s32.totalorder %s1692_s29, %s1692_s29 }
  0x1e   :  { %p1699_p0 = por %p1698_p13, %p1697_p12 }
  0x20   :  { %p1700_p1 = pnand %p1699_p0, %p1693_p11 }
  0x22   :  { %1703 = shalt.err (!%p1700_p1)
}
  0x23   :  { %46 = dma.hbm_to_vmem [thread:$0]  %s2238_s4, 256, %s41_s20, [#allocation9], %s1779_s15, %s1779_s15, %s1780_s16  }
  0x24   :  { %1770 = dma.done.wait [#allocation6], 512  }
  0x25   :  { %1771 = vsyncadd [#allocation6], 4294966784 }
  0x26   :  { %1772 = dma.done.wait [#allocation9], 256  }
  0x27   :  { %1773 = vsyncadd [#allocation9], 4294967040  ;;  %vm61_vm0 = vcmask 261120   ;;  %v1782_v0 = vmov 0.0   ;;  %p1303_p2 = scmp.gt.s32.totalorder %s2234_s0, 0 }
  0x28   :  { %62 = vst.msk [vmem:[#allocation11] sm:$0xff] %vm61_vm0, %v1782_v0  ;;  %63 = vst.msk [vmem:[#allocation13] sm:$0xff] %vm61_vm0, %v1782_v0  ;;  %vm69_vm1 = vcmask (!%p1303_p2), 257024   ;;  %v1783_v1 = vmov (!%p1303_p2), 0  }
  0x29   :  { %68 = sbr.rel (%p1303_p2) target bundleno = 48 (0x30), region = 37  ;;  %70 = vst.msk [vmem:[#allocation10] sm:$0xf] (!%p1303_p2), %vm69_vm1, %v1783_v1  ;;  %71 = vst.msk [vmem:[#allocation10 + $0x4] sm:$0xf] (!%p1303_p2), %vm69_vm1, %v1783_v1 }
  0x2a   :  { %72 = vst.msk [vmem:[#allocation10 + $0x8] sm:$0xf] (!%p1303_p2), %vm69_vm1, %v1783_v1  ;;  %73 = vst.msk [vmem:[#allocation10 + $0xc] sm:$0xf] (!%p1303_p2), %vm69_vm1, %v1783_v1 }
  0x2b   :  { %74 = vst.msk [vmem:[#allocation10 + $0x10] sm:$0xf] (!%p1303_p2), %vm69_vm1, %v1783_v1  ;;  %75 = vst.msk [vmem:[#allocation10 + $0x14] sm:$0xf] (!%p1303_p2), %vm69_vm1, %v1783_v1 }
  0x2c   :  { %76 = vst.msk [vmem:[#allocation10 + $0x18] sm:$0xf] (!%p1303_p2), %vm69_vm1, %v1783_v1  ;;  %77 = vst.msk [vmem:[#allocation10 + $0x1c] sm:$0xf] (!%p1303_p2), %vm69_vm1, %v1783_v1 }
  0x30 PF:  { %p1305_p3 = scmp.le.s32.totalorder %s2234_s0, 0 }
  0x31   :  { %v1879_v2 = vld [vmem:[%s2237_s3] sm:$0xff] (!%p1305_p3)   ;;  %v1784_v3 = vmov (!%p1305_p3), 0.0   ;;  %v1887_v4 = vld [vmem:[%s2237_s3 + $0x8] sm:$0xff] (!%p1305_p3)   ;;  %vm1785_vm2 = vmmov (!%p1305_p3), 0   ;;  %v298_v7 = vld [vmem:[#allocation5 + $0x10] sm:$0xf] (!%p1305_p3) }
  0x32   :  { %81 = sbr.rel (%p1305_p3) target bundleno = 5735 (0x1667), region = 41  ;;  %1407 = vmatprep.subr.bf16.mxu0 (!%p1305_p3), %v1784_v3  ;;  %1415 = vmatprep.subr.bf16.mxu1 (!%p1305_p3), %v1784_v3  ;;  %v92_v5 = vld [vmem:[#allocation5] sm:$0xf] (!%p1305_p3)  ;;  %v204_v6 = vld [vmem:[#allocation5 + $0x8] sm:$0xf] (!%p1305_p3)  ;;  %v485_v11 = vld [vmem:[#allocation11] sm:$0xff] (!%p1305_p3) }
  0x33   :  { %1408 = vmatpush3.bf16.msra.mxu0 (!%p1305_p3), %v1879_v2  ;;  %1411 = vmatprep.mubr.msk.bf16.mxu0 (!%p1305_p3), %vm1785_vm2, %v1784_v3  ;;  %v392_v8 = vld [vmem:[#allocation5 + $0x18] sm:$0xf] (!%p1305_p3)  ;;  %v1920_v9 = vld [vmem:[#allocation8] sm:$0xff] (!%p1305_p3)   ;;  %v1925_v10 = vld [vmem:[#allocation8 + $0x8] sm:$0xff] (!%p1305_p3)   ;;  %v488_v12 = vpack.c.bf16 (!%p1305_p3), %v485_v11, %v485_v11  ;;  %v1786_v19 = vmov (!%p1305_p3), 0   ;;  %s1787_s17 = smov (!%p1305_p3), 64  }
  0x34   :  { %1409 = vmatprep.subr.bf16.mxu0 (!%p1305_p3), %v1784_v3  ;;  %1416 = vmatpush3.bf16.msra.mxu1 (!%p1305_p3), %v1879_v2  ;;  %v1942_v13 = vld [vmem:[%s2239_s5] ss:$0 sm:$0xff] (!%p1305_p3)  ;;  %v486_v21 = vld [vmem:[#allocation13] sm:$0xff] (!%p1305_p3)  ;;  %s1788_s18 = smov (!%p1305_p3), 32   ;;  %s1789_s20 = smov (!%p1305_p3), 96  }
  0x35   :  { %1417 = vmatprep.subr.bf16.mxu1 (!%p1305_p3), %v1784_v3  ;;  %1419 = vmatprep.mubr.msk.bf16.mxu1 (!%p1305_p3), %vm1785_vm2, %v1784_v3  ;;  %v1952_v25 = vld [vmem:[%s2235_s1] sm:$0xff] (!%p1305_p3)  ;;  %v251_v35 = vld [vmem:[#allocation5 + $0xc] sm:$0xf] (!%p1305_p3)  ;;  %v345_v37 = vld [vmem:[#allocation5 + $0x14] sm:$0xf] (!%p1305_p3) }
  0x36   :  { %1590 = vset.pattern.permute.xlu1 (!%p1305_p3), %v1786_v19  ;;  %1591 = vset.pattern.permute.xlu0 (!%p1305_p3), %v1786_v19  ;;  %vm1321_vm3 = vcmp.gt.s32.totalorder (!%p1305_p3), %v1952_v25, 0  ;;  %v157_v34 = vld [vmem:[#allocation5 + $0x4] sm:$0xf] (!%p1305_p3)  ;;  %v439_v38 = vld [vmem:[#allocation5 + $0x1c] sm:$0xf] (!%p1305_p3)  ;;  %vm1325_vm5 = vcmp.gt.s32.totalorder (!%p1305_p3), %v1952_v25, 1 }
  0x37   :  { %1410 = vmatpush3.bf16.msra.mxu0 (!%p1305_p3), %v1887_v4  ;;  %v575_v29 = vsel (!%p1305_p3), %vm1321_vm3, 1, %v1786_v19  ;;  %v672_v52 = vsel (!%p1305_p3), %vm1325_vm5, 1, %v1786_v19  ;;  %vm1329_vm7 = vcmp.gt.s32.totalorder (!%p1305_p3), %v1952_v25, 2  ;;  %vm1333_vm9 = vcmp.gt.s32.totalorder (!%p1305_p3), %v1952_v25, 3 }
  0x38   :  { %1423 = vmatprep.subr.bf16.mxu0 (!%p1305_p3), %v1784_v3  ;;  %1418 = vmatpush3.bf16.msra.mxu1 (!%p1305_p3), %v1887_v4  ;;  %vm1337_vm11 = vcmp.gt.s32.totalorder (!%p1305_p3), %v1952_v25, 4  ;;  %vm1341_vm13 = vcmp.gt.s32.totalorder (!%p1305_p3), %v1952_v25, 5  ;;  %vm1345_vm15 = vcmp.gt.s32.totalorder (!%p1305_p3), %v1952_v25, 6  ;;  %vm594_vm3 = vcmask (!%p1305_p3), 257024  }
  0x39   :  { %1431 = vmatprep.subr.bf16.mxu1 %v1784_v3 }
  0x3a   :  { %1412 = vmatmul.mubr.msk.bf16.vlgmr.msra.gmra.mrb[0].mxu0 %vm61_vm0, %v92_v5 }
  0x3b   :  { %1424 = vmatpush3.bf16.msra.mxu0 %v1879_v2  ;;  %1427 = vmatprep.mubr.msk.bf16.mxu0 %vm1785_vm2, %v1784_v3 }
  0x3c   :  { %1425 = vmatprep.subr.bf16.mxu0 %v1784_v3  ;;  %1420 = vmatmul.mubr.msk.bf16.vlgmr.msra.gmra.mrb[0].mxu1 %vm61_vm0, %v157_v34 }
  0x3d   :  { %1432 = vmatpush3.bf16.msra.mxu1 %v1879_v2  ;;  %1435 = vmatprep.mubr.msk.bf16.mxu1 %vm1785_vm2, %v1784_v3 }
  0x3e   :  { %1433 = vmatprep.subr.bf16.mxu1 %v1784_v3 }
  0x3f   :  { %1426 = vmatpush3.bf16.msra.mxu0 %v1887_v4 }
  0x40   :  { %1439 = vmatprep.subr.bf16.mxu0 %v1784_v3 }
  0x41   :  { %1434 = vmatpush3.bf16.msra.mxu1 %v1887_v4 }
  0x42   :  { %1428 = vmatmul.mubr.msk.bf16.vlgmr.msra.gmra.mrb[4].mxu0 %vm61_vm0, %v204_v6  ;;  %1447 = vmatprep.subr.bf16.mxu1 %v1784_v3 }
  0x43   :  { %1440 = vmatpush3.bf16.msra.mxu0 %v1879_v2  ;;  %1443 = vmatprep.mubr.msk.bf16.mxu0 %vm1785_vm2, %v1784_v3 }
  0x44   :  { %1441 = vmatprep.subr.bf16.mxu0 %v1784_v3  ;;  %1436 = vmatmul.mubr.msk.bf16.vlgmr.msra.gmra.mrb[4].mxu1 %vm61_vm0, %v251_v35 }
  0x45   :  { %1448 = vmatpush3.bf16.msra.mxu1 %v1879_v2  ;;  %1451 = vmatprep.mubr.msk.bf16.mxu1 %vm1785_vm2, %v1784_v3 }
  0x46   :  { %1449 = vmatprep.subr.bf16.mxu1 %v1784_v3 }
  0x47   :  { %1442 = vmatpush3.bf16.msra.mxu0 %v1887_v4 }
  0x48   :  { %1455 = vmatprep.subr.bf16.mxu0 %v1784_v3 }
  0x49   :  { %1450 = vmatpush3.bf16.msra.mxu1 %v1887_v4 }
  0x4a   :  { %1444 = vmatmul.mubr.msk.bf16.vlgmr.msra.gmra.mrb[8].mxu0 %vm61_vm0, %v298_v7  ;;  %1463 = vmatprep.subr.bf16.mxu1 %v1784_v3 }
  0x4b   :  { %1456 = vmatpush3.bf16.msra.mxu0 %v1879_v2  ;;  %1459 = vmatprep.mubr.msk.bf16.mxu0 %vm1785_vm2, %v1784_v3 }
  0x4c   :  { %1457 = vmatprep.subr.bf16.mxu0 %v1784_v3  ;;  %1452 = vmatmul.mubr.msk.bf16.vlgmr.msra.gmra.mrb[8].mxu1 %vm61_vm0, %v345_v37 }
  0x4d   :  { %1464 = vmatpush3.bf16.msra.mxu1 %v1879_v2  ;;  %1467 = vmatprep.mubr.msk.bf16.mxu1 %vm1785_vm2, %v1784_v3 }
  0x4e   :  { %1465 = vmatprep.subr.bf16.mxu1 %v1784_v3 }
  0x4f   :  { %1458 = vmatpush3.bf16.msra.mxu0 %v1887_v4 }
  0x50   :  { %1471 = vmatprep.subr.bf16.mxu0 %v1784_v3 }
  0x51   :  { %1466 = vmatpush3.bf16.msra.mxu1 %v1887_v4 }
  0x52   :  { %1460 = vmatmul.mubr.msk.bf16.vlgmr.msra.gmra.mrb[12].mxu0 %vm61_vm0, %v392_v8  ;;  %1479 = vmatprep.subr.bf16.mxu1 %v1784_v3 }
  0x53   :  { %1472 = vmatpush3.bf16.msra.mxu0 %v1920_v9  ;;  %1475 = vmatprep.mubr.msk.bf16.mxu0 %vm1785_vm2, %v1784_v3 }
  0x54   :  { %1473 = vmatprep.subr.bf16.mxu0 %v1784_v3  ;;  %1468 = vmatmul.mubr.msk.bf16.vlgmr.msra.gmra.mrb[12].mxu1 %vm61_vm0, %v439_v38 }
  0x55   :  { %1480 = vmatpush3.bf16.msra.mxu1 %v1920_v9  ;;  %1483 = vmatprep.mubr.msk.bf16.mxu1 %vm1785_vm2, %v1784_v3 }
  0x56   :  { %1481 = vmatprep.subr.bf16.mxu1 %v1784_v3 }
  0x57   :  { %1474 = vmatpush3.bf16.msra.mxu0 %v1925_v10 }
  0x58   :  { %1487 = vmatprep.subr.bf16.mxu0 %v1784_v3 }
  0x59   :  { %1482 = vmatpush3.bf16.msra.mxu1 %v1925_v10 }
  0x5a   :  { %1476 = vmatmul.mubr.msk.bf16.vlgmr.msra.gmra.mrb[0].mxu0 %vm61_vm0, %v488_v12  ;;  %1495 = vmatprep.subr.bf16.mxu1 %v1784_v3 }
  0x5b   :  { %1488 = vmatpush3.bf16.msra.mxu0 %v1920_v9  ;;  %1491 = vmatprep.mubr.msk.bf16.mxu0 %vm1785_vm2, %v1784_v3 }
  0x5c   :  { %1489 = vmatprep.subr.bf16.mxu0 %v1784_v3 }
  0x5f   :  { %1490 = vmatpush3.bf16.msra.mxu0 %v1925_v10 }
  0x60   :  { %1503 = vmatprep.subr.bf16.mxu0 %v1784_v3 }
 0x12d   :  { %v538_v14 = vpop.f32.mrb[0].mxu0 }
 0x12e   :  { %v1535_v15 = vadd.f32 %v1942_v13, %v538_v14  ;;  %v1477_v16 = vpop.f32.mrb[1].mxu0 }
 0x12f   :  { %v541_v17 = vpop.f32.mrb[2].mxu0  ;;  %v765_v16 = vsel %vm1329_vm7, 1, %v1786_v19 }
 0x130   :  { %1596 = vtanh.f32 %v1535_v15  ;;  %v1478_v18 = vpop.f32.mrb[3].mxu0  ;;  %v1320_v22 = vmul.f32 -1.442695, %v1535_v15 }
 0x132   :  { %1598 = vpow2.f32 %v1320_v22 }
 0x13a   :  { %v1597_v20 = vpop.eup %1596 }
 0x13b   :  { %558 = vrot.lane.b32.xlu0 %v1597_v20, %s1787_s17 }
 0x13c   :  { %v1599_v23 = vpop.eup %1598 }
 0x13d   :  { %v548_v24 = vadd.f32 1.0, %v1599_v23 }
 0x13f   :  { %553 = vrot.lane.b32.xlu0 %v486_v21, %s1788_s18  ;;  %1600 = vrcp.f32 %v548_v24 }
 0x149   :  { %v1601_v26 = vpop.eup %1600 }
 0x1ad   :  { %v559_v27 = vpop.permute.xlu0 %558 }
 0x1ae   :  { %v561_v28 = vmul.f32 %v1601_v26, %v559_v27 }
 0x1b0   :  { %563 = vrot.lane.b32.xlu1 %v561_v28, %s1788_s18 }
 0x1b1   :  { %v1958_v30 = vpop.permute.xlu0 %553 }
 0x1b2   :  { %v556_v31 = vmul.f32 %v1601_v26, %v1958_v30 }
 0x1b4   :  { %577 = vperm.xlu1 %1590, %v575_v29  }
 0x1b8   :  { %581 = vrot.lane.b32.xlu1 %v485_v11, %s1789_s20 }
 0x222   :  { %v564_v32 = vpop.permute.xlu1 %563 }
 0x223   :  { %v1961_v33 = vadd.f32 %v564_v32, %v556_v31 }
 0x225   :  { %1602 = vtanh.f32 %v1961_v33 }
 0x22f   :  { %v1603_v36 = vpop.eup %1602 }
 0x230   :  { %569 = vrot.lane.b32.xlu0 %v1603_v36, %s1787_s17 }
 0x233   :  { %v1993_v39 = vpop.permute.xlu1 %577 }
 0x234   :  { %vm579_vm4 = vcmp.eq.s32.totalorder %v1993_v39, 1 }
 0x235   :  { %v585_v59 = vsel %vm579_vm4, %v1961_v33, %v1958_v30 }
 0x237   :  { %v582_v41 = vpop.permute.xlu1 %581 }
 0x2a2   :  { %v570_v40 = vpop.permute.xlu0 %569 }
 0x2a3   :  { %v1995_v42 = vmul.f32 %v1601_v26, %v570_v40 }
 0x2a5   :  { %v584_v43 = vsel %vm579_vm4, %v1995_v42, %v582_v41 }
 0x2a6   :  { %v597_v44 = vpack.c.bf16 %v584_v43, %v584_v43 }
 0x2a8   :  { %599 = vrot.lane.b32.xlu0 %v597_v44, %s1788_s18  ;;  %v858_v44 = vsel %vm1333_vm9, 1, %v1786_v19 }
 0x31a   :  { %v600_v45 = vpop.permute.xlu0 %599 }
 0x31b   :  { %1484 = vmatmul.mubr.msk.bf16.vlgmr.msra.gmra.mrb[0].mxu1 %vm61_vm0, %v600_v45 }
 0x31c   :  { %1496 = vmatpush3.bf16.msra.mxu1 %v1920_v9  ;;  %1499 = vmatprep.mubr.msk.bf16.mxu1 %vm1785_vm2, %v1784_v3 }
 0x31d   :  { %1497 = vmatprep.subr.bf16.mxu1 %v1784_v3 }
 0x320   :  { %1498 = vmatpush3.bf16.msra.mxu1 %v1925_v10 }
 0x321   :  { %1511 = vmatprep.subr.bf16.mxu1 %v1784_v3 }
 0x3ee   :  { %v638_v46 = vpop.f32.mrb[0].mxu1 }
 0x3ef   :  { %v1536_v47 = vadd.f32 %v1942_v13, %v638_v46  ;;  %v1485_v48 = vpop.f32.mrb[1].mxu1 }
 0x3f0   :  { %v641_v49 = vpop.f32.mrb[2].mxu1 }
 0x3f1   :  { %1604 = vtanh.f32 %v1536_v47  ;;  %v1486_v50 = vpop.f32.mrb[3].mxu1  ;;  %v1324_v53 = vmul.f32 -1.442695, %v1536_v47 }
 0x3f3   :  { %1606 = vpow2.f32 %v1324_v53 }
 0x3fb   :  { %v1605_v51 = vpop.eup %1604 }
 0x3fc   :  { %654 = vrot.lane.b32.xlu1 %v1605_v51, %s1787_s17 }
 0x3fd   :  { %v1607_v54 = vpop.eup %1606 }
 0x3fe   :  { %v648_v55 = vadd.f32 1.0, %v1607_v54 }
 0x400   :  { %674 = vperm.xlu1 %1590, %v672_v52   ;;  %1608 = vrcp.f32 %v648_v55 }
 0x40a   :  { %v1609_v56 = vpop.eup %1608 }
 0x40b   :  { %v652_v60 = vmul.f32 %v1609_v56, %v585_v59 }
 0x46e   :  { %v655_v57 = vpop.permute.xlu1 %654 }
 0x46f   :  { %v657_v58 = vmul.f32 %v1609_v56, %v655_v57 }
 0x471   :  { %659 = vrot.lane.b32.xlu0 %v657_v58, %s1788_s18 }
 0x47f   :  { %v2019_v0 = vpop.permute.xlu1 %674 }
 0x480   :  { %vm676_vm6 = vcmp.eq.s32.totalorder %v2019_v0, 1 }
 0x4e3   :  { %v660_v61 = vpop.permute.xlu0 %659 }
 0x4e4   :  { %v662_v62 = vadd.f32 %v660_v61, %v652_v60 }
 0x4e6   :  { %1610 = vtanh.f32 %v662_v62  ;;  %v678_v24 = vsel %vm676_vm6, %v662_v62, %v585_v59 }
 0x4f0   :  { %v1611_v63 = vpop.eup %1610 }
 0x4f1   :  { %665 = vrot.lane.b32.xlu0 %v1611_v63, %s1787_s17 }
 0x563   :  { %v666_v1 = vpop.permute.xlu0 %665 }
 0x564   :  { %v2021_v2 = vmul.f32 %v1609_v56, %v666_v1 }
 0x566   :  { %v677_v4 = vsel %vm676_vm6, %v2021_v2, %v584_v43 }
 0x567   :  { %v690_v5 = vpack.c.bf16 %v677_v4, %v677_v4 }
 0x569   :  { %692 = vrot.lane.b32.xlu1 %v690_v5, %s1788_s18 }
 0x5db   :  { %v693_v6 = vpop.permute.xlu1 %692 }
 0x5dc   :  { %1492 = vmatmul.mubr.msk.bf16.vlgmr.msra.gmra.mrb[4].mxu0 %vm61_vm0, %v693_v6 }
 0x5dd   :  { %1504 = vmatpush3.bf16.msra.mxu0 %v1920_v9  ;;  %1507 = vmatprep.mubr.msk.bf16.mxu0 %vm1785_vm2, %v1784_v3 }
 0x5de   :  { %1505 = vmatprep.subr.bf16.mxu0 %v1784_v3 }
 0x5e1   :  { %1506 = vmatpush3.bf16.msra.mxu0 %v1925_v10 }
 0x5e2   :  { %1519 = vmatprep.subr.bf16.mxu0 %v1784_v3 }
 0x6af   :  { %v731_v7 = vpop.f32.mrb[4].mxu0 }
 0x6b0   :  { %v1537_v8 = vadd.f32 %v1942_v13, %v731_v7  ;;  %v1493_v11 = vpop.f32.mrb[5].mxu0  ;;  %v951_v7 = vsel %vm1337_vm11, 1, %v1786_v19 }
 0x6b1   :  { %v734_v12 = vpop.f32.mrb[6].mxu0 }
 0x6b2   :  { %1612 = vtanh.f32 %v1537_v8  ;;  %v1494_v14 = vpop.f32.mrb[7].mxu0  ;;  %v1328_v17 = vmul.f32 -1.442695, %v1537_v8 }
 0x6b4   :  { %1614 = vpow2.f32 %v1328_v17 }
 0x6bc   :  { %v1613_v15 = vpop.eup %1612 }
 0x6bd   :  { %747 = vrot.lane.b32.xlu0 %v1613_v15, %s1787_s17 }
 0x6be   :  { %v1615_v18 = vpop.eup %1614 }
 0x6bf   :  { %v741_v20 = vadd.f32 1.0, %v1615_v18 }
 0x6c1   :  { %767 = vperm.xlu0 %1591, %v765_v16   ;;  %1616 = vrcp.f32 %v741_v20 }
 0x6cb   :  { %v1617_v21 = vpop.eup %1616 }
 0x6cc   :  { %v745_v26 = vmul.f32 %v1617_v21, %v678_v24 }
 0x72f   :  { %v748_v22 = vpop.permute.xlu0 %747 }
 0x730   :  { %v750_v23 = vmul.f32 %v1617_v21, %v748_v22 }
 0x732   :  { %752 = vrot.lane.b32.xlu1 %v750_v23, %s1788_s18 }
 0x740   :  { %v2043_v30 = vpop.permute.xlu0 %767 }
 0x741   :  { %vm769_vm8 = vcmp.eq.s32.totalorder %v2043_v30, 1 }
 0x7a4   :  { %v753_v27 = vpop.permute.xlu1 %752 }
 0x7a5   :  { %v755_v28 = vadd.f32 %v753_v27, %v745_v26 }
 0x7a7   :  { %1618 = vtanh.f32 %v755_v28  ;;  %v771_v51 = vsel %vm769_vm8, %v755_v28, %v678_v24 }
 0x7b1   :  { %v1619_v29 = vpop.eup %1618 }
 0x7b2   :  { %758 = vrot.lane.b32.xlu1 %v1619_v29, %s1787_s17 }
 0x824   :  { %v759_v31 = vpop.permute.xlu1 %758 }
 0x825   :  { %v2045_v32 = vmul.f32 %v1617_v21, %v759_v31 }
 0x827   :  { %v770_v33 = vsel %vm769_vm8, %v2045_v32, %v677_v4 }
 0x828   :  { %v783_v34 = vpack.c.bf16 %v770_v33, %v770_v33 }
 0x82a   :  { %785 = vrot.lane.b32.xlu1 %v783_v34, %s1788_s18 }
 0x89c   :  { %v786_v35 = vpop.permute.xlu1 %785 }
 0x89d   :  { %1500 = vmatmul.mubr.msk.bf16.vlgmr.msra.gmra.mrb[4].mxu1 %vm61_vm0, %v786_v35 }
 0x89e   :  { %1512 = vmatpush3.bf16.msra.mxu1 %v1920_v9  ;;  %1515 = vmatprep.mubr.msk.bf16.mxu1 %vm1785_vm2, %v1784_v3 }
 0x89f   :  { %1513 = vmatprep.subr.bf16.mxu1 %v1784_v3 }
 0x8a2   :  { %1514 = vmatpush3.bf16.msra.mxu1 %v1925_v10 }
 0x8a3   :  { %1527 = vmatprep.subr.bf16.mxu1 %v1784_v3 }
 0x970   :  { %v824_v36 = vpop.f32.mrb[4].mxu1 }
 0x971   :  { %v1538_v37 = vadd.f32 %v1942_v13, %v824_v36  ;;  %v1501_v38 = vpop.f32.mrb[5].mxu1 }
 0x972   :  { %v827_v40 = vpop.f32.mrb[6].mxu1 }
 0x973   :  { %1620 = vtanh.f32 %v1538_v37  ;;  %v1502_v41 = vpop.f32.mrb[7].mxu1  ;;  %v1332_v45 = vmul.f32 -1.442695, %v1538_v37 }
 0x975   :  { %1622 = vpow2.f32 %v1332_v45 }
 0x97d   :  { %v1621_v43 = vpop.eup %1620 }
 0x97e   :  { %840 = vrot.lane.b32.xlu0 %v1621_v43, %s1787_s17 }
 0x97f   :  { %v1623_v46 = vpop.eup %1622 }
 0x980   :  { %v834_v47 = vadd.f32 1.0, %v1623_v46 }
 0x982   :  { %860 = vperm.xlu0 %1591, %v858_v44   ;;  %1624 = vrcp.f32 %v834_v47 }
 0x98c   :  { %v1625_v48 = vpop.eup %1624 }
 0x98d   :  { %v838_v52 = vmul.f32 %v1625_v48, %v771_v51 }
 0x9f0   :  { %v841_v49 = vpop.permute.xlu0 %840 }
 0x9f1   :  { %v843_v50 = vmul.f32 %v1625_v48, %v841_v49 }
 0x9f3   :  { %845 = vrot.lane.b32.xlu1 %v843_v50, %s1788_s18 }
 0xa01   :  { %v2067_v56 = vpop.permute.xlu0 %860 }
 0xa02   :  { %vm862_vm10 = vcmp.eq.s32.totalorder %v2067_v56, 1 }
 0xa65   :  { %v846_v53 = vpop.permute.xlu1 %845 }
 0xa66   :  { %v848_v54 = vadd.f32 %v846_v53, %v838_v52 }
 0xa68   :  { %1626 = vtanh.f32 %v848_v54  ;;  %v864_v17 = vsel %vm862_vm10, %v848_v54, %v771_v51 }
 0xa72   :  { %v1627_v55 = vpop.eup %1626 }
 0xa73   :  { %851 = vrot.lane.b32.xlu1 %v1627_v55, %s1787_s17 }
 0xae5   :  { %v852_v57 = vpop.permute.xlu1 %851 }
 0xae6   :  { %v2069_v58 = vmul.f32 %v1625_v48, %v852_v57 }
 0xae8   :  { %v863_v59 = vsel %vm862_vm10, %v2069_v58, %v770_v33 }
 0xae9   :  { %v876_v60 = vpack.c.bf16 %v863_v59, %v863_v59 }
 0xaeb   :  { %878 = vrot.lane.b32.xlu0 %v876_v60, %s1788_s18 }
 0xb5d   :  { %v879_v61 = vpop.permute.xlu0 %878 }
 0xb5e   :  { %1508 = vmatmul.mubr.msk.bf16.vlgmr.msra.gmra.mrb[8].mxu0 %vm61_vm0, %v879_v61 }
 0xb5f   :  { %1520 = vmatpush3.bf16.msra.mxu0 %v1920_v9  ;;  %1523 = vmatprep.mubr.msk.bf16.mxu0 %vm1785_vm2, %v1784_v3 }
 0xb60   :  { %1521 = vmatprep.subr.bf16.mxu0 %v1784_v3 }
 0xb63   :  { %1522 = vmatpush3.bf16.msra.mxu0 %v1925_v10 }
 0xc31   :  { %v917_v62 = vpop.f32.mrb[8].mxu0 }
 0xc32   :  { %v1539_v63 = vadd.f32 %v1942_v13, %v917_v62  ;;  %v1509_v1 = vpop.f32.mrb[9].mxu0 }
 0xc33   :  { %v920_v4 = vpop.f32.mrb[10].mxu0 }
 0xc34   :  { %1628 = vtanh.f32 %v1539_v63  ;;  %v1510_v5 = vpop.f32.mrb[11].mxu0  ;;  %v1336_v8 = vmul.f32 -1.442695, %v1539_v63  ;;  %v1137_v63 = vsel %vm1345_vm15, 1, %v1786_v19 }
 0xc36   :  { %1630 = vpow2.f32 %v1336_v8 }
 0xc3e   :  { %v1629_v6 = vpop.eup %1628 }
 0xc3f   :  { %933 = vrot.lane.b32.xlu1 %v1629_v6, %s1787_s17 }
 0xc40   :  { %v1631_v11 = vpop.eup %1630 }
 0xc41   :  { %v927_v12 = vadd.f32 1.0, %v1631_v11 }
 0xc43   :  { %953 = vperm.xlu1 %1590, %v951_v7   ;;  %1632 = vrcp.f32 %v927_v12 }
 0xc4d   :  { %v1633_v14 = vpop.eup %1632 }
 0xc4e   :  { %v931_v18 = vmul.f32 %v1633_v14, %v864_v17 }
 0xcb1   :  { %v934_v15 = vpop.permute.xlu1 %933 }
 0xcb2   :  { %v936_v16 = vmul.f32 %v1633_v14, %v934_v15 }
 0xcb4   :  { %938 = vrot.lane.b32.xlu0 %v936_v16, %s1788_s18 }
 0xcc2   :  { %v2090_v23 = vpop.permute.xlu1 %953 }
 0xcc3   :  { %vm955_vm12 = vcmp.eq.s32.totalorder %v2090_v23, 1 }
 0xd26   :  { %v939_v20 = vpop.permute.xlu0 %938 }
 0xd27   :  { %v941_v21 = vadd.f32 %v939_v20, %v931_v18 }
 0xd29   :  { %1634 = vtanh.f32 %v941_v21  ;;  %v957_v44 = vsel %vm955_vm12, %v941_v21, %v864_v17 }
 0xd33   :  { %v1635_v22 = vpop.eup %1634 }
 0xd34   :  { %944 = vrot.lane.b32.xlu0 %v1635_v22, %s1787_s17 }
 0xda6   :  { %v945_v24 = vpop.permute.xlu0 %944 }
 0xda7   :  { %v2092_v26 = vmul.f32 %v1633_v14, %v945_v24 }
 0xda9   :  { %v956_v27 = vsel %vm955_vm12, %v2092_v26, %v863_v59 }
 0xdaa   :  { %v969_v28 = vpack.c.bf16 %v956_v27, %v956_v27 }
 0xdac   :  { %971 = vrot.lane.b32.xlu1 %v969_v28, %s1788_s18 }
 0xe1e   :  { %v972_v29 = vpop.permute.xlu1 %971 }
 0xe1f   :  { %1516 = vmatmul.mubr.msk.bf16.vlgmr.msra.gmra.mrb[8].mxu1 %vm61_vm0, %v972_v29 }
 0xe20   :  { %1528 = vmatpush3.bf16.msra.mxu1 %v1920_v9  ;;  %1531 = vmatprep.mubr.msk.bf16.mxu1 %vm1785_vm2, %v1784_v3  ;;  %v1044_v9 = vsel %vm1341_vm13, 1, %v1786_v19  ;;  %vm1349_vm2 = vcmp.gt.s32.totalorder %v1952_v25, 7  ;;  %v958_v25 = vsel %vm955_vm12, %v2092_v26, 0.0 }
 0xe21   :  { %1529 = vmatprep.subr.bf16.mxu1 %v1784_v3 }
 0xe24   :  { %1530 = vmatpush3.bf16.msra.mxu1 %v1925_v10 }
 0xef2   :  { %v1010_v31 = vpop.f32.mrb[8].mxu1 }
 0xef3   :  { %v1540_v33 = vadd.f32 %v1942_v13, %v1010_v31  ;;  %v1517_v34 = vpop.f32.mrb[9].mxu1 }
 0xef4   :  { %v1013_v35 = vpop.f32.mrb[10].mxu1 }
 0xef5   :  { %1636 = vtanh.f32 %v1540_v33  ;;  %v1518_v36 = vpop.f32.mrb[11].mxu1  ;;  %v1340_v38 = vmul.f32 -1.442695, %v1540_v33  ;;  %v1230_v35 = vsel %vm1349_vm2, 1, %v1786_v19  ;;  %v1355_v19 = vpack.c.bf16 %v958_v25, %v958_v25 }
 0xef6   :  { %v586_v36 = vsel %vm579_vm4, %v1995_v42, 0.0 }
 0xef7   :  { %1638 = vpow2.f32 %v1340_v38 }
 0xeff   :  { %v1637_v37 = vpop.eup %1636 }
 0xf00   :  { %1026 = vrot.lane.b32.xlu0 %v1637_v37, %s1787_s17  ;;  %v1351_v37 = vpack.c.bf16 %v586_v36, %v586_v36 }
 0xf01   :  { %v1639_v3 = vpop.eup %1638 }
 0xf02   :  { %v1020_v40 = vadd.f32 1.0, %v1639_v3 }
 0xf04   :  { %1046 = vperm.xlu0 %1591, %v1044_v9   ;;  %1640 = vrcp.f32 %v1020_v40 }
 0xf0e   :  { %v1641_v10 = vpop.eup %1640 }
 0xf0f   :  { %v1024_v45 = vmul.f32 %v1641_v10, %v957_v44 }
 0xf72   :  { %v1027_v41 = vpop.permute.xlu0 %1026 }
 0xf73   :  { %v1029_v43 = vmul.f32 %v1641_v10, %v1027_v41 }
 0xf75   :  { %1031 = vrot.lane.b32.xlu1 %v1029_v43, %s1788_s18 }
 0xf83   :  { %v2113_v49 = vpop.permute.xlu0 %1046 }
 0xf84   :  { %vm1048_vm14 = vcmp.eq.s32.totalorder %v2113_v49, 1 }
 0xfe7   :  { %v1032_v46 = vpop.permute.xlu1 %1031 }
 0xfe8   :  { %v1034_v47 = vadd.f32 %v1032_v46, %v1024_v45 }
 0xfea   :  { %1642 = vtanh.f32 %v1034_v47  ;;  %v1050_v11 = vsel %vm1048_vm14, %v1034_v47, %v957_v44 }
 0xff4   :  { %v1643_v48 = vpop.eup %1642 }
 0xff5   :  { %1037 = vrot.lane.b32.xlu1 %v1643_v48, %s1787_s17 }
0x1067   :  { %v1038_v50 = vpop.permute.xlu1 %1037 }
0x1068   :  { %v2115_v51 = vmul.f32 %v1641_v10, %v1038_v50 }
0x106a   :  { %v1049_v52 = vsel %vm1048_vm14, %v2115_v51, %v956_v27 }
0x106b   :  { %v1062_v53 = vpack.c.bf16 %v1049_v52, %v1049_v52 }
0x106d   :  { %1064 = vrot.lane.b32.xlu0 %v1062_v53, %s1788_s18  ;;  %v679_v53 = vsel %vm676_vm6, %v2021_v2, 0.0 }
0x10df   :  { %v1065_v54 = vpop.permute.xlu0 %1064 }
0x10e0   :  { %1524 = vmatmul.mubr.msk.bf16.vlgmr.msra.gmra.mrb[12].mxu0 %vm61_vm0, %v1065_v54  ;;  %v1352_v54 = vpack.c.bf16 %v679_v53, %v679_v53 }
0x11b3   :  { %v1103_v55 = vpop.f32.mrb[12].mxu0 }
0x11b4   :  { %v1541_v57 = vadd.f32 %v1942_v13, %v1103_v55  ;;  %v1525_v59 = vpop.f32.mrb[13].mxu0  ;;  %v865_v55 = vsel %vm862_vm10, %v2069_v58, 0.0 }
0x11b5   :  { %v1106_v60 = vpop.f32.mrb[14].mxu0  ;;  %v1051_v59 = vsel %vm1048_vm14, %v2115_v51, 0.0 }
0x11b6   :  { %1644 = vtanh.f32 %v1541_v57  ;;  %v1526_v61 = vpop.f32.mrb[15].mxu0  ;;  %v1344_v1 = vmul.f32 -1.442695, %v1541_v57  ;;  %v1354_v57 = vpack.c.bf16 %v865_v55, %v865_v55  ;;  %v1356_v60 = vpack.c.bf16 %v1051_v59, %v1051_v59 }
0x11b8   :  { %1646 = vpow2.f32 %v1344_v1 }
0x11c0   :  { %v1645_v62 = vpop.eup %1644 }
0x11c1   :  { %1119 = vrot.lane.b32.xlu1 %v1645_v62, %s1787_s17 }
0x11c2   :  { %v1647_v4 = vpop.eup %1646 }
0x11c3   :  { %v1113_v5 = vadd.f32 1.0, %v1647_v4 }
0x11c5   :  { %1139 = vperm.xlu1 %1590, %v1137_v63   ;;  %1648 = vrcp.f32 %v1113_v5 }
0x11cf   :  { %v1649_v6 = vpop.eup %1648 }
0x11d0   :  { %v1117_v12 = vmul.f32 %v1649_v6, %v1050_v11 }
0x1233   :  { %v1120_v7 = vpop.permute.xlu1 %1119 }
0x1234   :  { %v1122_v8 = vmul.f32 %v1649_v6, %v1120_v7 }
0x1236   :  { %1124 = vrot.lane.b32.xlu0 %v1122_v8, %s1788_s18 }
0x1244   :  { %v1140_v17 = vpop.permute.xlu1 %1139 }
0x1245   :  { %vm1141_vm1 = vcmp.eq.s32.totalorder %v1140_v17, 1 }
0x12a8   :  { %v1125_v14 = vpop.permute.xlu0 %1124 }
0x12a9   :  { %v1127_v15 = vadd.f32 %v1125_v14, %v1117_v12 }
0x12ab   :  { %1650 = vtanh.f32 %v1127_v15  ;;  %v1143_v45 = vsel %vm1141_vm1, %v1127_v15, %v1050_v11 }
0x12b5   :  { %v1651_v16 = vpop.eup %1650 }
0x12b6   :  { %1130 = vrot.lane.b32.xlu0 %v1651_v16, %s1787_s17 }
0x1328   :  { %v1131_v18 = vpop.permute.xlu0 %1130 }
0x1329   :  { %v1133_v20 = vmul.f32 %v1649_v6, %v1131_v18 }
0x132b   :  { %v2132_v21 = vsel %vm1141_vm1, %v1133_v20, %v1049_v52  ;;  %v1144_v38 = vsel %vm1141_vm1, %v1133_v20, 0.0 }
0x132c   :  { %v1155_v22 = vpack.c.bf16 %v2132_v21, %v2132_v21  ;;  %v1357_v39 = vpack.c.bf16 %v1144_v38, %v1144_v38 }
0x132e   :  { %1157 = vrot.lane.b32.xlu1 %v1155_v22, %s1788_s18 }
0x13a0   :  { %v1158_v24 = vpop.permute.xlu1 %1157 }
0x13a1   :  { %1532 = vmatmul.mubr.msk.bf16.vlgmr.msra.gmra.mrb[12].mxu1 %vm61_vm0, %v1158_v24 }
0x1474   :  { %v1196_v27 = vpop.f32.mrb[12].mxu1 }
0x1475   :  { %v1542_v28 = vadd.f32 %v1942_v13, %v1196_v27  ;;  %v1533_v29 = vpop.f32.mrb[13].mxu1  ;;  %v772_v13 = vsel %vm769_vm8, %v2045_v32, 0.0 }
0x1476   :  { %v1199_v31 = vpop.f32.mrb[14].mxu1  ;;  %v1353_v9 = vpack.c.bf16 %v772_v13, %v772_v13 }
0x1477   :  { %1652 = vtanh.f32 %v1542_v28  ;;  %v1534_v33 = vpop.f32.mrb[15].mxu1  ;;  %v1348_v42 = vmul.f32 -1.442695, %v1542_v28 }
0x1479   :  { %1654 = vpow2.f32 %v1348_v42 }
0x1481   :  { %v1653_v34 = vpop.eup %1652 }
0x1482   :  { %1212 = vrot.lane.b32.xlu0 %v1653_v34, %s1787_s17 }
0x1483   :  { %v1655_v30 = vpop.eup %1654 }
0x1484   :  { %v1206_v32 = vadd.f32 1.0, %v1655_v30 }
0x1486   :  { %1232 = vperm.xlu0 %1591, %v1230_v35   ;;  %1656 = vrcp.f32 %v1206_v32 }
0x148a   :  { %591 = vrot.lane.b32.xlu0 %v1351_v37, %s1788_s18 }
0x148e   :  { %777 = vrot.lane.b32.xlu0 %v1353_v9, %s1788_s18 }
0x1490   :  { %v1657_v3 = vpop.eup %1656 }
0x1491   :  { %v1210_v46 = vmul.f32 %v1657_v3, %v1143_v45 }
0x1492   :  { %963 = vrot.lane.b32.xlu0 %v1355_v19, %s1788_s18 }
0x1496   :  { %1149 = vrot.lane.b32.xlu0 %v1357_v39, %s1788_s18 }
0x14f4   :  { %v1213_v40 = vpop.permute.xlu0 %1212 }
0x14f5   :  { %v1215_v10 = vmul.f32 %v1657_v3, %v1213_v40 }
0x14f7   :  { %1217 = vrot.lane.b32.xlu1 %v1215_v10, %s1788_s18 }
0x1505   :  { %v1233_v23 = vpop.permute.xlu0 %1232 }
0x1506   :  { %vm1234_vm4 = vcmp.eq.s32.totalorder %v1233_v23, 1 }
0x1509   :  { %v592_v26 = vpop.permute.xlu0 %591 }
0x150a   :  { %595 = vst.msk [vmem:[#allocation10] sm:$0xf] %vm594_vm3, %v592_v26 }
0x150d   :  { %v778_v41 = vpop.permute.xlu0 %777 }
0x150e   :  { %781 = vst.msk [vmem:[#allocation10 + $0x8] sm:$0xf] %vm594_vm3, %v778_v41 }
0x1511   :  { %v964_v43 = vpop.permute.xlu0 %963 }
0x1512   :  { %967 = vst.msk [vmem:[#allocation10 + $0x10] sm:$0xf] %vm594_vm3, %v964_v43 }
0x1515   :  { %v1150_v44 = vpop.permute.xlu0 %1149 }
0x1516   :  { %1153 = vst.msk [vmem:[#allocation10 + $0x18] sm:$0xf] %vm594_vm3, %v1150_v44 }
0x1569   :  { %v1218_v47 = vpop.permute.xlu1 %1217 }
0x156a   :  { %v1220_v48 = vadd.f32 %v1218_v47, %v1210_v46 }
0x156c   :  { %1658 = vtanh.f32 %v1220_v48  ;;  %v1236_v50 = vsel %vm1234_vm4, %v1220_v48, %v1143_v45 }
0x1576   :  { %v1659_v52 = vpop.eup %1658 }
0x1577   :  { %1223 = vrot.lane.b32.xlu1 %v1659_v52, %s1787_s17 }
0x157b   :  { %684 = vrot.lane.b32.xlu1 %v1352_v54, %s1788_s18 }
0x157f   :  { %870 = vrot.lane.b32.xlu1 %v1354_v57, %s1788_s18 }
0x1583   :  { %1056 = vrot.lane.b32.xlu1 %v1356_v60, %s1788_s18 }
0x15e9   :  { %v1224_v0 = vpop.permute.xlu1 %1223 }
0x15ea   :  { %v1226_v2 = vmul.f32 %v1657_v3, %v1224_v0 }
0x15ec   :  { %v1237_v61 = vsel %vm1234_vm4, %v1226_v2, 0.0  ;;  %v1235_v56 = vsel %vm1234_vm4, %v1226_v2, %v2132_v21 }
0x15ed   :  { %v1358_v58 = vpack.c.bf16 %v1237_v61, %v1237_v61  ;;  %1248 = vrot.lane.b32.xlu0 %v1235_v56, %s1788_s18  ;;  %v685_v62 = vpop.permute.xlu1 %684 }
0x15ee   :  { %688 = vst.msk [vmem:[#allocation10 + $0x4] sm:$0xf] %vm594_vm3, %v685_v62 }
0x15ef   :  { %1242 = vrot.lane.b32.xlu1 %v1358_v58, %s1788_s18 }
0x15f1   :  { %v871_v49 = vpop.permute.xlu1 %870 }
0x15f2   :  { %874 = vst.msk [vmem:[#allocation10 + $0xc] sm:$0xf] %vm594_vm3, %v871_v49 }
0x15f3   :  { %1253 = vrot.lane.b32.xlu1 %v1236_v50, %s1789_s20 }
0x15f5   :  { %v1057_v51 = vpop.permute.xlu1 %1056 }
0x15f6   :  { %1060 = vst.msk [vmem:[#allocation10 + $0x14] sm:$0xf] %vm594_vm3, %v1057_v51 }
0x165f   :  { %v1249_v63 = vpop.permute.xlu0 %1248 }
0x1660   :  { %1251 = vst.msk [vmem:[#allocation11] sm:$0xff] %vm61_vm0, %v1249_v63 }
0x1661   :  { %v1243_v1 = vpop.permute.xlu1 %1242 }
0x1662   :  { %1246 = vst.msk [vmem:[#allocation10 + $0x1c] sm:$0xf] %vm594_vm3, %v1243_v1 }
0x1665   :  { %v1254_v4 = vpop.permute.xlu1 %1253 }
0x1666   :  { %1256 = vst.msk [vmem:[#allocation13] sm:$0xff] %vm61_vm0, %v1254_v4 }
0x1667 PF:  { %s1790_s1 = smov [#allocation11]   ;;  %s1791_s22 = smov [#allocation10]  }
0x1668   :  { %s1275_s21 = sshll.u32 %s1790_s1, 4  ;;  %s1262_s23 = sshll.u32 %s1791_s22, 4  ;;  %s1276_s21 = int_to_ptr.vmem [resolvable:$true] %s1275_s21  ;;  %s2188_s23 = int_to_ptr.vmem [resolvable:$true] %s1262_s23 }
0x1669   :  { %s1704_s24 = scalar_lea.vmem %s1276_s21, 128  ;;  %p1709_p5 = scmp.lt.s32.totalorder %s1276_s21, %s1276_s21 }
0x166a   :  { %p1705_p4 = scmp.ne.s32.totalorder %s1276_s21, %s1704_s24  ;;  %p1710_p6 = scmp.lt.s32.totalorder %s1704_s24, %s1704_s24 }
0x166c   :  { %p1711_p7 = por %p1710_p6, %p1709_p5 }
0x166e   :  { %p1712_p8 = pnand %p1711_p7, %p1705_p4 }
0x1670   :  { %1715 = shalt.err (!%p1712_p8)
}
0x1671   :  { %s1716_s27 = scalar_lea.hbm %s2241_s7, 128 }
0x1672   :  { %p1717_p9 = scmp.ne.s32.totalorder %s2241_s7, %s1716_s27  ;;  %p1720_p10 = scmp.lt.u32.totalorder %s1716_s27, %s2241_s7 }
0x1674   :  { %p1722_p11 = pnand %p1720_p10, %p1717_p9 }
0x1676   :  { %1725 = shalt.err (!%p1722_p11)
}
0x1677   :  { %1278 = dma.vmem_to_hbm [thread:$0]  %s1276_s21, 128, %s2241_s7, [#allocation12]  }
0x1678   :  { %s1726_s10 = scalar_lea.vmem %s2188_s23, 512  ;;  %p1731_p13 = scmp.lt.s32.totalorder %s2188_s23, %s2188_s23 }
0x1679   :  { %p1727_p12 = scmp.ne.s32.totalorder %s2188_s23, %s1726_s10  ;;  %p1732_p0 = scmp.lt.s32.totalorder %s1726_s10, %s1726_s10 }
0x167b   :  { %p1733_p1 = por %p1732_p0, %p1731_p13 }
0x167d   :  { %p1734_p2 = pnand %p1733_p1, %p1727_p12 }
0x167f   :  { %1737 = shalt.err (!%p1734_p2)
}
0x1680   :  { %s1738_s13 = scalar_lea.hbm %s2240_s6, 512 }
0x1681   :  { %p1739_p3 = scmp.ne.s32.totalorder %s2240_s6, %s1738_s13  ;;  %p1742_p4 = scmp.lt.u32.totalorder %s1738_s13, %s2240_s6 }
0x1683   :  { %p1744_p5 = pnand %p1742_p4, %p1739_p3 }
0x1685   :  { %1747 = shalt.err (!%p1744_p5)
}
0x1686   :  { %1268 = dma.vmem_to_hbm [thread:$0]  %s2188_s23, 512, %s2240_s6, [#allocation7], %s1779_s15, %s1779_s15, %s1780_s16  }
0x1687   :  { %s1792_s5 = smov [#allocation13]  }
0x1688   :  { %s1285_s19 = sshll.u32 %s1792_s5, 4  ;;  %s1286_s19 = int_to_ptr.vmem [resolvable:$true] %s1285_s19 }
0x1689   :  { %s1748_s20 = scalar_lea.vmem %s1286_s19, 128  ;;  %p1753_p7 = scmp.lt.s32.totalorder %s1286_s19, %s1286_s19 }
0x168a   :  { %p1749_p6 = scmp.ne.s32.totalorder %s1286_s19, %s1748_s20  ;;  %p1754_p8 = scmp.lt.s32.totalorder %s1748_s20, %s1748_s20 }
0x168c   :  { %p1755_p9 = por %p1754_p8, %p1753_p7 }
0x168e   :  { %p1756_p10 = pnand %p1755_p9, %p1749_p6 }
0x1690   :  { %1759 = shalt.err (!%p1756_p10)
}
0x1691   :  { %s1760_s22 = scalar_lea.hbm %s2242_s8, 128 }
0x1692   :  { %p1761_p11 = scmp.ne.s32.totalorder %s2242_s8, %s1760_s22  ;;  %p1764_p12 = scmp.lt.u32.totalorder %s1760_s22, %s2242_s8 }
0x1694   :  { %p1766_p13 = pnand %p1764_p12, %p1761_p11 }
0x1696   :  { %1769 = shalt.err (!%p1766_p13)
}
0x1697   :  { %1288 = dma.vmem_to_hbm [thread:$0]  %s1286_s19, 128, %s2242_s8, [#allocation12]  }
0x1698   :  { %1774 = dma.done.wait [#allocation7], 512  }
0x1699   :  { %1775 = vsyncadd [#allocation7], 4294966784 }
0x169a   :  { %1776 = dma.done.wait [#allocation12], 256  }
0x169b   :  { %1777 = vsyncadd [#allocation12], 4294967040 }
0x169c   :  { %1298 = vsyncpa [#allocation6], 1 }
0x169d   :  { %1299 = vsyncpa [#allocation9], 1 }
0x169e   :  { %1300 = vsyncpa [#allocation7], 1 }
0x169f   :  { %1301 = vsyncpa [#allocation12], 1 }

// kernel: tpu_custom_call.1
= control target key start
LH: loop header
LB: loop body
LE: loop exit
PB: predicated region body
PF: predicated region fallthrough
CT: control target
= control target key end

     0   :  { %15 = vsyncpa [#allocation6], 0  ;;  %s2234_s0 = inlined_call_operand.<no memory space> [shape: s32[1], index: 0, kind: input, shape index: {}]   ;;  %s2235_s1 = inlined_call_operand.vmem [shape: s32[8,1], index: 1, kind: input, shape index: {}]   ;;  %s2236_s2 = inlined_call_operand.hbm [shape: bf16[8,8,32], index: 2, kind: input, shape index: {}]   ;;  %s2237_s3 = inlined_call_operand.vmem [shape: bf16[32,128], index: 3, kind: input, shape index: {}]   ;;  %s2238_s4 = inlined_call_operand.hbm [shape: bf16[32,128], index: 4, kind: input, shape index: {}]   ;;  %s2239_s5 = inlined_call_operand.vmem [shape: f32[1,128], index: 5, kind: input, shape index: {}]   ;;  %s2240_s6 = inlined_call_operand.hbm [shape: bf16[8,8,32], index: 6, kind: output, shape index: {0}]   ;;  %s2241_s7 = inlined_call_operand.hbm [shape: f32[8,32], index: 7, kind: output, shape index: {1}]   ;;  %s2242_s8 = inlined_call_operand.hbm [shape: f32[8,32], index: 8, kind: output, shape index: {2}]  }
   0x1   :  { %16 = vsyncpa [#allocation9], 0 }
   0x2   :  { %17 = vsyncpa [#allocation7], 0 }
   0x3   :  { %18 = vsyncpa [#allocation12], 0  ;;  %s1778_s27 = smov [#allocation5]   ;;  %s1660_s9 = scalar_lea.hbm %s2236_s2, 512 }
   0x4   :  { %s26_s28 = sshll.u32 %s1778_s27, 4  ;;  %p1661_p0 = scmp.ne.s32.totalorder %s2236_s2, %s1660_s9  ;;  %s27_s28 = int_to_ptr.vmem [resolvable:$true] %s26_s28 }
   0x5   :  { %p1664_p1 = scmp.lt.u32.totalorder %s1660_s9, %s2236_s2 }
   0x7   :  { %p1666_p2 = pnand %p1664_p1, %p1661_p0 }
   0x9   :  { %1669 = shalt.err (!%p1666_p2)
}
   0xa   :  { %s1670_s14 = scalar_lea.vmem %s27_s28, 512  ;;  %p1675_p4 = scmp.lt.s32.totalorder %s27_s28, %s27_s28 }
   0xb   :  { %p1671_p3 = scmp.ne.s32.totalorder %s27_s28, %s1670_s14  ;;  %p1676_p5 = scmp.lt.s32.totalorder %s1670_s14, %s1670_s14 }
   0xd   :  { %p1677_p6 = por %p1676_p5, %p1675_p4 }
   0xf   :  { %p1678_p7 = pnand %p1677_p6, %p1671_p3 }
  0x11   :  { %1681 = shalt.err (!%p1678_p7)
}
  0x12   :  { %s1779_s15 = smov 64   ;;  %s1780_s16 = smov 4  }
  0x13   :  { %32 = dma.hbm_to_vmem [thread:$0]  %s2236_s2, 512, %s27_s28, [#allocation6], %s1779_s15, %s1779_s15, %s1780_s16  }
  0x14   :  { %s1781_s19 = smov [#allocation8]   ;;  %s1682_s23 = scalar_lea.hbm %s2238_s4, 256 }
  0x15   :  { %s40_s20 = sshll.u32 %s1781_s19, 4  ;;  %p1683_p8 = scmp.ne.s32.totalorder %s2238_s4, %s1682_s23  ;;  %s41_s20 = int_to_ptr.vmem [resolvable:$true] %s40_s20 }
  0x16   :  { %p1686_p9 = scmp.lt.u32.totalorder %s1682_s23, %s2238_s4 }
  0x18   :  { %p1688_p10 = pnand %p1686_p9, %p1683_p8 }
  0x1a   :  { %1691 = shalt.err (!%p1688_p10)
}
  0x1b   :  { %s1692_s29 = scalar_lea.vmem %s41_s20, 256  ;;  %p1697_p12 = scmp.lt.s32.totalorder %s41_s20, %s41_s20 }
  0x1c   :  { %p1693_p11 = scmp.ne.s32.totalorder %s41_s20, %s1692_s29  ;;  %p1698_p13 = scmp.lt.s32.totalorder %s1692_s29, %s1692_s29 }
  0x1e   :  { %p1699_p0 = por %p1698_p13, %p1697_p12 }
  0x20   :  { %p1700_p1 = pnand %p1699_p0, %p1693_p11 }
  0x22   :  { %1703 = shalt.err (!%p1700_p1)
}
  0x23   :  { %46 = dma.hbm_to_vmem [thread:$0]  %s2238_s4, 256, %s41_s20, [#allocation9], %s1779_s15, %s1779_s15, %s1780_s16  }
  0x24   :  { %1770 = dma.done.wait [#allocation6], 512  }
  0x25   :  { %1771 = vsyncadd [#allocation6], 4294966784 }
  0x26   :  { %1772 = dma.done.wait [#allocation9], 256  }
  0x27   :  { %1773 = vsyncadd [#allocation9], 4294967040  ;;  %vm61_vm0 = vcmask 261120   ;;  %v1782_v0 = vmov 0.0   ;;  %p1303_p2 = scmp.gt.s32.totalorder %s2234_s0, 0 }
  0x28   :  { %62 = vst.msk [vmem:[#allocation11] sm:$0xff] %vm61_vm0, %v1782_v0  ;;  %63 = vst.msk [vmem:[#allocation13] sm:$0xff] %vm61_vm0, %v1782_v0  ;;  %vm69_vm1 = vcmask (!%p1303_p2), 257024   ;;  %v1783_v1 = vmov (!%p1303_p2), 0  }
  0x29   :  { %68 = sbr.rel (%p1303_p2) target bundleno = 48 (0x30), region = 37  ;;  %70 = vst.msk [vmem:[#allocation10] sm:$0xf] (!%p1303_p2), %vm69_vm1, %v1783_v1  ;;  %71 = vst.msk [vmem:[#allocation10 + $0x4] sm:$0xf] (!%p1303_p2), %vm69_vm1, %v1783_v1 }
  0x2a   :  { %72 = vst.msk [vmem:[#allocation10 + $0x8] sm:$0xf] (!%p1303_p2), %vm69_vm1, %v1783_v1  ;;  %73 = vst.msk [vmem:[#allocation10 + $0xc] sm:$0xf] (!%p1303_p2), %vm69_vm1, %v1783_v1 }
  0x2b   :  { %74 = vst.msk [vmem:[#allocation10 + $0x10] sm:$0xf] (!%p1303_p2), %vm69_vm1, %v1783_v1  ;;  %75 = vst.msk [vmem:[#allocation10 + $0x14] sm:$0xf] (!%p1303_p2), %vm69_vm1, %v1783_v1 }
  0x2c   :  { %76 = vst.msk [vmem:[#allocation10 + $0x18] sm:$0xf] (!%p1303_p2), %vm69_vm1, %v1783_v1  ;;  %77 = vst.msk [vmem:[#allocation10 + $0x1c] sm:$0xf] (!%p1303_p2), %vm69_vm1, %v1783_v1 }
  0x30 PF:  { %p1305_p3 = scmp.le.s32.totalorder %s2234_s0, 0 }
  0x31   :  { %v1879_v2 = vld [vmem:[%s2237_s3] sm:$0xff] (!%p1305_p3)   ;;  %v1784_v3 = vmov (!%p1305_p3), 0.0   ;;  %v1887_v4 = vld [vmem:[%s2237_s3 + $0x8] sm:$0xff] (!%p1305_p3)   ;;  %vm1785_vm2 = vmmov (!%p1305_p3), 0   ;;  %v298_v7 = vld [vmem:[#allocation5 + $0x10] sm:$0xf] (!%p1305_p3) }
  0x32   :  { %81 = sbr.rel (%p1305_p3) target bundleno = 5735 (0x1667), region = 41  ;;  %1407 = vmatprep.subr.bf16.mxu0 (!%p1305_p3), %v1784_v3  ;;  %1415 = vmatprep.subr.bf16.mxu1 (!%p1305_p3), %v1784_v3  ;;  %v92_v5 = vld [vmem:[#allocation5] sm:$0xf] (!%p1305_p3)  ;;  %v204_v6 = vld [vmem:[#allocation5 + $0x8] sm:$0xf] (!%p1305_p3)  ;;  %v485_v11 = vld [vmem:[#allocation11] sm:$0xff] (!%p1305_p3) }
  0x33   :  { %1408 = vmatpush3.bf16.msra.mxu0 (!%p1305_p3), %v1879_v2  ;;  %1411 = vmatprep.mubr.msk.bf16.mxu0 (!%p1305_p3), %vm1785_vm2, %v1784_v3  ;;  %v392_v8 = vld [vmem:[#allocation5 + $0x18] sm:$0xf] (!%p1305_p3)  ;;  %v1920_v9 = vld [vmem:[#allocation8] sm:$0xff] (!%p1305_p3)   ;;  %v1925_v10 = vld [vmem:[#allocation8 + $0x8] sm:$0xff] (!%p1305_p3)   ;;  %v488_v12 = vpack.c.bf16 (!%p1305_p3), %v485_v11, %v485_v11  ;;  %v1786_v19 = vmov (!%p1305_p3), 0   ;;  %s1787_s17 = smov (!%p1305_p3), 64  }
  0x34   :  { %1409 = vmatprep.subr.bf16.mxu0 (!%p1305_p3), %v1784_v3  ;;  %1416 = vmatpush3.bf16.msra.mxu1 (!%p1305_p3), %v1879_v2  ;;  %v1942_v13 = vld [vmem:[%s2239_s5] ss:$0 sm:$0xff] (!%p1305_p3)  ;;  %v486_v21 = vld [vmem:[#allocation13] sm:$0xff] (!%p1305_p3)  ;;  %s1788_s18 = smov (!%p1305_p3), 32   ;;  %s1789_s20 = smov (!%p1305_p3), 96  }
  0x35   :  { %1417 = vmatprep.subr.bf16.mxu1 (!%p1305_p3), %v1784_v3  ;;  %1419 = vmatprep.mubr.msk.bf16.mxu1 (!%p1305_p3), %vm1785_vm2, %v1784_v3  ;;  %v1952_v25 = vld [vmem:[%s2235_s1] sm:$0xff] (!%p1305_p3)  ;;  %v251_v35 = vld [vmem:[#allocation5 + $0xc] sm:$0xf] (!%p1305_p3)  ;;  %v345_v37 = vld [vmem:[#allocation5 + $0x14] sm:$0xf] (!%p1305_p3) }
  0x36   :  { %1590 = vset.pattern.permute.xlu1 (!%p1305_p3), %v1786_v19  ;;  %1591 = vset.pattern.permute.xlu0 (!%p1305_p3), %v1786_v19  ;;  %vm1321_vm3 = vcmp.gt.s32.totalorder (!%p1305_p3), %v1952_v25, 0  ;;  %v157_v34 = vld [vmem:[#allocation5 + $0x4] sm:$0xf] (!%p1305_p3)  ;;  %v439_v38 = vld [vmem:[#allocation5 + $0x1c] sm:$0xf] (!%p1305_p3)  ;;  %vm1325_vm5 = vcmp.gt.s32.totalorder (!%p1305_p3), %v1952_v25, 1 }
  0x37   :  { %1410 = vmatpush3.bf16.msra.mxu0 (!%p1305_p3), %v1887_v4  ;;  %v575_v29 = vsel (!%p1305_p3), %vm1321_vm3, 1, %v1786_v19  ;;  %v672_v52 = vsel (!%p1305_p3), %vm1325_vm5, 1, %v1786_v19  ;;  %vm1329_vm7 = vcmp.gt.s32.totalorder (!%p1305_p3), %v1952_v25, 2  ;;  %vm1333_vm9 = vcmp.gt.s32.totalorder (!%p1305_p3), %v1952_v25, 3 }
  0x38   :  { %1423 = vmatprep.subr.bf16.mxu0 (!%p1305_p3), %v1784_v3  ;;  %1418 = vmatpush3.bf16.msra.mxu1 (!%p1305_p3), %v1887_v4  ;;  %vm1337_vm11 = vcmp.gt.s32.totalorder (!%p1305_p3), %v1952_v25, 4  ;;  %vm1341_vm13 = vcmp.gt.s32.totalorder (!%p1305_p3), %v1952_v25, 5  ;;  %vm1345_vm15 = vcmp.gt.s32.totalorder (!%p1305_p3), %v1952_v25, 6  ;;  %vm594_vm3 = vcmask (!%p1305_p3), 257024  }
  0x39   :  { %1431 = vmatprep.subr.bf16.mxu1 %v1784_v3 }
  0x3a   :  { %1412 = vmatmul.mubr.msk.bf16.vlgmr.msra.gmra.mrb[0].mxu0 %vm61_vm0, %v92_v5 }
  0x3b   :  { %1424 = vmatpush3.bf16.msra.mxu0 %v1879_v2  ;;  %1427 = vmatprep.mubr.msk.bf16.mxu0 %vm1785_vm2, %v1784_v3 }
  0x3c   :  { %1425 = vmatprep.subr.bf16.mxu0 %v1784_v3  ;;  %1420 = vmatmul.mubr.msk.bf16.vlgmr.msra.gmra.mrb[0].mxu1 %vm61_vm0, %v157_v34 }
  0x3d   :  { %1432 = vmatpush3.bf16.msra.mxu1 %v1879_v2  ;;  %1435 = vmatprep.mubr.msk.bf16.mxu1 %vm1785_vm2, %v1784_v3 }
  0x3e   :  { %1433 = vmatprep.subr.bf16.mxu1 %v1784_v3 }
  0x3f   :  { %1426 = vmatpush3.bf16.msra.mxu0 %v1887_v4 }
  0x40   :  { %1439 = vmatprep.subr.bf16.mxu0 %v1784_v3 }
  0x41   :  { %1434 = vmatpush3.bf16.msra.mxu1 %v1887_v4 }
  0x42   :  { %1428 = vmatmul.mubr.msk.bf16.vlgmr.msra.gmra.mrb[4].mxu0 %vm61_vm0, %v204_v6  ;;  %1447 = vmatprep.subr.bf16.mxu1 %v1784_v3 }
  0x43   :  { %1440 = vmatpush3.bf16.msra.mxu0 %v1879_v2  ;;  %1443 = vmatprep.mubr.msk.bf16.mxu0 %vm1785_vm2, %v1784_v3 }
  0x44   :  { %1441 = vmatprep.subr.bf16.mxu0 %v1784_v3  ;;  %1436 = vmatmul.mubr.msk.bf16.vlgmr.msra.gmra.mrb[4].mxu1 %vm61_vm0, %v251_v35 }
  0x45   :  { %1448 = vmatpush3.bf16.msra.mxu1 %v1879_v2  ;;  %1451 = vmatprep.mubr.msk.bf16.mxu1 %vm1785_vm2, %v1784_v3 }
  0x46   :  { %1449 = vmatprep.subr.bf16.mxu1 %v1784_v3 }
  0x47   :  { %1442 = vmatpush3.bf16.msra.mxu0 %v1887_v4 }
  0x48   :  { %1455 = vmatprep.subr.bf16.mxu0 %v1784_v3 }
  0x49   :  { %1450 = vmatpush3.bf16.msra.mxu1 %v1887_v4 }
  0x4a   :  { %1444 = vmatmul.mubr.msk.bf16.vlgmr.msra.gmra.mrb[8].mxu0 %vm61_vm0, %v298_v7  ;;  %1463 = vmatprep.subr.bf16.mxu1 %v1784_v3 }
  0x4b   :  { %1456 = vmatpush3.bf16.msra.mxu0 %v1879_v2  ;;  %1459 = vmatprep.mubr.msk.bf16.mxu0 %vm1785_vm2, %v1784_v3 }
  0x4c   :  { %1457 = vmatprep.subr.bf16.mxu0 %v1784_v3  ;;  %1452 = vmatmul.mubr.msk.bf16.vlgmr.msra.gmra.mrb[8].mxu1 %vm61_vm0, %v345_v37 }
  0x4d   :  { %1464 = vmatpush3.bf16.msra.mxu1 %v1879_v2  ;;  %1467 = vmatprep.mubr.msk.bf16.mxu1 %vm1785_vm2, %v1784_v3 }
  0x4e   :  { %1465 = vmatprep.subr.bf16.mxu1 %v1784_v3 }
  0x4f   :  { %1458 = vmatpush3.bf16.msra.mxu0 %v1887_v4 }
  0x50   :  { %1471 = vmatprep.subr.bf16.mxu0 %v1784_v3 }
  0x51   :  { %1466 = vmatpush3.bf16.msra.mxu1 %v1887_v4 }
  0x52   :  { %1460 = vmatmul.mubr.msk.bf16.vlgmr.msra.gmra.mrb[12].mxu0 %vm61_vm0, %v392_v8  ;;  %1479 = vmatprep.subr.bf16.mxu1 %v1784_v3 }
  0x53   :  { %1472 = vmatpush3.bf16.msra.mxu0 %v1920_v9  ;;  %1475 = vmatprep.mubr.msk.bf16.mxu0 %vm1785_vm2, %v1784_v3 }
  0x54   :  { %1473 = vmatprep.subr.bf16.mxu0 %v1784_v3  ;;  %1468 = vmatmul.mubr.msk.bf16.vlgmr.msra.gmra.mrb[12].mxu1 %vm61_vm0, %v439_v38 }
  0x55   :  { %1480 = vmatpush3.bf16.msra.mxu1 %v1920_v9  ;;  %1483 = vmatprep.mubr.msk.bf16.mxu1 %vm1785_vm2, %v1784_v3 }
  0x56   :  { %1481 = vmatprep.subr.bf16.mxu1 %v1784_v3 }
  0x57   :  { %1474 = vmatpush3.bf16.msra.mxu0 %v1925_v10 }
  0x58   :  { %1487 = vmatprep.subr.bf16.mxu0 %v1784_v3 }
  0x59   :  { %1482 = vmatpush3.bf16.msra.mxu1 %v1925_v10 }
  0x5a   :  { %1476 = vmatmul.mubr.msk.bf16.vlgmr.msra.gmra.mrb[0].mxu0 %vm61_vm0, %v488_v12  ;;  %1495 = vmatprep.subr.bf16.mxu1 %v1784_v3 }
  0x5b   :  { %1488 = vmatpush3.bf16.msra.mxu0 %v1920_v9  ;;  %1491 = vmatprep.mubr.msk.bf16.mxu0 %vm1785_vm2, %v1784_v3 }
  0x5c   :  { %1489 = vmatprep.subr.bf16.mxu0 %v1784_v3 }
  0x5f   :  { %1490 = vmatpush3.bf16.msra.mxu0 %v1925_v10 }
  0x60   :  { %1503 = vmatprep.subr.bf16.mxu0 %v1784_v3 }
 0x12d   :  { %v538_v14 = vpop.f32.mrb[0].mxu0 }
 0x12e   :  { %v1535_v15 = vadd.f32 %v1942_v13, %v538_v14  ;;  %v1477_v16 = vpop.f32.mrb[1].mxu0 }
 0x12f   :  { %v541_v17 = vpop.f32.mrb[2].mxu0  ;;  %v765_v16 = vsel %vm1329_vm7, 1, %v1786_v19 }
 0x130   :  { %1596 = vtanh.f32 %v1535_v15  ;;  %v1478_v18 = vpop.f32.mrb[3].mxu0  ;;  %v1320_v22 = vmul.f32 -1.442695, %v1535_v15 }
 0x132   :  { %1598 = vpow2.f32 %v1320_v22 }
 0x13a   :  { %v1597_v20 = vpop.eup %1596 }
 0x13b   :  { %558 = vrot.lane.b32.xlu0 %v1597_v20, %s1787_s17 }
 0x13c   :  { %v1599_v23 = vpop.eup %1598 }
 0x13d   :  { %v548_v24 = vadd.f32 1.0, %v1599_v23 }
 0x13f   :  { %553 = vrot.lane.b32.xlu0 %v486_v21, %s1788_s18  ;;  %1600 = vrcp.f32 %v548_v24 }
 0x149   :  { %v1601_v26 = vpop.eup %1600 }
 0x1ad   :  { %v559_v27 = vpop.permute.xlu0 %558 }
 0x1ae   :  { %v561_v28 = vmul.f32 %v1601_v26, %v559_v27 }
 0x1b0   :  { %563 = vrot.lane.b32.xlu1 %v561_v28, %s1788_s18 }
 0x1b1   :  { %v1958_v30 = vpop.permute.xlu0 %553 }
 0x1b2   :  { %v556_v31 = vmul.f32 %v1601_v26, %v1958_v30 }
 0x1b4   :  { %577 = vperm.xlu1 %1590, %v575_v29  }
 0x1b8   :  { %581 = vrot.lane.b32.xlu1 %v485_v11, %s1789_s20 }
 0x222   :  { %v564_v32 = vpop.permute.xlu1 %563 }
 0x223   :  { %v1961_v33 = vadd.f32 %v564_v32, %v556_v31 }
 0x225   :  { %1602 = vtanh.f32 %v1961_v33 }
 0x22f   :  { %v1603_v36 = vpop.eup %1602 }
 0x230   :  { %569 = vrot.lane.b32.xlu0 %v1603_v36, %s1787_s17 }
 0x233   :  { %v1993_v39 = vpop.permute.xlu1 %577 }
 0x234   :  { %vm579_vm4 = vcmp.eq.s32.totalorder %v1993_v39, 1 }
 0x235   :  { %v585_v59 = vsel %vm579_vm4, %v1961_v33, %v1958_v30 }
 0x237   :  { %v582_v41 = vpop.permute.xlu1 %581 }
 0x2a2   :  { %v570_v40 = vpop.permute.xlu0 %569 }
 0x2a3   :  { %v1995_v42 = vmul.f32 %v1601_v26, %v570_v40 }
 0x2a5   :  { %v584_v43 = vsel %vm579_vm4, %v1995_v42, %v582_v41 }
 0x2a6   :  { %v597_v44 = vpack.c.bf16 %v584_v43, %v584_v43 }
 0x2a8   :  { %599 = vrot.lane.b32.xlu0 %v597_v44, %s1788_s18  ;;  %v858_v44 = vsel %vm1333_vm9, 1, %v1786_v19 }
 0x31a   :  { %v600_v45 = vpop.permute.xlu0 %599 }
 0x31b   :  { %1484 = vmatmul.mubr.msk.bf16.vlgmr.msra.gmra.mrb[0].mxu1 %vm61_vm0, %v600_v45 }
 0x31c   :  { %1496 = vmatpush3.bf16.msra.mxu1 %v1920_v9  ;;  %1499 = vmatprep.mubr.msk.bf16.mxu1 %vm1785_vm2, %v1784_v3 }
 0x31d   :  { %1497 = vmatprep.subr.bf16.mxu1 %v1784_v3 }
 0x320   :  { %1498 = vmatpush3.bf16.msra.mxu1 %v1925_v10 }
 0x321   :  { %1511 = vmatprep.subr.bf16.mxu1 %v1784_v3 }
 0x3ee   :  { %v638_v46 = vpop.f32.mrb[0].mxu1 }
 0x3ef   :  { %v1536_v47 = vadd.f32 %v1942_v13, %v638_v46  ;;  %v1485_v48 = vpop.f32.mrb[1].mxu1 }
 0x3f0   :  { %v641_v49 = vpop.f32.mrb[2].mxu1 }
 0x3f1   :  { %1604 = vtanh.f32 %v1536_v47  ;;  %v1486_v50 = vpop.f32.mrb[3].mxu1  ;;  %v1324_v53 = vmul.f32 -1.442695, %v1536_v47 }
 0x3f3   :  { %1606 = vpow2.f32 %v1324_v53 }
 0x3fb   :  { %v1605_v51 = vpop.eup %1604 }
 0x3fc   :  { %654 = vrot.lane.b32.xlu1 %v1605_v51, %s1787_s17 }
 0x3fd   :  { %v1607_v54 = vpop.eup %1606 }
 0x3fe   :  { %v648_v55 = vadd.f32 1.0, %v1607_v54 }
 0x400   :  { %674 = vperm.xlu1 %1590, %v672_v52   ;;  %1608 = vrcp.f32 %v648_v55 }
 0x40a   :  { %v1609_v56 = vpop.eup %1608 }
 0x40b   :  { %v652_v60 = vmul.f32 %v1609_v56, %v585_v59 }
 0x46e   :  { %v655_v57 = vpop.permute.xlu1 %654 }
 0x46f   :  { %v657_v58 = vmul.f32 %v1609_v56, %v655_v57 }
 0x471   :  { %659 = vrot.lane.b32.xlu0 %v657_v58, %s1788_s18 }
 0x47f   :  { %v2019_v0 = vpop.permute.xlu1 %674 }
 0x480   :  { %vm676_vm6 = vcmp.eq.s32.totalorder %v2019_v0, 1 }
 0x4e3   :  { %v660_v61 = vpop.permute.xlu0 %659 }
 0x4e4   :  { %v662_v62 = vadd.f32 %v660_v61, %v652_v60 }
 0x4e6   :  { %1610 = vtanh.f32 %v662_v62  ;;  %v678_v24 = vsel %vm676_vm6, %v662_v62, %v585_v59 }
 0x4f0   :  { %v1611_v63 = vpop.eup %1610 }
 0x4f1   :  { %665 = vrot.lane.b32.xlu0 %v1611_v63, %s1787_s17 }
 0x563   :  { %v666_v1 = vpop.permute.xlu0 %665 }
 0x564   :  { %v2021_v2 = vmul.f32 %v1609_v56, %v666_v1 }
 0x566   :  { %v677_v4 = vsel %vm676_vm6, %v2021_v2, %v584_v43 }
 0x567   :  { %v690_v5 = vpack.c.bf16 %v677_v4, %v677_v4 }
 0x569   :  { %692 = vrot.lane.b32.xlu1 %v690_v5, %s1788_s18 }
 0x5db   :  { %v693_v6 = vpop.permute.xlu1 %692 }
 0x5dc   :  { %1492 = vmatmul.mubr.msk.bf16.vlgmr.msra.gmra.mrb[4].mxu0 %vm61_vm0, %v693_v6 }
 0x5dd   :  { %1504 = vmatpush3.bf16.msra.mxu0 %v1920_v9  ;;  %1507 = vmatprep.mubr.msk.bf16.mxu0 %vm1785_vm2, %v1784_v3 }
 0x5de   :  { %1505 = vmatprep.subr.bf16.mxu0 %v1784_v3 }
 0x5e1   :  { %1506 = vmatpush3.bf16.msra.mxu0 %v1925_v10 }
 0x5e2   :  { %1519 = vmatprep.subr.bf16.mxu0 %v1784_v3 }
 0x6af   :  { %v731_v7 = vpop.f32.mrb[4].mxu0 }
 0x6b0   :  { %v1537_v8 = vadd.f32 %v1942_v13, %v731_v7  ;;  %v1493_v11 = vpop.f32.mrb[5].mxu0  ;;  %v951_v7 = vsel %vm1337_vm11, 1, %v1786_v19 }
 0x6b1   :  { %v734_v12 = vpop.f32.mrb[6].mxu0 }
 0x6b2   :  { %1612 = vtanh.f32 %v1537_v8  ;;  %v1494_v14 = vpop.f32.mrb[7].mxu0  ;;  %v1328_v17 = vmul.f32 -1.442695, %v1537_v8 }
 0x6b4   :  { %1614 = vpow2.f32 %v1328_v17 }
 0x6bc   :  { %v1613_v15 = vpop.eup %1612 }
 0x6bd   :  { %747 = vrot.lane.b32.xlu0 %v1613_v15, %s1787_s17 }
 0x6be   :  { %v1615_v18 = vpop.eup %1614 }
 0x6bf   :  { %v741_v20 = vadd.f32 1.0, %v1615_v18 }
 0x6c1   :  { %767 = vperm.xlu0 %1591, %v765_v16   ;;  %1616 = vrcp.f32 %v741_v20 }
 0x6cb   :  { %v1617_v21 = vpop.eup %1616 }
 0x6cc   :  { %v745_v26 = vmul.f32 %v1617_v21, %v678_v24 }
 0x72f   :  { %v748_v22 = vpop.permute.xlu0 %747 }
 0x730   :  { %v750_v23 = vmul.f32 %v1617_v21, %v748_v22 }
 0x732   :  { %752 = vrot.lane.b32.xlu1 %v750_v23, %s1788_s18 }
 0x740   :  { %v2043_v30 = vpop.permute.xlu0 %767 }
 0x741   :  { %vm769_vm8 = vcmp.eq.s32.totalorder %v2043_v30, 1 }
 0x7a4   :  { %v753_v27 = vpop.permute.xlu1 %752 }
 0x7a5   :  { %v755_v28 = vadd.f32 %v753_v27, %v745_v26 }
 0x7a7   :  { %1618 = vtanh.f32 %v755_v28  ;;  %v771_v51 = vsel %vm769_vm8, %v755_v28, %v678_v24 }
 0x7b1   :  { %v1619_v29 = vpop.eup %1618 }
 0x7b2   :  { %758 = vrot.lane.b32.xlu1 %v1619_v29, %s1787_s17 }
 0x824   :  { %v759_v31 = vpop.permute.xlu1 %758 }
 0x825   :  { %v2045_v32 = vmul.f32 %v1617_v21, %v759_v31 }
 0x827   :  { %v770_v33 = vsel %vm769_vm8, %v2045_v32, %v677_v4 }
 0x828   :  { %v783_v34 = vpack.c.bf16 %v770_v33, %v770_v33 }
 0x82a   :  { %785 = vrot.lane.b32.xlu1 %v783_v34, %s1788_s18 }
 0x89c   :  { %v786_v35 = vpop.permute.xlu1 %785 }
 0x89d   :  { %1500 = vmatmul.mubr.msk.bf16.vlgmr.msra.gmra.mrb[4].mxu1 %vm61_vm0, %v786_v35 }
 0x89e   :  { %1512 = vmatpush3.bf16.msra.mxu1 %v1920_v9  ;;  %1515 = vmatprep.mubr.msk.bf16.mxu1 %vm1785_vm2, %v1784_v3 }
 0x89f   :  { %1513 = vmatprep.subr.bf16.mxu1 %v1784_v3 }
 0x8a2   :  { %1514 = vmatpush3.bf16.msra.mxu1 %v1925_v10 }
 0x8a3   :  { %1527 = vmatprep.subr.bf16.mxu1 %v1784_v3 }
 0x970   :  { %v824_v36 = vpop.f32.mrb[4].mxu1 }
 0x971   :  { %v1538_v37 = vadd.f32 %v1942_v13, %v824_v36  ;;  %v1501_v38 = vpop.f32.mrb[5].mxu1 }
 0x972   :  { %v827_v40 = vpop.f32.mrb[6].mxu1 }
 0x973   :  { %1620 = vtanh.f32 %v1538_v37  ;;  %v1502_v41 = vpop.f32.mrb[7].mxu1  ;;  %v1332_v45 = vmul.f32 -1.442695, %v1538_v37 }
 0x975   :  { %1622 = vpow2.f32 %v1332_v45 }
 0x97d   :  { %v1621_v43 = vpop.eup %1620 }
 0x97e   :  { %840 = vrot.lane.b32.xlu0 %v1621_v43, %s1787_s17 }
 0x97f   :  { %v1623_v46 = vpop.eup %1622 }
 0x980   :  { %v834_v47 = vadd.f32 1.0, %v1623_v46 }
 0x982   :  { %860 = vperm.xlu0 %1591, %v858_v44   ;;  %1624 = vrcp.f32 %v834_v47 }
 0x98c   :  { %v1625_v48 = vpop.eup %1624 }
 0x98d   :  { %v838_v52 = vmul.f32 %v1625_v48, %v771_v51 }
 0x9f0   :  { %v841_v49 = vpop.permute.xlu0 %840 }
 0x9f1   :  { %v843_v50 = vmul.f32 %v1625_v48, %v841_v49 }
 0x9f3   :  { %845 = vrot.lane.b32.xlu1 %v843_v50, %s1788_s18 }
 0xa01   :  { %v2067_v56 = vpop.permute.xlu0 %860 }
 0xa02   :  { %vm862_vm10 = vcmp.eq.s32.totalorder %v2067_v56, 1 }
 0xa65   :  { %v846_v53 = vpop.permute.xlu1 %845 }
 0xa66   :  { %v848_v54 = vadd.f32 %v846_v53, %v838_v52 }
 0xa68   :  { %1626 = vtanh.f32 %v848_v54  ;;  %v864_v17 = vsel %vm862_vm10, %v848_v54, %v771_v51 }
 0xa72   :  { %v1627_v55 = vpop.eup %1626 }
 0xa73   :  { %851 = vrot.lane.b32.xlu1 %v1627_v55, %s1787_s17 }
 0xae5   :  { %v852_v57 = vpop.permute.xlu1 %851 }
 0xae6   :  { %v2069_v58 = vmul.f32 %v1625_v48, %v852_v57 }
 0xae8   :  { %v863_v59 = vsel %vm862_vm10, %v2069_v58, %v770_v33 }
 0xae9   :  { %v876_v60 = vpack.c.bf16 %v863_v59, %v863_v59 }
 0xaeb   :  { %878 = vrot.lane.b32.xlu0 %v876_v60, %s1788_s18 }
 0xb5d   :  { %v879_v61 = vpop.permute.xlu0 %878 }
 0xb5e   :  { %1508 = vmatmul.mubr.msk.bf16.vlgmr.msra.gmra.mrb[8].mxu0 %vm61_vm0, %v879_v61 }
 0xb5f   :  { %1520 = vmatpush3.bf16.msra.mxu0 %v1920_v9  ;;  %1523 = vmatprep.mubr.msk.bf16.mxu0 %vm1785_vm2, %v1784_v3 }
 0xb60   :  { %1521 = vmatprep.subr.bf16.mxu0 %v1784_v3 }
 0xb63   :  { %1522 = vmatpush3.bf16.msra.mxu0 %v1925_v10 }
 0xc31   :  { %v917_v62 = vpop.f32.mrb[8].mxu0 }
 0xc32   :  { %v1539_v63 = vadd.f32 %v1942_v13, %v917_v62  ;;  %v1509_v1 = vpop.f32.mrb[9].mxu0 }
 0xc33   :  { %v920_v4 = vpop.f32.mrb[10].mxu0 }
 0xc34   :  { %1628 = vtanh.f32 %v1539_v63  ;;  %v1510_v5 = vpop.f32.mrb[11].mxu0  ;;  %v1336_v8 = vmul.f32 -1.442695, %v1539_v63  ;;  %v1137_v63 = vsel %vm1345_vm15, 1, %v1786_v19 }
 0xc36   :  { %1630 = vpow2.f32 %v1336_v8 }
 0xc3e   :  { %v1629_v6 = vpop.eup %1628 }
 0xc3f   :  { %933 = vrot.lane.b32.xlu1 %v1629_v6, %s1787_s17 }
 0xc40   :  { %v1631_v11 = vpop.eup %1630 }
 0xc41   :  { %v927_v12 = vadd.f32 1.0, %v1631_v11 }
 0xc43   :  { %953 = vperm.xlu1 %1590, %v951_v7   ;;  %1632 = vrcp.f32 %v927_v12 }
 0xc4d   :  { %v1633_v14 = vpop.eup %1632 }
 0xc4e   :  { %v931_v18 = vmul.f32 %v1633_v14, %v864_v17 }
 0xcb1   :  { %v934_v15 = vpop.permute.xlu1 %933 }
 0xcb2   :  { %v936_v16 = vmul.f32 %v1633_v14, %v934_v15 }
 0xcb4   :  { %938 = vrot.lane.b32.xlu0 %v936_v16, %s1788_s18 }
 0xcc2   :  { %v2090_v23 = vpop.permute.xlu1 %953 }
 0xcc3   :  { %vm955_vm12 = vcmp.eq.s32.totalorder %v2090_v23, 1 }
 0xd26   :  { %v939_v20 = vpop.permute.xlu0 %938 }
 0xd27   :  { %v941_v21 = vadd.f32 %v939_v20, %v931_v18 }
 0xd29   :  { %1634 = vtanh.f32 %v941_v21  ;;  %v957_v44 = vsel %vm955_vm12, %v941_v21, %v864_v17 }
 0xd33   :  { %v1635_v22 = vpop.eup %1634 }
 0xd34   :  { %944 = vrot.lane.b32.xlu0 %v1635_v22, %s1787_s17 }
 0xda6   :  { %v945_v24 = vpop.permute.xlu0 %944 }
 0xda7   :  { %v2092_v26 = vmul.f32 %v1633_v14, %v945_v24 }
 0xda9   :  { %v956_v27 = vsel %vm955_vm12, %v2092_v26, %v863_v59 }
 0xdaa   :  { %v969_v28 = vpack.c.bf16 %v956_v27, %v956_v27 }
 0xdac   :  { %971 = vrot.lane.b32.xlu1 %v969_v28, %s1788_s18 }
 0xe1e   :  { %v972_v29 = vpop.permute.xlu1 %971 }
 0xe1f   :  { %1516 = vmatmul.mubr.msk.bf16.vlgmr.msra.gmra.mrb[8].mxu1 %vm61_vm0, %v972_v29 }
 0xe20   :  { %1528 = vmatpush3.bf16.msra.mxu1 %v1920_v9  ;;  %1531 = vmatprep.mubr.msk.bf16.mxu1 %vm1785_vm2, %v1784_v3  ;;  %v1044_v9 = vsel %vm1341_vm13, 1, %v1786_v19  ;;  %vm1349_vm2 = vcmp.gt.s32.totalorder %v1952_v25, 7  ;;  %v958_v25 = vsel %vm955_vm12, %v2092_v26, 0.0 }
 0xe21   :  { %1529 = vmatprep.subr.bf16.mxu1 %v1784_v3 }
 0xe24   :  { %1530 = vmatpush3.bf16.msra.mxu1 %v1925_v10 }
 0xef2   :  { %v1010_v31 = vpop.f32.mrb[8].mxu1 }
 0xef3   :  { %v1540_v33 = vadd.f32 %v1942_v13, %v1010_v31  ;;  %v1517_v34 = vpop.f32.mrb[9].mxu1 }
 0xef4   :  { %v1013_v35 = vpop.f32.mrb[10].mxu1 }
 0xef5   :  { %1636 = vtanh.f32 %v1540_v33  ;;  %v1518_v36 = vpop.f32.mrb[11].mxu1  ;;  %v1340_v38 = vmul.f32 -1.442695, %v1540_v33  ;;  %v1230_v35 = vsel %vm1349_vm2, 1, %v1786_v19  ;;  %v1355_v19 = vpack.c.bf16 %v958_v25, %v958_v25 }
 0xef6   :  { %v586_v36 = vsel %vm579_vm4, %v1995_v42, 0.0 }
 0xef7   :  { %1638 = vpow2.f32 %v1340_v38 }
 0xeff   :  { %v1637_v37 = vpop.eup %1636 }
 0xf00   :  { %1026 = vrot.lane.b32.xlu0 %v1637_v37, %s1787_s17  ;;  %v1351_v37 = vpack.c.bf16 %v586_v36, %v586_v36 }
 0xf01   :  { %v1639_v3 = vpop.eup %1638 }
 0xf02   :  { %v1020_v40 = vadd.f32 1.0, %v1639_v3 }
 0xf04   :  { %1046 = vperm.xlu0 %1591, %v1044_v9   ;;  %1640 = vrcp.f32 %v1020_v40 }
 0xf0e   :  { %v1641_v10 = vpop.eup %1640 }
 0xf0f   :  { %v1024_v45 = vmul.f32 %v1641_v10, %v957_v44 }
 0xf72   :  { %v1027_v41 = vpop.permute.xlu0 %1026 }
 0xf73   :  { %v1029_v43 = vmul.f32 %v1641_v10, %v1027_v41 }
 0xf75   :  { %1031 = vrot.lane.b32.xlu1 %v1029_v43, %s1788_s18 }
 0xf83   :  { %v2113_v49 = vpop.permute.xlu0 %1046 }
 0xf84   :  { %vm1048_vm14 = vcmp.eq.s32.totalorder %v2113_v49, 1 }
 0xfe7   :  { %v1032_v46 = vpop.permute.xlu1 %1031 }
 0xfe8   :  { %v1034_v47 = vadd.f32 %v1032_v46, %v1024_v45 }
 0xfea   :  { %1642 = vtanh.f32 %v1034_v47  ;;  %v1050_v11 = vsel %vm1048_vm14, %v1034_v47, %v957_v44 }
 0xff4   :  { %v1643_v48 = vpop.eup %1642 }
 0xff5   :  { %1037 = vrot.lane.b32.xlu1 %v1643_v48, %s1787_s17 }
0x1067   :  { %v1038_v50 = vpop.permute.xlu1 %1037 }
0x1068   :  { %v2115_v51 = vmul.f32 %v1641_v10, %v1038_v50 }
0x106a   :  { %v1049_v52 = vsel %vm1048_vm14, %v2115_v51, %v956_v27 }
0x106b   :  { %v1062_v53 = vpack.c.bf16 %v1049_v52, %v1049_v52 }
0x106d   :  { %1064 = vrot.lane.b32.xlu0 %v1062_v53, %s1788_s18  ;;  %v679_v53 = vsel %vm676_vm6, %v2021_v2, 0.0 }
0x10df   :  { %v1065_v54 = vpop.permute.xlu0 %1064 }
0x10e0   :  { %1524 = vmatmul.mubr.msk.bf16.vlgmr.msra.gmra.mrb[12].mxu0 %vm61_vm0, %v1065_v54  ;;  %v1352_v54 = vpack.c.bf16 %v679_v53, %v679_v53 }
0x11b3   :  { %v1103_v55 = vpop.f32.mrb[12].mxu0 }
0x11b4   :  { %v1541_v57 = vadd.f32 %v1942_v13, %v1103_v55  ;;  %v1525_v59 = vpop.f32.mrb[13].mxu0  ;;  %v865_v55 = vsel %vm862_vm10, %v2069_v58, 0.0 }
0x11b5   :  { %v1106_v60 = vpop.f32.mrb[14].mxu0  ;;  %v1051_v59 = vsel %vm1048_vm14, %v2115_v51, 0.0 }
0x11b6   :  { %1644 = vtanh.f32 %v1541_v57  ;;  %v1526_v61 = vpop.f32.mrb[15].mxu0  ;;  %v1344_v1 = vmul.f32 -1.442695, %v1541_v57  ;;  %v1354_v57 = vpack.c.bf16 %v865_v55, %v865_v55  ;;  %v1356_v60 = vpack.c.bf16 %v1051_v59, %v1051_v59 }
0x11b8   :  { %1646 = vpow2.f32 %v1344_v1 }
0x11c0   :  { %v1645_v62 = vpop.eup %1644 }
0x11c1   :  { %1119 = vrot.lane.b32.xlu1 %v1645_v62, %s1787_s17 }
0x11c2   :  { %v1647_v4 = vpop.eup %1646 }
0x11c3   :  { %v1113_v5 = vadd.f32 1.0, %v1647_v4 }
0x11c5   :  { %1139 = vperm.xlu1 %1590, %v1137_v63   ;;  %1648 = vrcp.f32 %v1113_v5 }
0x11cf   :  { %v1649_v6 = vpop.eup %1648 }
0x11d0   :  { %v1117_v12 = vmul.f32 %v1649_v6, %v1050_v11 }
0x1233   :  { %v1120_v7 = vpop.permute.xlu1 %1119 }
0x1234   :  { %v1122_v8 = vmul.f32 %v1649_v6, %v1120_v7 }
0x1236   :  { %1124 = vrot.lane.b32.xlu0 %v1122_v8, %s1788_s18 }
0x1244   :  { %v1140_v17 = vpop.permute.xlu1 %1139 }
0x1245   :  { %vm1141_vm1 = vcmp.eq.s32.totalorder %v1140_v17, 1 }
0x12a8   :  { %v1125_v14 = vpop.permute.xlu0 %1124 }
0x12a9   :  { %v1127_v15 = vadd.f32 %v1125_v14, %v1117_v12 }
0x12ab   :  { %1650 = vtanh.f32 %v1127_v15  ;;  %v1143_v45 = vsel %vm1141_vm1, %v1127_v15, %v1050_v11 }
0x12b5   :  { %v1651_v16 = vpop.eup %1650 }
0x12b6   :  { %1130 = vrot.lane.b32.xlu0 %v1651_v16, %s1787_s17 }
0x1328   :  { %v1131_v18 = vpop.permute.xlu0 %1130 }
0x1329   :  { %v1133_v20 = vmul.f32 %v1649_v6, %v1131_v18 }
0x132b   :  { %v2132_v21 = vsel %vm1141_vm1, %v1133_v20, %v1049_v52  ;;  %v1144_v38 = vsel %vm1141_vm1, %v1133_v20, 0.0 }
0x132c   :  { %v1155_v22 = vpack.c.bf16 %v2132_v21, %v2132_v21  ;;  %v1357_v39 = vpack.c.bf16 %v1144_v38, %v1144_v38 }
0x132e   :  { %1157 = vrot.lane.b32.xlu1 %v1155_v22, %s1788_s18 }
0x13a0   :  { %v1158_v24 = vpop.permute.xlu1 %1157 }
0x13a1   :  { %1532 = vmatmul.mubr.msk.bf16.vlgmr.msra.gmra.mrb[12].mxu1 %vm61_vm0, %v1158_v24 }
0x1474   :  { %v1196_v27 = vpop.f32.mrb[12].mxu1 }
0x1475   :  { %v1542_v28 = vadd.f32 %v1942_v13, %v1196_v27  ;;  %v1533_v29 = vpop.f32.mrb[13].mxu1  ;;  %v772_v13 = vsel %vm769_vm8, %v2045_v32, 0.0 }
0x1476   :  { %v1199_v31 = vpop.f32.mrb[14].mxu1  ;;  %v1353_v9 = vpack.c.bf16 %v772_v13, %v772_v13 }
0x1477   :  { %1652 = vtanh.f32 %v1542_v28  ;;  %v1534_v33 = vpop.f32.mrb[15].mxu1  ;;  %v1348_v42 = vmul.f32 -1.442695, %v1542_v28 }
0x1479   :  { %1654 = vpow2.f32 %v1348_v42 }
0x1481   :  { %v1653_v34 = vpop.eup %1652 }
0x1482   :  { %1212 = vrot.lane.b32.xlu0 %v1653_v34, %s1787_s17 }
0x1483   :  { %v1655_v30 = vpop.eup %1654 }
0x1484   :  { %v1206_v32 = vadd.f32 1.0, %v1655_v30 }
0x1486   :  { %1232 = vperm.xlu0 %1591, %v1230_v35   ;;  %1656 = vrcp.f32 %v1206_v32 }
0x148a   :  { %591 = vrot.lane.b32.xlu0 %v1351_v37, %s1788_s18 }
0x148e   :  { %777 = vrot.lane.b32.xlu0 %v1353_v9, %s1788_s18 }
0x1490   :  { %v1657_v3 = vpop.eup %1656 }
0x1491   :  { %v1210_v46 = vmul.f32 %v1657_v3, %v1143_v45 }
0x1492   :  { %963 = vrot.lane.b32.xlu0 %v1355_v19, %s1788_s18 }
0x1496   :  { %1149 = vrot.lane.b32.xlu0 %v1357_v39, %s1788_s18 }
0x14f4   :  { %v1213_v40 = vpop.permute.xlu0 %1212 }
0x14f5   :  { %v1215_v10 = vmul.f32 %v1657_v3, %v1213_v40 }
0x14f7   :  { %1217 = vrot.lane.b32.xlu1 %v1215_v10, %s1788_s18 }
0x1505   :  { %v1233_v23 = vpop.permute.xlu0 %1232 }
0x1506   :  { %vm1234_vm4 = vcmp.eq.s32.totalorder %v1233_v23, 1 }
0x1509   :  { %v592_v26 = vpop.permute.xlu0 %591 }
0x150a   :  { %595 = vst.msk [vmem:[#allocation10] sm:$0xf] %vm594_vm3, %v592_v26 }
0x150d   :  { %v778_v41 = vpop.permute.xlu0 %777 }
0x150e   :  { %781 = vst.msk [vmem:[#allocation10 + $0x8] sm:$0xf] %vm594_vm3, %v778_v41 }
0x1511   :  { %v964_v43 = vpop.permute.xlu0 %963 }
0x1512   :  { %967 = vst.msk [vmem:[#allocation10 + $0x10] sm:$0xf] %vm594_vm3, %v964_v43 }
0x1515   :  { %v1150_v44 = vpop.permute.xlu0 %1149 }
0x1516   :  { %1153 = vst.msk [vmem:[#allocation10 + $0x18] sm:$0xf] %vm594_vm3, %v1150_v44 }
0x1569   :  { %v1218_v47 = vpop.permute.xlu1 %1217 }
0x156a   :  { %v1220_v48 = vadd.f32 %v1218_v47, %v1210_v46 }
0x156c   :  { %1658 = vtanh.f32 %v1220_v48  ;;  %v1236_v50 = vsel %vm1234_vm4, %v1220_v48, %v1143_v45 }
0x1576   :  { %v1659_v52 = vpop.eup %1658 }
0x1577   :  { %1223 = vrot.lane.b32.xlu1 %v1659_v52, %s1787_s17 }
0x157b   :  { %684 = vrot.lane.b32.xlu1 %v1352_v54, %s1788_s18 }
0x157f   :  { %870 = vrot.lane.b32.xlu1 %v1354_v57, %s1788_s18 }
0x1583   :  { %1056 = vrot.lane.b32.xlu1 %v1356_v60, %s1788_s18 }
0x15e9   :  { %v1224_v0 = vpop.permute.xlu1 %1223 }
0x15ea   :  { %v1226_v2 = vmul.f32 %v1657_v3, %v1224_v0 }
0x15ec   :  { %v1237_v61 = vsel %vm1234_vm4, %v1226_v2, 0.0  ;;  %v1235_v56 = vsel %vm1234_vm4, %v1226_v2, %v2132_v21 }
0x15ed   :  { %v1358_v58 = vpack.c.bf16 %v1237_v61, %v1237_v61  ;;  %1248 = vrot.lane.b32.xlu0 %v1235_v56, %s1788_s18  ;;  %v685_v62 = vpop.permute.xlu1 %684 }
0x15ee   :  { %688 = vst.msk [vmem:[#allocation10 + $0x4] sm:$0xf] %vm594_vm3, %v685_v62 }
0x15ef   :  { %1242 = vrot.lane.b32.xlu1 %v1358_v58, %s1788_s18 }
0x15f1   :  { %v871_v49 = vpop.permute.xlu1 %870 }
0x15f2   :  { %874 = vst.msk [vmem:[#allocation10 + $0xc] sm:$0xf] %vm594_vm3, %v871_v49 }
0x15f3   :  { %1253 = vrot.lane.b32.xlu1 %v1236_v50, %s1789_s20 }
0x15f5   :  { %v1057_v51 = vpop.permute.xlu1 %1056 }
0x15f6   :  { %1060 = vst.msk [vmem:[#allocation10 + $0x14] sm:$0xf] %vm594_vm3, %v1057_v51 }
0x165f   :  { %v1249_v63 = vpop.permute.xlu0 %1248 }
0x1660   :  { %1251 = vst.msk [vmem:[#allocation11] sm:$0xff] %vm61_vm0, %v1249_v63 }
0x1661   :  { %v1243_v1 = vpop.permute.xlu1 %1242 }
0x1662   :  { %1246 = vst.msk [vmem:[#allocation10 + $0x1c] sm:$0xf] %vm594_vm3, %v1243_v1 }
0x1665   :  { %v1254_v4 = vpop.permute.xlu1 %1253 }
0x1666   :  { %1256 = vst.msk [vmem:[#allocation13] sm:$0xff] %vm61_vm0, %v1254_v4 }
0x1667 PF:  { %s1790_s1 = smov [#allocation11]   ;;  %s1791_s22 = smov [#allocation10]  }
0x1668   :  { %s1275_s21 = sshll.u32 %s1790_s1, 4  ;;  %s1262_s23 = sshll.u32 %s1791_s22, 4  ;;  %s1276_s21 = int_to_ptr.vmem [resolvable:$true] %s1275_s21  ;;  %s2188_s23 = int_to_ptr.vmem [resolvable:$true] %s1262_s23 }
0x1669   :  { %s1704_s24 = scalar_lea.vmem %s1276_s21, 128  ;;  %p1709_p5 = scmp.lt.s32.totalorder %s1276_s21, %s1276_s21 }
0x166a   :  { %p1705_p4 = scmp.ne.s32.totalorder %s1276_s21, %s1704_s24  ;;  %p1710_p6 = scmp.lt.s32.totalorder %s1704_s24, %s1704_s24 }
0x166c   :  { %p1711_p7 = por %p1710_p6, %p1709_p5 }
0x166e   :  { %p1712_p8 = pnand %p1711_p7, %p1705_p4 }
0x1670   :  { %1715 = shalt.err (!%p1712_p8)
}
0x1671   :  { %s1716_s27 = scalar_lea.hbm %s2241_s7, 128 }
0x1672   :  { %p1717_p9 = scmp.ne.s32.totalorder %s2241_s7, %s1716_s27  ;;  %p1720_p10 = scmp.lt.u32.totalorder %s1716_s27, %s2241_s7 }
0x1674   :  { %p1722_p11 = pnand %p1720_p10, %p1717_p9 }
0x1676   :  { %1725 = shalt.err (!%p1722_p11)
}
0x1677   :  { %1278 = dma.vmem_to_hbm [thread:$0]  %s1276_s21, 128, %s2241_s7, [#allocation12]  }
0x1678   :  { %s1726_s10 = scalar_lea.vmem %s2188_s23, 512  ;;  %p1731_p13 = scmp.lt.s32.totalorder %s2188_s23, %s2188_s23 }
0x1679   :  { %p1727_p12 = scmp.ne.s32.totalorder %s2188_s23, %s1726_s10  ;;  %p1732_p0 = scmp.lt.s32.totalorder %s1726_s10, %s1726_s10 }
0x167b   :  { %p1733_p1 = por %p1732_p0, %p1731_p13 }
0x167d   :  { %p1734_p2 = pnand %p1733_p1, %p1727_p12 }
0x167f   :  { %1737 = shalt.err (!%p1734_p2)
}
0x1680   :  { %s1738_s13 = scalar_lea.hbm %s2240_s6, 512 }
0x1681   :  { %p1739_p3 = scmp.ne.s32.totalorder %s2240_s6, %s1738_s13  ;;  %p1742_p4 = scmp.lt.u32.totalorder %s1738_s13, %s2240_s6 }
0x1683   :  { %p1744_p5 = pnand %p1742_p4, %p1739_p3 }
0x1685   :  { %1747 = shalt.err (!%p1744_p5)
}
0x1686   :  { %1268 = dma.vmem_to_hbm [thread:$0]  %s2188_s23, 512, %s2240_s6, [#allocation7], %s1779_s15, %s1779_s15, %s1780_s16  }
0x1687   :  { %s1792_s5 = smov [#allocation13]  }
0x1688   :  { %s1285_s19 = sshll.u32 %s1792_s5, 4  ;;  %s1286_s19 = int_to_ptr.vmem [resolvable:$true] %s1285_s19 }
0x1689   :  { %s1748_s20 = scalar_lea.vmem %s1286_s19, 128  ;;  %p1753_p7 = scmp.lt.s32.totalorder %s1286_s19, %s1286_s19 }
0x168a   :  { %p1749_p6 = scmp.ne.s32.totalorder %s1286_s19, %s1748_s20  ;;  %p1754_p8 = scmp.lt.s32.totalorder %s1748_s20, %s1748_s20 }
0x168c   :  { %p1755_p9 = por %p1754_p8, %p1753_p7 }
0x168e   :  { %p1756_p10 = pnand %p1755_p9, %p1749_p6 }
0x1690   :  { %1759 = shalt.err (!%p1756_p10)
}
0x1691   :  { %s1760_s22 = scalar_lea.hbm %s2242_s8, 128 }
0x1692   :  { %p1761_p11 = scmp.ne.s32.totalorder %s2242_s8, %s1760_s22  ;;  %p1764_p12 = scmp.lt.u32.totalorder %s1760_s22, %s2242_s8 }
0x1694   :  { %p1766_p13 = pnand %p1764_p12, %p1761_p11 }
0x1696   :  { %1769 = shalt.err (!%p1766_p13)
}
0x1697   :  { %1288 = dma.vmem_to_hbm [thread:$0]  %s1286_s19, 128, %s2242_s8, [#allocation12]  }
0x1698   :  { %1774 = dma.done.wait [#allocation7], 512  }
0x1699   :  { %1775 = vsyncadd [#allocation7], 4294966784 }
0x169a   :  { %1776 = dma.done.wait [#allocation12], 256  }
0x169b   :  { %1777 = vsyncadd [#allocation12], 4294967040 }
0x169c   :  { %1298 = vsyncpa [#allocation6], 1 }
0x169d   :  { %1299 = vsyncpa [#allocation9], 1 }
0x169e   :  { %1300 = vsyncpa [#allocation7], 1 }
0x169f   :  { %1301 = vsyncpa [#allocation12], 1 }

</bundles_post_ra>
